<compile_context>
chip_gen: v5e
topology: v5e:2x2
jax: 0.10.0
libtpu: 0.0.40
codegen_flags: <defaults>
</compile_context>

<pallas_src>
import functools

import jax
import jax.numpy as jnp
from jax.experimental import pallas as pl
from jax.experimental.pallas import tpu as pltpu


CONV_DIMS = ((3, 64), (64, 128), (128, 64), (64, 32))   # (Cin, Cout) per conv
POOL_AVG = (False, False, True, True)                   # Max, Max, Avg, Avg
DROP_PS = (0.5, 0.2, 0.1)                               # dropout2d after layers 1..3


# ------------------------------ Pallas kernel ------------------------------

def fused_embedder_kernel(p_ref,
                          w1_ref, b1_ref, m1_ref,
                          w2_ref, b2_ref, m2_ref,
                          w3_ref, b3_ref, m3_ref,
                          w4_ref, b4_ref,
                          fc1w_ref, fc1b_ref, fc2w_ref, fc2b_ref,
                          o_ref, *, input_hw, conv_ks, pool_ks, pool_avg):
    """Whole Embedder forward for one sample (grid is over batch).

    Activations are 2-D (row, channel) with row = h * P + w, P = input width.
    """
    H, W = input_hw
    P = W                                     # row pitch of the flattened layout

    w_refs = (None, w2_ref, w3_ref, w4_ref)
    b_refs = (None, b2_ref, b3_ref, b4_ref)
    m_refs = (m1_ref, m2_ref, m3_ref, None)   # no dropout after layer 4

    # ---- layer-1 conv: ONE im2col matmul over the full flattened grid ----
    # p_ref[0]: (H*W, k1*k1*3) bf16;  w1: (k1*k1*3, 64) bf16  ->  M = H*W.
    y = jnp.dot(p_ref[0], w1_ref[...], preferred_element_type=jnp.float32)
    y = y + b1_ref[...]
    hv, wv = H - conv_ks[0] + 1, W - conv_ks[0] + 1       # valid (h, w) extent

    for li in range(4):
        if li > 0:
            # conv: kc*kc accumulated (rows, Cin)@(Cin, Cout) 2-D matmuls on
            # row-shifted views; bias added once after the tap loop.
            kc = conv_ks[li]
            hv2, wv2 = hv - kc + 1, wv - kc + 1
            L = (hv2 - 1) * P + wv2
            xb = y.astype(jnp.bfloat16)
            acc = None
            for i in range(kc):
                for j in range(kc):
                    s0 = i * P + j
                    t = jnp.dot(xb[s0:s0 + L, :], w_refs[li][i, j],
                                preferred_element_type=jnp.float32)
                    acc = t if acc is None else acc + t
            y = acc + b_refs[li][...]
            hv, wv = hv2, wv2

        # stride-1 "valid" pooling, then ReLU, then dropout2d channel scale
        # (matches the module's relu(pool(conv(x))) ordering).
        kp = pool_ks[li]
        hv2, wv2 = hv - kp + 1, wv - kp + 1
        Lp = (hv2 - 1) * P + wv2
        pooled = None
        for i in range(kp):
            for j in range(kp):
                s0 = i * P + j
                t = y[s0:s0 + Lp, :]
                if pooled is None:
                    pooled = t
                elif pool_avg[li]:
                    pooled = pooled + t
                else:
                    pooled = jnp.maximum(pooled, t)
        if pool_avg[li]:
            pooled = pooled * (1.0 / float(kp * kp))
        y = jnp.maximum(pooled, 0.0)                       # relu (after pool)
        if m_refs[li] is not None:
            y = y * m_refs[li][0]                          # (1, C) channel mask
        hv, wv = hv2, wv2

    # ---- fc1 + relu, fc2 + sigmoid ----
    # fc1 weight rows were pre-permuted (NCHW-flatten -> NHWC-flatten) and
    # split per spatial position, so the flatten is just gathering the Hf*Wf
    # valid rows -- no lane-axis concat / reshape on the hot path.
    Hf, Wf = hv, wv
    yb = y.astype(jnp.bfloat16)
    h1 = fc1b_ref[...]                                     # (1, 256) f32
    for h in range(Hf):
        for w in range(Wf):
            r = h * P + w
            h1 = h1 + jnp.dot(yb[r:r + 1, :], fc1w_ref[h * Wf + w],
                              preferred_element_type=jnp.float32)
    h1 = jnp.maximum(h1, 0.0).astype(jnp.bfloat16)
    z = jnp.dot(h1, fc2w_ref[...], preferred_element_type=jnp.float32)
    z = z + fc2b_ref[...]
    o_ref[...] = (1.0 / (1.0 + jnp.exp(-z))).reshape(1, 1, -1)   # exact sigmoid


# ------------------------------ params / prep ------------------------------

def init_embedder_params(key, input_size, kernel_sizes):
    conv_ks = kernel_sizes[0::2]
    params = {}
    keys = jax.random.split(key, 12)
    for idx, ((cin, cout), k) in enumerate(zip(CONV_DIMS, conv_ks)):
        wk, bk = keys[2 * idx], keys[2 * idx + 1]
        fan_in = float(cin * k * k)
        params[f"conv{idx + 1}_w"] = (
            jax.random.normal(wk, (k, k, cin, cout), jnp.float32) / jnp.sqrt(fan_in))
        params[f"conv{idx + 1}_b"] = jax.random.normal(bk, (cout,), jnp.float32) * 0.01
    size_reduction = sum(kernel_sizes) - len(kernel_sizes)
    fc_in = (input_size[0] - size_reduction) * (input_size[1] - size_reduction) * 32
    # fc1_w rows stored in PyTorch NCHW-flatten order (as nn.Linear sees them
    # after x.view(-1, fc_in)); prepare_embedder_weights permutes them once.
    params["fc1_w"] = jax.random.normal(keys[8], (fc_in, 256), jnp.float32) / jnp.sqrt(float(fc_in))
    params["fc1_b"] = jax.random.normal(keys[9], (256,), jnp.float32) * 0.01
    params["fc2_w"] = jax.random.normal(keys[10], (256, 128), jnp.float32) / jnp.sqrt(256.0)
    params["fc2_b"] = jax.random.normal(keys[11], (128,), jnp.float32) * 0.01
    return params, fc_in


def prepare_embedder_weights(params, input_size, kernel_sizes):
    """One-time (hoisted) weight prep: bf16 casts, conv1 im2col weight flatten,
    fc1 row permutation NCHW-flatten -> NHWC-flatten (done once, not per call)."""
    conv_ks = kernel_sizes[0::2]
    pool_ks = kernel_sizes[1::2]
    k1, cin1 = conv_ks[0], params["conv1_w"].shape[2]
    prep = {
        "w1": params["conv1_w"].reshape(k1 * k1 * cin1, -1).astype(jnp.bfloat16),
        "b1": params["conv1_b"].reshape(1, -1).astype(jnp.float32),
    }
    for li in (2, 3, 4):
        prep[f"w{li}"] = params[f"conv{li}_w"].astype(jnp.bfloat16)
        prep[f"b{li}"] = params[f"conv{li}_b"].reshape(1, -1).astype(jnp.float32)
    hf, wf = input_size
    for kc, kp in zip(conv_ks, pool_ks):
        hf, wf = hf - kc - kp + 2, wf - kc - kp + 2
    cf = params["conv4_w"].shape[-1]
    nh = params["fc1_w"].shape[-1]
    prep["fc1w"] = (params["fc1_w"].reshape(cf, hf, wf, nh)
                    .transpose(1, 2, 0, 3)
                    .reshape(hf * wf, cf, nh).astype(jnp.bfloat16))   # (Hf*Wf, Cf, 256)
    prep["fc1b"] = params["fc1_b"].reshape(1, -1).astype(jnp.float32)
    prep["fc2w"] = params["fc2_w"].astype(jnp.bfloat16)
    prep["fc2b"] = params["fc2_b"].reshape(1, -1).astype(jnp.float32)
    return prep


# ------------------------------ forward ------------------------------

@functools.partial(jax.jit, static_argnames=("input_size", "kernel_sizes", "training"))
def embedder_forward(prep, x_nchw, dropout_key, *, input_size, kernel_sizes, training=True):
    conv_ks = tuple(kernel_sizes[0::2])
    pool_ks = tuple(kernel_sizes[1::2])
    H, W = input_size
    N = x_nchw.shape[0]
    k1 = conv_ks[0]

    # conv1 im2col patches over the full flattened (h*W + w) grid; this folds
    # the NCHW->NHWC transpose into the patch build.  Wrapped taps only land in
    # positions that are invalid for the conv output, so they never matter.
    x = jnp.transpose(x_nchw, (0, 2, 3, 1)).astype(jnp.float32)          # NHWC
    taps = [jnp.roll(x, (-i, -j), axis=(1, 2)) for i in range(k1) for j in range(k1)]
    patches = (jnp.concatenate(taps, axis=-1)
               .reshape(N, H * W, k1 * k1 * x.shape[-1])
               .astype(jnp.bfloat16))                                    # (N, H*W, 27)

    # dropout2d channel masks with values in {0, 1/(1-p)} after layers 1..3.
    dkeys = jax.random.split(dropout_key, len(DROP_PS))
    masks = []
    for dk, p, (_, c) in zip(dkeys, DROP_PS, CONV_DIMS[:3]):
        if training and p > 0.0:
            keep = jax.random.bernoulli(dk, 1.0 - p, (N, 1, c)).astype(jnp.float32)
            masks.append(keep * (1.0 / (1.0 - p)))
        else:
            masks.append(jnp.ones((N, 1, c), jnp.float32))

    full = lambda a: pl.BlockSpec(a.shape, lambda n: (0,) * a.ndim)
    per_n = lambda a: pl.BlockSpec((1,) + a.shape[1:],
                                   lambda n: (n,) + (0,) * (a.ndim - 1))

    args = [patches,
            prep["w1"], prep["b1"], masks[0],
            prep["w2"], prep["b2"], masks[1],
            prep["w3"], prep["b3"], masks[2],
            prep["w4"], prep["b4"],
            prep["fc1w"], prep["fc1b"], prep["fc2w"], prep["fc2b"]]
    in_specs = [per_n(patches),
                full(prep["w1"]), full(prep["b1"]), per_n(masks[0]),
                full(prep["w2"]), full(prep["b2"]), per_n(masks[1]),
                full(prep["w3"]), full(prep["b3"]), per_n(masks[2]),
                full(prep["w4"]), full(prep["b4"]),
                full(prep["fc1w"]), full(prep["fc1b"]),
                full(prep["fc2w"]), full(prep["fc2b"])]

    n_out = prep["fc2w"].shape[-1]
    kern = functools.partial(fused_embedder_kernel,
                             input_hw=(H, W), conv_ks=conv_ks,
                             pool_ks=pool_ks, pool_avg=POOL_AVG)
    out = pl.pallas_call(
        kern,
        out_shape=jax.ShapeDtypeStruct((N, 1, n_out), jnp.float32),
        grid=(N,),
        in_specs=in_specs,
        out_specs=pl.BlockSpec((1, 1, n_out), lambda n: (n, 0, 0)),
        compiler_params=pltpu.CompilerParams(
            dimension_semantics=("parallel",)),          # megacore: split batch
    )(*args)
    return out.reshape(N, n_out)


# ------------------------------------ main ------------------------------------

if __name__ == "__main__":
    input_size = (16, 16)
    kernel_sizes = (3, 2, 3, 2, 3, 2, 3, 2)   # conv/pool kernel sizes, alternating
    key = jax.random.PRNGKey(0)
    pkey, xkey, dkey = jax.random.split(key, 3)

    params, fc_in = init_embedder_params(pkey, input_size, kernel_sizes)
    prep = prepare_embedder_weights(params, input_size, kernel_sizes)   # hoisted, once
    x = jax.random.normal(xkey, (2, 3, input_size[0], input_size[1]), jnp.float32)  # NCHW

    out = embedder_forward(prep, x, dkey,
                           input_size=input_size, kernel_sizes=kernel_sizes)
    out = jax.block_until_ready(out)

    assert out.shape == (2, 128), out.shape
    assert bool(jnp.all(jnp.isfinite(out)))
    assert bool(jnp.all((out >= 0.0) & (out <= 1.0)))   # sigmoid output range
    print("KERNEL_OK")
</pallas_src>

<mosaic_0001>
module attributes {stable_mosaic.version = 11 : i64} {
  func.func @fused_embedder_kernel(%arg0: i32, %arg1: memref<1x256x27xbf16, #tpu.memory_space<vmem>>, %arg2: memref<27x64xbf16, #tpu.memory_space<vmem>>, %arg3: memref<1x64xf32, #tpu.memory_space<vmem>>, %arg4: memref<1x1x64xf32, #tpu.memory_space<vmem>>, %arg5: memref<3x3x64x128xbf16, #tpu.memory_space<vmem>>, %arg6: memref<1x128xf32, #tpu.memory_space<vmem>>, %arg7: memref<1x1x128xf32, #tpu.memory_space<vmem>>, %arg8: memref<3x3x128x64xbf16, #tpu.memory_space<vmem>>, %arg9: memref<1x64xf32, #tpu.memory_space<vmem>>, %arg10: memref<1x1x64xf32, #tpu.memory_space<vmem>>, %arg11: memref<3x3x64x32xbf16, #tpu.memory_space<vmem>>, %arg12: memref<1x32xf32, #tpu.memory_space<vmem>>, %arg13: memref<16x32x256xbf16, #tpu.memory_space<vmem>>, %arg14: memref<1x256xf32, #tpu.memory_space<vmem>>, %arg15: memref<256x128xbf16, #tpu.memory_space<vmem>>, %arg16: memref<1x128xf32, #tpu.memory_space<vmem>>, %arg17: memref<1x1x128xf32, #tpu.memory_space<vmem>>) attributes {dimension_semantics = [#tpu.dimension_semantics<parallel>], iteration_bounds = array<i64: 2>, scalar_prefetch = 0 : i64, scratch_operands = 0 : i64, tpu.core_type = #tpu.core_type<tc>, window_params = [{transform_indices = @transform_0, window_bounds = array<i64: 1, 256, 27>}, {pipeline_mode = #tpu.pipeline_mode<synchronous>, transform_indices = @transform_1, window_bounds = array<i64: 27, 64>}, {pipeline_mode = #tpu.pipeline_mode<synchronous>, transform_indices = @transform_2, window_bounds = array<i64: 1, 64>}, {transform_indices = @transform_3, window_bounds = array<i64: 1, 1, 64>}, {pipeline_mode = #tpu.pipeline_mode<synchronous>, transform_indices = @transform_4, window_bounds = array<i64: 3, 3, 64, 128>}, {pipeline_mode = #tpu.pipeline_mode<synchronous>, transform_indices = @transform_5, window_bounds = array<i64: 1, 128>}, {transform_indices = @transform_6, window_bounds = array<i64: 1, 1, 128>}, {pipeline_mode = #tpu.pipeline_mode<synchronous>, transform_indices = @transform_7, window_bounds = array<i64: 3, 3, 128, 64>}, {pipeline_mode = #tpu.pipeline_mode<synchronous>, transform_indices = @transform_8, window_bounds = array<i64: 1, 64>}, {transform_indices = @transform_9, window_bounds = array<i64: 1, 1, 64>}, {pipeline_mode = #tpu.pipeline_mode<synchronous>, transform_indices = @transform_10, window_bounds = array<i64: 3, 3, 64, 32>}, {pipeline_mode = #tpu.pipeline_mode<synchronous>, transform_indices = @transform_11, window_bounds = array<i64: 1, 32>}, {pipeline_mode = #tpu.pipeline_mode<synchronous>, transform_indices = @transform_12, window_bounds = array<i64: 16, 32, 256>}, {pipeline_mode = #tpu.pipeline_mode<synchronous>, transform_indices = @transform_13, window_bounds = array<i64: 1, 256>}, {pipeline_mode = #tpu.pipeline_mode<synchronous>, transform_indices = @transform_14, window_bounds = array<i64: 256, 128>}, {pipeline_mode = #tpu.pipeline_mode<synchronous>, transform_indices = @transform_15, window_bounds = array<i64: 1, 128>}, {transform_indices = @transform_16, window_bounds = array<i64: 1, 1, 128>}]} {
    %c0 = arith.constant 0 : index
    %c0_0 = arith.constant 0 : index
    %c0_1 = arith.constant 0 : index
    %0 = vector.load %arg1[%c0, %c0_0, %c0_1] : memref<1x256x27xbf16, #tpu.memory_space<vmem>>, vector<1x256x27xbf16>
    %1 = vector.shape_cast %0 : vector<1x256x27xbf16> to vector<256x27xbf16>
    %c0_2 = arith.constant 0 : index
    %c0_3 = arith.constant 0 : index
    %2 = vector.load %arg2[%c0_2, %c0_3] : memref<27x64xbf16, #tpu.memory_space<vmem>>, vector<27x64xbf16>
    %cst = arith.constant dense<0.000000e+00> : vector<256x64xf32>
    %3 = tpu.matmul %1, %2, %cst {dimension_numbers = #tpu.dot_dimension_numbers<[1], [0], [0], [1], [0, 0, 1, 1], [], []>} : vector<256x27xbf16>, vector<27x64xbf16>, vector<256x64xf32> -> vector<256x64xf32>
    %c0_4 = arith.constant 0 : index
    %c0_5 = arith.constant 0 : index
    %4 = vector.load %arg3[%c0_4, %c0_5] : memref<1x64xf32, #tpu.memory_space<vmem>>, vector<1x64xf32>
    %5 = vector.broadcast %4 : vector<1x64xf32> to vector<256x64xf32>
    %6 = arith.addf %3, %5 : vector<256x64xf32>
    %7 = vector.extract_strided_slice %6 {offsets = [0, 0], sizes = [205, 64], strides = [1, 1]} : vector<256x64xf32> to vector<205x64xf32>
    %8 = vector.extract_strided_slice %6 {offsets = [1, 0], sizes = [205, 64], strides = [1, 1]} : vector<256x64xf32> to vector<205x64xf32>
    %9 = arith.maximumf %7, %8 : vector<205x64xf32>
    %10 = vector.extract_strided_slice %6 {offsets = [16, 0], sizes = [205, 64], strides = [1, 1]} : vector<256x64xf32> to vector<205x64xf32>
    %11 = arith.maximumf %9, %10 : vector<205x64xf32>
    %12 = vector.extract_strided_slice %6 {offsets = [17, 0], sizes = [205, 64], strides = [1, 1]} : vector<256x64xf32> to vector<205x64xf32>
    %13 = arith.maximumf %11, %12 : vector<205x64xf32>
    %cst_6 = arith.constant 0.000000e+00 : f32
    %14 = vector.broadcast %cst_6 : f32 to vector<205x64xf32>
    %15 = arith.maximumf %13, %14 : vector<205x64xf32>
    %c0_7 = arith.constant 0 : index
    %c0_8 = arith.constant 0 : index
    %c0_9 = arith.constant 0 : index
    %16 = vector.load %arg4[%c0_7, %c0_8, %c0_9] : memref<1x1x64xf32, #tpu.memory_space<vmem>>, vector<1x1x64xf32>
    %17 = vector.shape_cast %16 : vector<1x1x64xf32> to vector<1x64xf32>
    %18 = vector.broadcast %17 : vector<1x64xf32> to vector<205x64xf32>
    %19 = arith.mulf %15, %18 : vector<205x64xf32>
    %20 = arith.truncf %19 : vector<205x64xf32> to vector<205x64xbf16>
    %21 = vector.extract_strided_slice %20 {offsets = [0, 0], sizes = [171, 64], strides = [1, 1]} : vector<205x64xbf16> to vector<171x64xbf16>
    %c0_10 = arith.constant 0 : index
    %c0_11 = arith.constant 0 : index
    %c0_12 = arith.constant 0 : index
    %c0_13 = arith.constant 0 : index
    %22 = vector.load %arg5[%c0_10, %c0_11, %c0_12, %c0_13] : memref<3x3x64x128xbf16, #tpu.memory_space<vmem>>, vector<1x1x64x128xbf16>
    %23 = vector.shape_cast %22 : vector<1x1x64x128xbf16> to vector<64x128xbf16>
    %cst_14 = arith.constant dense<0.000000e+00> : vector<171x128xf32>
    %24 = tpu.matmul %21, %23, %cst_14 {dimension_numbers = #tpu.dot_dimension_numbers<[1], [0], [0], [1], [0, 0, 1, 1], [], []>} : vector<171x64xbf16>, vector<64x128xbf16>, vector<171x128xf32> -> vector<171x128xf32>
    %25 = vector.extract_strided_slice %20 {offsets = [1, 0], sizes = [171, 64], strides = [1, 1]} : vector<205x64xbf16> to vector<171x64xbf16>
    %c0_15 = arith.constant 0 : index
    %c1 = arith.constant 1 : index
    %c0_16 = arith.constant 0 : index
    %c0_17 = arith.constant 0 : index
    %26 = vector.load %arg5[%c0_15, %c1, %c0_16, %c0_17] : memref<3x3x64x128xbf16, #tpu.memory_space<vmem>>, vector<1x1x64x128xbf16>
    %27 = vector.shape_cast %26 : vector<1x1x64x128xbf16> to vector<64x128xbf16>
    %cst_18 = arith.constant dense<0.000000e+00> : vector<171x128xf32>
    %28 = tpu.matmul %25, %27, %cst_18 {dimension_numbers = #tpu.dot_dimension_numbers<[1], [0], [0], [1], [0, 0, 1, 1], [], []>} : vector<171x64xbf16>, vector<64x128xbf16>, vector<171x128xf32> -> vector<171x128xf32>
    %29 = arith.addf %24, %28 : vector<171x128xf32>
    %30 = vector.extract_strided_slice %20 {offsets = [2, 0], sizes = [171, 64], strides = [1, 1]} : vector<205x64xbf16> to vector<171x64xbf16>
    %c0_19 = arith.constant 0 : index
    %c2 = arith.constant 2 : index
    %c0_20 = arith.constant 0 : index
    %c0_21 = arith.constant 0 : index
    %31 = vector.load %arg5[%c0_19, %c2, %c0_20, %c0_21] : memref<3x3x64x128xbf16, #tpu.memory_space<vmem>>, vector<1x1x64x128xbf16>
    %32 = vector.shape_cast %31 : vector<1x1x64x128xbf16> to vector<64x128xbf16>
    %cst_22 = arith.constant dense<0.000000e+00> : vector<171x128xf32>
    %33 = tpu.matmul %30, %32, %cst_22 {dimension_numbers = #tpu.dot_dimension_numbers<[1], [0], [0], [1], [0, 0, 1, 1], [], []>} : vector<171x64xbf16>, vector<64x128xbf16>, vector<171x128xf32> -> vector<171x128xf32>
    %34 = arith.addf %29, %33 : vector<171x128xf32>
    %35 = vector.extract_strided_slice %20 {offsets = [16, 0], sizes = [171, 64], strides = [1, 1]} : vector<205x64xbf16> to vector<171x64xbf16>
    %c1_23 = arith.constant 1 : index
    %c0_24 = arith.constant 0 : index
    %c0_25 = arith.constant 0 : index
    %c0_26 = arith.constant 0 : index
    %36 = vector.load %arg5[%c1_23, %c0_24, %c0_25, %c0_26] : memref<3x3x64x128xbf16, #tpu.memory_space<vmem>>, vector<1x1x64x128xbf16>
    %37 = vector.shape_cast %36 : vector<1x1x64x128xbf16> to vector<64x128xbf16>
    %cst_27 = arith.constant dense<0.000000e+00> : vector<171x128xf32>
    %38 = tpu.matmul %35, %37, %cst_27 {dimension_numbers = #tpu.dot_dimension_numbers<[1], [0], [0], [1], [0, 0, 1, 1], [], []>} : vector<171x64xbf16>, vector<64x128xbf16>, vector<171x128xf32> -> vector<171x128xf32>
    %39 = arith.addf %34, %38 : vector<171x128xf32>
    %40 = vector.extract_strided_slice %20 {offsets = [17, 0], sizes = [171, 64], strides = [1, 1]} : vector<205x64xbf16> to vector<171x64xbf16>
    %c1_28 = arith.constant 1 : index
    %c1_29 = arith.constant 1 : index
    %c0_30 = arith.constant 0 : index
    %c0_31 = arith.constant 0 : index
    %41 = vector.load %arg5[%c1_28, %c1_29, %c0_30, %c0_31] : memref<3x3x64x128xbf16, #tpu.memory_space<vmem>>, vector<1x1x64x128xbf16>
    %42 = vector.shape_cast %41 : vector<1x1x64x128xbf16> to vector<64x128xbf16>
    %cst_32 = arith.constant dense<0.000000e+00> : vector<171x128xf32>
    %43 = tpu.matmul %40, %42, %cst_32 {dimension_numbers = #tpu.dot_dimension_numbers<[1], [0], [0], [1], [0, 0, 1, 1], [], []>} : vector<171x64xbf16>, vector<64x128xbf16>, vector<171x128xf32> -> vector<171x128xf32>
    %44 = arith.addf %39, %43 : vector<171x128xf32>
    %45 = vector.extract_strided_slice %20 {offsets = [18, 0], sizes = [171, 64], strides = [1, 1]} : vector<205x64xbf16> to vector<171x64xbf16>
    %c1_33 = arith.constant 1 : index
    %c2_34 = arith.constant 2 : index
    %c0_35 = arith.constant 0 : index
    %c0_36 = arith.constant 0 : index
    %46 = vector.load %arg5[%c1_33, %c2_34, %c0_35, %c0_36] : memref<3x3x64x128xbf16, #tpu.memory_space<vmem>>, vector<1x1x64x128xbf16>
    %47 = vector.shape_cast %46 : vector<1x1x64x128xbf16> to vector<64x128xbf16>
    %cst_37 = arith.constant dense<0.000000e+00> : vector<171x128xf32>
    %48 = tpu.matmul %45, %47, %cst_37 {dimension_numbers = #tpu.dot_dimension_numbers<[1], [0], [0], [1], [0, 0, 1, 1], [], []>} : vector<171x64xbf16>, vector<64x128xbf16>, vector<171x128xf32> -> vector<171x128xf32>
    %49 = arith.addf %44, %48 : vector<171x128xf32>
    %50 = vector.extract_strided_slice %20 {offsets = [32, 0], sizes = [171, 64], strides = [1, 1]} : vector<205x64xbf16> to vector<171x64xbf16>
    %c2_38 = arith.constant 2 : index
    %c0_39 = arith.constant 0 : index
    %c0_40 = arith.constant 0 : index
    %c0_41 = arith.constant 0 : index
    %51 = vector.load %arg5[%c2_38, %c0_39, %c0_40, %c0_41] : memref<3x3x64x128xbf16, #tpu.memory_space<vmem>>, vector<1x1x64x128xbf16>
    %52 = vector.shape_cast %51 : vector<1x1x64x128xbf16> to vector<64x128xbf16>
    %cst_42 = arith.constant dense<0.000000e+00> : vector<171x128xf32>
    %53 = tpu.matmul %50, %52, %cst_42 {dimension_numbers = #tpu.dot_dimension_numbers<[1], [0], [0], [1], [0, 0, 1, 1], [], []>} : vector<171x64xbf16>, vector<64x128xbf16>, vector<171x128xf32> -> vector<171x128xf32>
    %54 = arith.addf %49, %53 : vector<171x128xf32>
    %55 = vector.extract_strided_slice %20 {offsets = [33, 0], sizes = [171, 64], strides = [1, 1]} : vector<205x64xbf16> to vector<171x64xbf16>
    %c2_43 = arith.constant 2 : index
    %c1_44 = arith.constant 1 : index
    %c0_45 = arith.constant 0 : index
    %c0_46 = arith.constant 0 : index
    %56 = vector.load %arg5[%c2_43, %c1_44, %c0_45, %c0_46] : memref<3x3x64x128xbf16, #tpu.memory_space<vmem>>, vector<1x1x64x128xbf16>
    %57 = vector.shape_cast %56 : vector<1x1x64x128xbf16> to vector<64x128xbf16>
    %cst_47 = arith.constant dense<0.000000e+00> : vector<171x128xf32>
    %58 = tpu.matmul %55, %57, %cst_47 {dimension_numbers = #tpu.dot_dimension_numbers<[1], [0], [0], [1], [0, 0, 1, 1], [], []>} : vector<171x64xbf16>, vector<64x128xbf16>, vector<171x128xf32> -> vector<171x128xf32>
    %59 = arith.addf %54, %58 : vector<171x128xf32>
    %60 = vector.extract_strided_slice %20 {offsets = [34, 0], sizes = [171, 64], strides = [1, 1]} : vector<205x64xbf16> to vector<171x64xbf16>
    %c2_48 = arith.constant 2 : index
    %c2_49 = arith.constant 2 : index
    %c0_50 = arith.constant 0 : index
    %c0_51 = arith.constant 0 : index
    %61 = vector.load %arg5[%c2_48, %c2_49, %c0_50, %c0_51] : memref<3x3x64x128xbf16, #tpu.memory_space<vmem>>, vector<1x1x64x128xbf16>
    %62 = vector.shape_cast %61 : vector<1x1x64x128xbf16> to vector<64x128xbf16>
    %cst_52 = arith.constant dense<0.000000e+00> : vector<171x128xf32>
    %63 = tpu.matmul %60, %62, %cst_52 {dimension_numbers = #tpu.dot_dimension_numbers<[1], [0], [0], [1], [0, 0, 1, 1], [], []>} : vector<171x64xbf16>, vector<64x128xbf16>, vector<171x128xf32> -> vector<171x128xf32>
    %64 = arith.addf %59, %63 : vector<171x128xf32>
    %c0_53 = arith.constant 0 : index
    %c0_54 = arith.constant 0 : index
    %65 = vector.load %arg6[%c0_53, %c0_54] : memref<1x128xf32, #tpu.memory_space<vmem>>, vector<1x128xf32>
    %66 = vector.broadcast %65 : vector<1x128xf32> to vector<171x128xf32>
    %67 = arith.addf %64, %66 : vector<171x128xf32>
    %68 = vector.extract_strided_slice %67 {offsets = [0, 0], sizes = [154, 128], strides = [1, 1]} : vector<171x128xf32> to vector<154x128xf32>
    %69 = vector.extract_strided_slice %67 {offsets = [1, 0], sizes = [154, 128], strides = [1, 1]} : vector<171x128xf32> to vector<154x128xf32>
    %70 = arith.maximumf %68, %69 : vector<154x128xf32>
    %71 = vector.extract_strided_slice %67 {offsets = [16, 0], sizes = [154, 128], strides = [1, 1]} : vector<171x128xf32> to vector<154x128xf32>
    %72 = arith.maximumf %70, %71 : vector<154x128xf32>
    %73 = vector.extract_strided_slice %67 {offsets = [17, 0], sizes = [154, 128], strides = [1, 1]} : vector<171x128xf32> to vector<154x128xf32>
    %74 = arith.maximumf %72, %73 : vector<154x128xf32>
    %cst_55 = arith.constant 0.000000e+00 : f32
    %75 = vector.broadcast %cst_55 : f32 to vector<154x128xf32>
    %76 = arith.maximumf %74, %75 : vector<154x128xf32>
    %c0_56 = arith.constant 0 : index
    %c0_57 = arith.constant 0 : index
    %c0_58 = arith.constant 0 : index
    %77 = vector.load %arg7[%c0_56, %c0_57, %c0_58] : memref<1x1x128xf32, #tpu.memory_space<vmem>>, vector<1x1x128xf32>
    %78 = vector.shape_cast %77 : vector<1x1x128xf32> to vector<1x128xf32>
    %79 = vector.broadcast %78 : vector<1x128xf32> to vector<154x128xf32>
    %80 = arith.mulf %76, %79 : vector<154x128xf32>
    %81 = arith.truncf %80 : vector<154x128xf32> to vector<154x128xbf16>
    %82 = vector.extract_strided_slice %81 {offsets = [0, 0], sizes = [120, 128], strides = [1, 1]} : vector<154x128xbf16> to vector<120x128xbf16>
    %c0_59 = arith.constant 0 : index
    %c0_60 = arith.constant 0 : index
    %c0_61 = arith.constant 0 : index
    %c0_62 = arith.constant 0 : index
    %83 = vector.load %arg8[%c0_59, %c0_60, %c0_61, %c0_62] : memref<3x3x128x64xbf16, #tpu.memory_space<vmem>>, vector<1x1x128x64xbf16>
    %84 = vector.shape_cast %83 : vector<1x1x128x64xbf16> to vector<128x64xbf16>
    %cst_63 = arith.constant dense<0.000000e+00> : vector<120x64xf32>
    %85 = tpu.matmul %82, %84, %cst_63 {dimension_numbers = #tpu.dot_dimension_numbers<[1], [0], [0], [1], [0, 0, 1, 1], [], []>} : vector<120x128xbf16>, vector<128x64xbf16>, vector<120x64xf32> -> vector<120x64xf32>
    %86 = vector.extract_strided_slice %81 {offsets = [1, 0], sizes = [120, 128], strides = [1, 1]} : vector<154x128xbf16> to vector<120x128xbf16>
    %c0_64 = arith.constant 0 : index
    %c1_65 = arith.constant 1 : index
    %c0_66 = arith.constant 0 : index
    %c0_67 = arith.constant 0 : index
    %87 = vector.load %arg8[%c0_64, %c1_65, %c0_66, %c0_67] : memref<3x3x128x64xbf16, #tpu.memory_space<vmem>>, vector<1x1x128x64xbf16>
    %88 = vector.shape_cast %87 : vector<1x1x128x64xbf16> to vector<128x64xbf16>
    %cst_68 = arith.constant dense<0.000000e+00> : vector<120x64xf32>
    %89 = tpu.matmul %86, %88, %cst_68 {dimension_numbers = #tpu.dot_dimension_numbers<[1], [0], [0], [1], [0, 0, 1, 1], [], []>} : vector<120x128xbf16>, vector<128x64xbf16>, vector<120x64xf32> -> vector<120x64xf32>
    %90 = arith.addf %85, %89 : vector<120x64xf32>
    %91 = vector.extract_strided_slice %81 {offsets = [2, 0], sizes = [120, 128], strides = [1, 1]} : vector<154x128xbf16> to vector<120x128xbf16>
    %c0_69 = arith.constant 0 : index
    %c2_70 = arith.constant 2 : index
    %c0_71 = arith.constant 0 : index
    %c0_72 = arith.constant 0 : index
    %92 = vector.load %arg8[%c0_69, %c2_70, %c0_71, %c0_72] : memref<3x3x128x64xbf16, #tpu.memory_space<vmem>>, vector<1x1x128x64xbf16>
    %93 = vector.shape_cast %92 : vector<1x1x128x64xbf16> to vector<128x64xbf16>
    %cst_73 = arith.constant dense<0.000000e+00> : vector<120x64xf32>
    %94 = tpu.matmul %91, %93, %cst_73 {dimension_numbers = #tpu.dot_dimension_numbers<[1], [0], [0], [1], [0, 0, 1, 1], [], []>} : vector<120x128xbf16>, vector<128x64xbf16>, vector<120x64xf32> -> vector<120x64xf32>
    %95 = arith.addf %90, %94 : vector<120x64xf32>
    %96 = vector.extract_strided_slice %81 {offsets = [16, 0], sizes = [120, 128], strides = [1, 1]} : vector<154x128xbf16> to vector<120x128xbf16>
    %c1_74 = arith.constant 1 : index
    %c0_75 = arith.constant 0 : index
    %c0_76 = arith.constant 0 : index
    %c0_77 = arith.constant 0 : index
    %97 = vector.load %arg8[%c1_74, %c0_75, %c0_76, %c0_77] : memref<3x3x128x64xbf16, #tpu.memory_space<vmem>>, vector<1x1x128x64xbf16>
    %98 = vector.shape_cast %97 : vector<1x1x128x64xbf16> to vector<128x64xbf16>
    %cst_78 = arith.constant dense<0.000000e+00> : vector<120x64xf32>
    %99 = tpu.matmul %96, %98, %cst_78 {dimension_numbers = #tpu.dot_dimension_numbers<[1], [0], [0], [1], [0, 0, 1, 1], [], []>} : vector<120x128xbf16>, vector<128x64xbf16>, vector<120x64xf32> -> vector<120x64xf32>
    %100 = arith.addf %95, %99 : vector<120x64xf32>
    %101 = vector.extract_strided_slice %81 {offsets = [17, 0], sizes = [120, 128], strides = [1, 1]} : vector<154x128xbf16> to vector<120x128xbf16>
    %c1_79 = arith.constant 1 : index
    %c1_80 = arith.constant 1 : index
    %c0_81 = arith.constant 0 : index
    %c0_82 = arith.constant 0 : index
    %102 = vector.load %arg8[%c1_79, %c1_80, %c0_81, %c0_82] : memref<3x3x128x64xbf16, #tpu.memory_space<vmem>>, vector<1x1x128x64xbf16>
    %103 = vector.shape_cast %102 : vector<1x1x128x64xbf16> to vector<128x64xbf16>
    %cst_83 = arith.constant dense<0.000000e+00> : vector<120x64xf32>
    %104 = tpu.matmul %101, %103, %cst_83 {dimension_numbers = #tpu.dot_dimension_numbers<[1], [0], [0], [1], [0, 0, 1, 1], [], []>} : vector<120x128xbf16>, vector<128x64xbf16>, vector<120x64xf32> -> vector<120x64xf32>
    %105 = arith.addf %100, %104 : vector<120x64xf32>
    %106 = vector.extract_strided_slice %81 {offsets = [18, 0], sizes = [120, 128], strides = [1, 1]} : vector<154x128xbf16> to vector<120x128xbf16>
    %c1_84 = arith.constant 1 : index
    %c2_85 = arith.constant 2 : index
    %c0_86 = arith.constant 0 : index
    %c0_87 = arith.constant 0 : index
    %107 = vector.load %arg8[%c1_84, %c2_85, %c0_86, %c0_87] : memref<3x3x128x64xbf16, #tpu.memory_space<vmem>>, vector<1x1x128x64xbf16>
    %108 = vector.shape_cast %107 : vector<1x1x128x64xbf16> to vector<128x64xbf16>
    %cst_88 = arith.constant dense<0.000000e+00> : vector<120x64xf32>
    %109 = tpu.matmul %106, %108, %cst_88 {dimension_numbers = #tpu.dot_dimension_numbers<[1], [0], [0], [1], [0, 0, 1, 1], [], []>} : vector<120x128xbf16>, vector<128x64xbf16>, vector<120x64xf32> -> vector<120x64xf32>
    %110 = arith.addf %105, %109 : vector<120x64xf32>
    %111 = vector.extract_strided_slice %81 {offsets = [32, 0], sizes = [120, 128], strides = [1, 1]} : vector<154x128xbf16> to vector<120x128xbf16>
    %c2_89 = arith.constant 2 : index
    %c0_90 = arith.constant 0 : index
    %c0_91 = arith.constant 0 : index
    %c0_92 = arith.constant 0 : index
    %112 = vector.load %arg8[%c2_89, %c0_90, %c0_91, %c0_92] : memref<3x3x128x64xbf16, #tpu.memory_space<vmem>>, vector<1x1x128x64xbf16>
    %113 = vector.shape_cast %112 : vector<1x1x128x64xbf16> to vector<128x64xbf16>
    %cst_93 = arith.constant dense<0.000000e+00> : vector<120x64xf32>
    %114 = tpu.matmul %111, %113, %cst_93 {dimension_numbers = #tpu.dot_dimension_numbers<[1], [0], [0], [1], [0, 0, 1, 1], [], []>} : vector<120x128xbf16>, vector<128x64xbf16>, vector<120x64xf32> -> vector<120x64xf32>
    %115 = arith.addf %110, %114 : vector<120x64xf32>
    %116 = vector.extract_strided_slice %81 {offsets = [33, 0], sizes = [120, 128], strides = [1, 1]} : vector<154x128xbf16> to vector<120x128xbf16>
    %c2_94 = arith.constant 2 : index
    %c1_95 = arith.constant 1 : index
    %c0_96 = arith.constant 0 : index
    %c0_97 = arith.constant 0 : index
    %117 = vector.load %arg8[%c2_94, %c1_95, %c0_96, %c0_97] : memref<3x3x128x64xbf16, #tpu.memory_space<vmem>>, vector<1x1x128x64xbf16>
    %118 = vector.shape_cast %117 : vector<1x1x128x64xbf16> to vector<128x64xbf16>
    %cst_98 = arith.constant dense<0.000000e+00> : vector<120x64xf32>
    %119 = tpu.matmul %116, %118, %cst_98 {dimension_numbers = #tpu.dot_dimension_numbers<[1], [0], [0], [1], [0, 0, 1, 1], [], []>} : vector<120x128xbf16>, vector<128x64xbf16>, vector<120x64xf32> -> vector<120x64xf32>
    %120 = arith.addf %115, %119 : vector<120x64xf32>
    %121 = vector.extract_strided_slice %81 {offsets = [34, 0], sizes = [120, 128], strides = [1, 1]} : vector<154x128xbf16> to vector<120x128xbf16>
    %c2_99 = arith.constant 2 : index
    %c2_100 = arith.constant 2 : index
    %c0_101 = arith.constant 0 : index
    %c0_102 = arith.constant 0 : index
    %122 = vector.load %arg8[%c2_99, %c2_100, %c0_101, %c0_102] : memref<3x3x128x64xbf16, #tpu.memory_space<vmem>>, vector<1x1x128x64xbf16>
    %123 = vector.shape_cast %122 : vector<1x1x128x64xbf16> to vector<128x64xbf16>
    %cst_103 = arith.constant dense<0.000000e+00> : vector<120x64xf32>
    %124 = tpu.matmul %121, %123, %cst_103 {dimension_numbers = #tpu.dot_dimension_numbers<[1], [0], [0], [1], [0, 0, 1, 1], [], []>} : vector<120x128xbf16>, vector<128x64xbf16>, vector<120x64xf32> -> vector<120x64xf32>
    %125 = arith.addf %120, %124 : vector<120x64xf32>
    %c0_104 = arith.constant 0 : index
    %c0_105 = arith.constant 0 : index
    %126 = vector.load %arg9[%c0_104, %c0_105] : memref<1x64xf32, #tpu.memory_space<vmem>>, vector<1x64xf32>
    %127 = vector.broadcast %126 : vector<1x64xf32> to vector<120x64xf32>
    %128 = arith.addf %125, %127 : vector<120x64xf32>
    %129 = vector.extract_strided_slice %128 {offsets = [0, 0], sizes = [103, 64], strides = [1, 1]} : vector<120x64xf32> to vector<103x64xf32>
    %130 = vector.extract_strided_slice %128 {offsets = [1, 0], sizes = [103, 64], strides = [1, 1]} : vector<120x64xf32> to vector<103x64xf32>
    %131 = arith.addf %129, %130 : vector<103x64xf32>
    %132 = vector.extract_strided_slice %128 {offsets = [16, 0], sizes = [103, 64], strides = [1, 1]} : vector<120x64xf32> to vector<103x64xf32>
    %133 = arith.addf %131, %132 : vector<103x64xf32>
    %134 = vector.extract_strided_slice %128 {offsets = [17, 0], sizes = [103, 64], strides = [1, 1]} : vector<120x64xf32> to vector<103x64xf32>
    %135 = arith.addf %133, %134 : vector<103x64xf32>
    %cst_106 = arith.constant 2.500000e-01 : f32
    %136 = vector.broadcast %cst_106 : f32 to vector<103x64xf32>
    %137 = arith.mulf %135, %136 : vector<103x64xf32>
    %cst_107 = arith.constant 0.000000e+00 : f32
    %138 = vector.broadcast %cst_107 : f32 to vector<103x64xf32>
    %139 = arith.maximumf %137, %138 : vector<103x64xf32>
    %c0_108 = arith.constant 0 : index
    %c0_109 = arith.constant 0 : index
    %c0_110 = arith.constant 0 : index
    %140 = vector.load %arg10[%c0_108, %c0_109, %c0_110] : memref<1x1x64xf32, #tpu.memory_space<vmem>>, vector<1x1x64xf32>
    %141 = vector.shape_cast %140 : vector<1x1x64xf32> to vector<1x64xf32>
    %142 = vector.broadcast %141 : vector<1x64xf32> to vector<103x64xf32>
    %143 = arith.mulf %139, %142 : vector<103x64xf32>
    %144 = arith.truncf %143 : vector<103x64xf32> to vector<103x64xbf16>
    %145 = vector.extract_strided_slice %144 {offsets = [0, 0], sizes = [69, 64], strides = [1, 1]} : vector<103x64xbf16> to vector<69x64xbf16>
    %c0_111 = arith.constant 0 : index
    %c0_112 = arith.constant 0 : index
    %c0_113 = arith.constant 0 : index
    %c0_114 = arith.constant 0 : index
    %146 = vector.load %arg11[%c0_111, %c0_112, %c0_113, %c0_114] : memref<3x3x64x32xbf16, #tpu.memory_space<vmem>>, vector<1x1x64x32xbf16>
    %147 = vector.shape_cast %146 : vector<1x1x64x32xbf16> to vector<64x32xbf16>
    %cst_115 = arith.constant dense<0.000000e+00> : vector<69x32xf32>
    %148 = tpu.matmul %145, %147, %cst_115 {dimension_numbers = #tpu.dot_dimension_numbers<[1], [0], [0], [1], [0, 0, 1, 1], [], []>} : vector<69x64xbf16>, vector<64x32xbf16>, vector<69x32xf32> -> vector<69x32xf32>
    %149 = vector.extract_strided_slice %144 {offsets = [1, 0], sizes = [69, 64], strides = [1, 1]} : vector<103x64xbf16> to vector<69x64xbf16>
    %c0_116 = arith.constant 0 : index
    %c1_117 = arith.constant 1 : index
    %c0_118 = arith.constant 0 : index
    %c0_119 = arith.constant 0 : index
    %150 = vector.load %arg11[%c0_116, %c1_117, %c0_118, %c0_119] : memref<3x3x64x32xbf16, #tpu.memory_space<vmem>>, vector<1x1x64x32xbf16>
    %151 = vector.shape_cast %150 : vector<1x1x64x32xbf16> to vector<64x32xbf16>
    %cst_120 = arith.constant dense<0.000000e+00> : vector<69x32xf32>
    %152 = tpu.matmul %149, %151, %cst_120 {dimension_numbers = #tpu.dot_dimension_numbers<[1], [0], [0], [1], [0, 0, 1, 1], [], []>} : vector<69x64xbf16>, vector<64x32xbf16>, vector<69x32xf32> -> vector<69x32xf32>
    %153 = arith.addf %148, %152 : vector<69x32xf32>
    %154 = vector.extract_strided_slice %144 {offsets = [2, 0], sizes = [69, 64], strides = [1, 1]} : vector<103x64xbf16> to vector<69x64xbf16>
    %c0_121 = arith.constant 0 : index
    %c2_122 = arith.constant 2 : index
    %c0_123 = arith.constant 0 : index
    %c0_124 = arith.constant 0 : index
    %155 = vector.load %arg11[%c0_121, %c2_122, %c0_123, %c0_124] : memref<3x3x64x32xbf16, #tpu.memory_space<vmem>>, vector<1x1x64x32xbf16>
    %156 = vector.shape_cast %155 : vector<1x1x64x32xbf16> to vector<64x32xbf16>
    %cst_125 = arith.constant dense<0.000000e+00> : vector<69x32xf32>
    %157 = tpu.matmul %154, %156, %cst_125 {dimension_numbers = #tpu.dot_dimension_numbers<[1], [0], [0], [1], [0, 0, 1, 1], [], []>} : vector<69x64xbf16>, vector<64x32xbf16>, vector<69x32xf32> -> vector<69x32xf32>
    %158 = arith.addf %153, %157 : vector<69x32xf32>
    %159 = vector.extract_strided_slice %144 {offsets = [16, 0], sizes = [69, 64], strides = [1, 1]} : vector<103x64xbf16> to vector<69x64xbf16>
    %c1_126 = arith.constant 1 : index
    %c0_127 = arith.constant 0 : index
    %c0_128 = arith.constant 0 : index
    %c0_129 = arith.constant 0 : index
    %160 = vector.load %arg11[%c1_126, %c0_127, %c0_128, %c0_129] : memref<3x3x64x32xbf16, #tpu.memory_space<vmem>>, vector<1x1x64x32xbf16>
    %161 = vector.shape_cast %160 : vector<1x1x64x32xbf16> to vector<64x32xbf16>
    %cst_130 = arith.constant dense<0.000000e+00> : vector<69x32xf32>
    %162 = tpu.matmul %159, %161, %cst_130 {dimension_numbers = #tpu.dot_dimension_numbers<[1], [0], [0], [1], [0, 0, 1, 1], [], []>} : vector<69x64xbf16>, vector<64x32xbf16>, vector<69x32xf32> -> vector<69x32xf32>
    %163 = arith.addf %158, %162 : vector<69x32xf32>
    %164 = vector.extract_strided_slice %144 {offsets = [17, 0], sizes = [69, 64], strides = [1, 1]} : vector<103x64xbf16> to vector<69x64xbf16>
    %c1_131 = arith.constant 1 : index
    %c1_132 = arith.constant 1 : index
    %c0_133 = arith.constant 0 : index
    %c0_134 = arith.constant 0 : index
    %165 = vector.load %arg11[%c1_131, %c1_132, %c0_133, %c0_134] : memref<3x3x64x32xbf16, #tpu.memory_space<vmem>>, vector<1x1x64x32xbf16>
    %166 = vector.shape_cast %165 : vector<1x1x64x32xbf16> to vector<64x32xbf16>
    %cst_135 = arith.constant dense<0.000000e+00> : vector<69x32xf32>
    %167 = tpu.matmul %164, %166, %cst_135 {dimension_numbers = #tpu.dot_dimension_numbers<[1], [0], [0], [1], [0, 0, 1, 1], [], []>} : vector<69x64xbf16>, vector<64x32xbf16>, vector<69x32xf32> -> vector<69x32xf32>
    %168 = arith.addf %163, %167 : vector<69x32xf32>
    %169 = vector.extract_strided_slice %144 {offsets = [18, 0], sizes = [69, 64], strides = [1, 1]} : vector<103x64xbf16> to vector<69x64xbf16>
    %c1_136 = arith.constant 1 : index
    %c2_137 = arith.constant 2 : index
    %c0_138 = arith.constant 0 : index
    %c0_139 = arith.constant 0 : index
    %170 = vector.load %arg11[%c1_136, %c2_137, %c0_138, %c0_139] : memref<3x3x64x32xbf16, #tpu.memory_space<vmem>>, vector<1x1x64x32xbf16>
    %171 = vector.shape_cast %170 : vector<1x1x64x32xbf16> to vector<64x32xbf16>
    %cst_140 = arith.constant dense<0.000000e+00> : vector<69x32xf32>
    %172 = tpu.matmul %169, %171, %cst_140 {dimension_numbers = #tpu.dot_dimension_numbers<[1], [0], [0], [1], [0, 0, 1, 1], [], []>} : vector<69x64xbf16>, vector<64x32xbf16>, vector<69x32xf32> -> vector<69x32xf32>
    %173 = arith.addf %168, %172 : vector<69x32xf32>
    %174 = vector.extract_strided_slice %144 {offsets = [32, 0], sizes = [69, 64], strides = [1, 1]} : vector<103x64xbf16> to vector<69x64xbf16>
    %c2_141 = arith.constant 2 : index
    %c0_142 = arith.constant 0 : index
    %c0_143 = arith.constant 0 : index
    %c0_144 = arith.constant 0 : index
    %175 = vector.load %arg11[%c2_141, %c0_142, %c0_143, %c0_144] : memref<3x3x64x32xbf16, #tpu.memory_space<vmem>>, vector<1x1x64x32xbf16>
    %176 = vector.shape_cast %175 : vector<1x1x64x32xbf16> to vector<64x32xbf16>
    %cst_145 = arith.constant dense<0.000000e+00> : vector<69x32xf32>
    %177 = tpu.matmul %174, %176, %cst_145 {dimension_numbers = #tpu.dot_dimension_numbers<[1], [0], [0], [1], [0, 0, 1, 1], [], []>} : vector<69x64xbf16>, vector<64x32xbf16>, vector<69x32xf32> -> vector<69x32xf32>
    %178 = arith.addf %173, %177 : vector<69x32xf32>
    %179 = vector.extract_strided_slice %144 {offsets = [33, 0], sizes = [69, 64], strides = [1, 1]} : vector<103x64xbf16> to vector<69x64xbf16>
    %c2_146 = arith.constant 2 : index
    %c1_147 = arith.constant 1 : index
    %c0_148 = arith.constant 0 : index
    %c0_149 = arith.constant 0 : index
    %180 = vector.load %arg11[%c2_146, %c1_147, %c0_148, %c0_149] : memref<3x3x64x32xbf16, #tpu.memory_space<vmem>>, vector<1x1x64x32xbf16>
    %181 = vector.shape_cast %180 : vector<1x1x64x32xbf16> to vector<64x32xbf16>
    %cst_150 = arith.constant dense<0.000000e+00> : vector<69x32xf32>
    %182 = tpu.matmul %179, %181, %cst_150 {dimension_numbers = #tpu.dot_dimension_numbers<[1], [0], [0], [1], [0, 0, 1, 1], [], []>} : vector<69x64xbf16>, vector<64x32xbf16>, vector<69x32xf32> -> vector<69x32xf32>
    %183 = arith.addf %178, %182 : vector<69x32xf32>
    %184 = vector.extract_strided_slice %144 {offsets = [34, 0], sizes = [69, 64], strides = [1, 1]} : vector<103x64xbf16> to vector<69x64xbf16>
    %c2_151 = arith.constant 2 : index
    %c2_152 = arith.constant 2 : index
    %c0_153 = arith.constant 0 : index
    %c0_154 = arith.constant 0 : index
    %185 = vector.load %arg11[%c2_151, %c2_152, %c0_153, %c0_154] : memref<3x3x64x32xbf16, #tpu.memory_space<vmem>>, vector<1x1x64x32xbf16>
    %186 = vector.shape_cast %185 : vector<1x1x64x32xbf16> to vector<64x32xbf16>
    %cst_155 = arith.constant dense<0.000000e+00> : vector<69x32xf32>
    %187 = tpu.matmul %184, %186, %cst_155 {dimension_numbers = #tpu.dot_dimension_numbers<[1], [0], [0], [1], [0, 0, 1, 1], [], []>} : vector<69x64xbf16>, vector<64x32xbf16>, vector<69x32xf32> -> vector<69x32xf32>
    %188 = arith.addf %183, %187 : vector<69x32xf32>
    %c0_156 = arith.constant 0 : index
    %c0_157 = arith.constant 0 : index
    %189 = vector.load %arg12[%c0_156, %c0_157] : memref<1x32xf32, #tpu.memory_space<vmem>>, vector<1x32xf32>
    %190 = vector.broadcast %189 : vector<1x32xf32> to vector<69x32xf32>
    %191 = arith.addf %188, %190 : vector<69x32xf32>
    %192 = vector.extract_strided_slice %191 {offsets = [0, 0], sizes = [52, 32], strides = [1, 1]} : vector<69x32xf32> to vector<52x32xf32>
    %193 = vector.extract_strided_slice %191 {offsets = [1, 0], sizes = [52, 32], strides = [1, 1]} : vector<69x32xf32> to vector<52x32xf32>
    %194 = arith.addf %192, %193 : vector<52x32xf32>
    %195 = vector.extract_strided_slice %191 {offsets = [16, 0], sizes = [52, 32], strides = [1, 1]} : vector<69x32xf32> to vector<52x32xf32>
    %196 = arith.addf %194, %195 : vector<52x32xf32>
    %197 = vector.extract_strided_slice %191 {offsets = [17, 0], sizes = [52, 32], strides = [1, 1]} : vector<69x32xf32> to vector<52x32xf32>
    %198 = arith.addf %196, %197 : vector<52x32xf32>
    %cst_158 = arith.constant 2.500000e-01 : f32
    %199 = vector.broadcast %cst_158 : f32 to vector<52x32xf32>
    %200 = arith.mulf %198, %199 : vector<52x32xf32>
    %cst_159 = arith.constant 0.000000e+00 : f32
    %201 = vector.broadcast %cst_159 : f32 to vector<52x32xf32>
    %202 = arith.maximumf %200, %201 : vector<52x32xf32>
    %203 = arith.truncf %202 : vector<52x32xf32> to vector<52x32xbf16>
    %c0_160 = arith.constant 0 : index
    %c0_161 = arith.constant 0 : index
    %204 = vector.load %arg14[%c0_160, %c0_161] : memref<1x256xf32, #tpu.memory_space<vmem>>, vector<1x256xf32>
    %205 = vector.extract_strided_slice %203 {offsets = [0, 0], sizes = [1, 32], strides = [1, 1]} : vector<52x32xbf16> to vector<1x32xbf16>
    %c0_162 = arith.constant 0 : index
    %c0_163 = arith.constant 0 : index
    %c0_164 = arith.constant 0 : index
    %206 = vector.load %arg13[%c0_162, %c0_163, %c0_164] : memref<16x32x256xbf16, #tpu.memory_space<vmem>>, vector<1x32x256xbf16>
    %207 = vector.shape_cast %206 : vector<1x32x256xbf16> to vector<32x256xbf16>
    %cst_165 = arith.constant dense<0.000000e+00> : vector<1x256xf32>
    %208 = tpu.matmul %205, %207, %cst_165 {dimension_numbers = #tpu.dot_dimension_numbers<[1], [0], [0], [1], [0, 0, 1, 1], [], []>} : vector<1x32xbf16>, vector<32x256xbf16>, vector<1x256xf32> -> vector<1x256xf32>
    %209 = arith.addf %204, %208 : vector<1x256xf32>
    %210 = vector.extract_strided_slice %203 {offsets = [1, 0], sizes = [1, 32], strides = [1, 1]} : vector<52x32xbf16> to vector<1x32xbf16>
    %c1_166 = arith.constant 1 : index
    %c0_167 = arith.constant 0 : index
    %c0_168 = arith.constant 0 : index
    %211 = vector.load %arg13[%c1_166, %c0_167, %c0_168] : memref<16x32x256xbf16, #tpu.memory_space<vmem>>, vector<1x32x256xbf16>
    %212 = vector.shape_cast %211 : vector<1x32x256xbf16> to vector<32x256xbf16>
    %cst_169 = arith.constant dense<0.000000e+00> : vector<1x256xf32>
    %213 = tpu.matmul %210, %212, %cst_169 {dimension_numbers = #tpu.dot_dimension_numbers<[1], [0], [0], [1], [0, 0, 1, 1], [], []>} : vector<1x32xbf16>, vector<32x256xbf16>, vector<1x256xf32> -> vector<1x256xf32>
    %214 = arith.addf %209, %213 : vector<1x256xf32>
    %215 = vector.extract_strided_slice %203 {offsets = [2, 0], sizes = [1, 32], strides = [1, 1]} : vector<52x32xbf16> to vector<1x32xbf16>
    %c2_170 = arith.constant 2 : index
    %c0_171 = arith.constant 0 : index
    %c0_172 = arith.constant 0 : index
    %216 = vector.load %arg13[%c2_170, %c0_171, %c0_172] : memref<16x32x256xbf16, #tpu.memory_space<vmem>>, vector<1x32x256xbf16>
    %217 = vector.shape_cast %216 : vector<1x32x256xbf16> to vector<32x256xbf16>
    %cst_173 = arith.constant dense<0.000000e+00> : vector<1x256xf32>
    %218 = tpu.matmul %215, %217, %cst_173 {dimension_numbers = #tpu.dot_dimension_numbers<[1], [0], [0], [1], [0, 0, 1, 1], [], []>} : vector<1x32xbf16>, vector<32x256xbf16>, vector<1x256xf32> -> vector<1x256xf32>
    %219 = arith.addf %214, %218 : vector<1x256xf32>
    %220 = vector.extract_strided_slice %203 {offsets = [3, 0], sizes = [1, 32], strides = [1, 1]} : vector<52x32xbf16> to vector<1x32xbf16>
    %c3 = arith.constant 3 : index
    %c0_174 = arith.constant 0 : index
    %c0_175 = arith.constant 0 : index
    %221 = vector.load %arg13[%c3, %c0_174, %c0_175] : memref<16x32x256xbf16, #tpu.memory_space<vmem>>, vector<1x32x256xbf16>
    %222 = vector.shape_cast %221 : vector<1x32x256xbf16> to vector<32x256xbf16>
    %cst_176 = arith.constant dense<0.000000e+00> : vector<1x256xf32>
    %223 = tpu.matmul %220, %222, %cst_176 {dimension_numbers = #tpu.dot_dimension_numbers<[1], [0], [0], [1], [0, 0, 1, 1], [], []>} : vector<1x32xbf16>, vector<32x256xbf16>, vector<1x256xf32> -> vector<1x256xf32>
    %224 = arith.addf %219, %223 : vector<1x256xf32>
    %225 = vector.extract_strided_slice %203 {offsets = [16, 0], sizes = [1, 32], strides = [1, 1]} : vector<52x32xbf16> to vector<1x32xbf16>
    %c4 = arith.constant 4 : index
    %c0_177 = arith.constant 0 : index
    %c0_178 = arith.constant 0 : index
    %226 = vector.load %arg13[%c4, %c0_177, %c0_178] : memref<16x32x256xbf16, #tpu.memory_space<vmem>>, vector<1x32x256xbf16>
    %227 = vector.shape_cast %226 : vector<1x32x256xbf16> to vector<32x256xbf16>
    %cst_179 = arith.constant dense<0.000000e+00> : vector<1x256xf32>
    %228 = tpu.matmul %225, %227, %cst_179 {dimension_numbers = #tpu.dot_dimension_numbers<[1], [0], [0], [1], [0, 0, 1, 1], [], []>} : vector<1x32xbf16>, vector<32x256xbf16>, vector<1x256xf32> -> vector<1x256xf32>
    %229 = arith.addf %224, %228 : vector<1x256xf32>
    %230 = vector.extract_strided_slice %203 {offsets = [17, 0], sizes = [1, 32], strides = [1, 1]} : vector<52x32xbf16> to vector<1x32xbf16>
    %c5 = arith.constant 5 : index
    %c0_180 = arith.constant 0 : index
    %c0_181 = arith.constant 0 : index
    %231 = vector.load %arg13[%c5, %c0_180, %c0_181] : memref<16x32x256xbf16, #tpu.memory_space<vmem>>, vector<1x32x256xbf16>
    %232 = vector.shape_cast %231 : vector<1x32x256xbf16> to vector<32x256xbf16>
    %cst_182 = arith.constant dense<0.000000e+00> : vector<1x256xf32>
    %233 = tpu.matmul %230, %232, %cst_182 {dimension_numbers = #tpu.dot_dimension_numbers<[1], [0], [0], [1], [0, 0, 1, 1], [], []>} : vector<1x32xbf16>, vector<32x256xbf16>, vector<1x256xf32> -> vector<1x256xf32>
    %234 = arith.addf %229, %233 : vector<1x256xf32>
    %235 = vector.extract_strided_slice %203 {offsets = [18, 0], sizes = [1, 32], strides = [1, 1]} : vector<52x32xbf16> to vector<1x32xbf16>
    %c6 = arith.constant 6 : index
    %c0_183 = arith.constant 0 : index
    %c0_184 = arith.constant 0 : index
    %236 = vector.load %arg13[%c6, %c0_183, %c0_184] : memref<16x32x256xbf16, #tpu.memory_space<vmem>>, vector<1x32x256xbf16>
    %237 = vector.shape_cast %236 : vector<1x32x256xbf16> to vector<32x256xbf16>
    %cst_185 = arith.constant dense<0.000000e+00> : vector<1x256xf32>
    %238 = tpu.matmul %235, %237, %cst_185 {dimension_numbers = #tpu.dot_dimension_numbers<[1], [0], [0], [1], [0, 0, 1, 1], [], []>} : vector<1x32xbf16>, vector<32x256xbf16>, vector<1x256xf32> -> vector<1x256xf32>
    %239 = arith.addf %234, %238 : vector<1x256xf32>
    %240 = vector.extract_strided_slice %203 {offsets = [19, 0], sizes = [1, 32], strides = [1, 1]} : vector<52x32xbf16> to vector<1x32xbf16>
    %c7 = arith.constant 7 : index
    %c0_186 = arith.constant 0 : index
    %c0_187 = arith.constant 0 : index
    %241 = vector.load %arg13[%c7, %c0_186, %c0_187] : memref<16x32x256xbf16, #tpu.memory_space<vmem>>, vector<1x32x256xbf16>
    %242 = vector.shape_cast %241 : vector<1x32x256xbf16> to vector<32x256xbf16>
    %cst_188 = arith.constant dense<0.000000e+00> : vector<1x256xf32>
    %243 = tpu.matmul %240, %242, %cst_188 {dimension_numbers = #tpu.dot_dimension_numbers<[1], [0], [0], [1], [0, 0, 1, 1], [], []>} : vector<1x32xbf16>, vector<32x256xbf16>, vector<1x256xf32> -> vector<1x256xf32>
    %244 = arith.addf %239, %243 : vector<1x256xf32>
    %245 = vector.extract_strided_slice %203 {offsets = [32, 0], sizes = [1, 32], strides = [1, 1]} : vector<52x32xbf16> to vector<1x32xbf16>
    %c8 = arith.constant 8 : index
    %c0_189 = arith.constant 0 : index
    %c0_190 = arith.constant 0 : index
    %246 = vector.load %arg13[%c8, %c0_189, %c0_190] : memref<16x32x256xbf16, #tpu.memory_space<vmem>>, vector<1x32x256xbf16>
    %247 = vector.shape_cast %246 : vector<1x32x256xbf16> to vector<32x256xbf16>
    %cst_191 = arith.constant dense<0.000000e+00> : vector<1x256xf32>
    %248 = tpu.matmul %245, %247, %cst_191 {dimension_numbers = #tpu.dot_dimension_numbers<[1], [0], [0], [1], [0, 0, 1, 1], [], []>} : vector<1x32xbf16>, vector<32x256xbf16>, vector<1x256xf32> -> vector<1x256xf32>
    %249 = arith.addf %244, %248 : vector<1x256xf32>
    %250 = vector.extract_strided_slice %203 {offsets = [33, 0], sizes = [1, 32], strides = [1, 1]} : vector<52x32xbf16> to vector<1x32xbf16>
    %c9 = arith.constant 9 : index
    %c0_192 = arith.constant 0 : index
    %c0_193 = arith.constant 0 : index
    %251 = vector.load %arg13[%c9, %c0_192, %c0_193] : memref<16x32x256xbf16, #tpu.memory_space<vmem>>, vector<1x32x256xbf16>
    %252 = vector.shape_cast %251 : vector<1x32x256xbf16> to vector<32x256xbf16>
    %cst_194 = arith.constant dense<0.000000e+00> : vector<1x256xf32>
    %253 = tpu.matmul %250, %252, %cst_194 {dimension_numbers = #tpu.dot_dimension_numbers<[1], [0], [0], [1], [0, 0, 1, 1], [], []>} : vector<1x32xbf16>, vector<32x256xbf16>, vector<1x256xf32> -> vector<1x256xf32>
    %254 = arith.addf %249, %253 : vector<1x256xf32>
    %255 = vector.extract_strided_slice %203 {offsets = [34, 0], sizes = [1, 32], strides = [1, 1]} : vector<52x32xbf16> to vector<1x32xbf16>
    %c10 = arith.constant 10 : index
    %c0_195 = arith.constant 0 : index
    %c0_196 = arith.constant 0 : index
    %256 = vector.load %arg13[%c10, %c0_195, %c0_196] : memref<16x32x256xbf16, #tpu.memory_space<vmem>>, vector<1x32x256xbf16>
    %257 = vector.shape_cast %256 : vector<1x32x256xbf16> to vector<32x256xbf16>
    %cst_197 = arith.constant dense<0.000000e+00> : vector<1x256xf32>
    %258 = tpu.matmul %255, %257, %cst_197 {dimension_numbers = #tpu.dot_dimension_numbers<[1], [0], [0], [1], [0, 0, 1, 1], [], []>} : vector<1x32xbf16>, vector<32x256xbf16>, vector<1x256xf32> -> vector<1x256xf32>
    %259 = arith.addf %254, %258 : vector<1x256xf32>
    %260 = vector.extract_strided_slice %203 {offsets = [35, 0], sizes = [1, 32], strides = [1, 1]} : vector<52x32xbf16> to vector<1x32xbf16>
    %c11 = arith.constant 11 : index
    %c0_198 = arith.constant 0 : index
    %c0_199 = arith.constant 0 : index
    %261 = vector.load %arg13[%c11, %c0_198, %c0_199] : memref<16x32x256xbf16, #tpu.memory_space<vmem>>, vector<1x32x256xbf16>
    %262 = vector.shape_cast %261 : vector<1x32x256xbf16> to vector<32x256xbf16>
    %cst_200 = arith.constant dense<0.000000e+00> : vector<1x256xf32>
    %263 = tpu.matmul %260, %262, %cst_200 {dimension_numbers = #tpu.dot_dimension_numbers<[1], [0], [0], [1], [0, 0, 1, 1], [], []>} : vector<1x32xbf16>, vector<32x256xbf16>, vector<1x256xf32> -> vector<1x256xf32>
    %264 = arith.addf %259, %263 : vector<1x256xf32>
    %265 = vector.extract_strided_slice %203 {offsets = [48, 0], sizes = [1, 32], strides = [1, 1]} : vector<52x32xbf16> to vector<1x32xbf16>
    %c12 = arith.constant 12 : index
    %c0_201 = arith.constant 0 : index
    %c0_202 = arith.constant 0 : index
    %266 = vector.load %arg13[%c12, %c0_201, %c0_202] : memref<16x32x256xbf16, #tpu.memory_space<vmem>>, vector<1x32x256xbf16>
    %267 = vector.shape_cast %266 : vector<1x32x256xbf16> to vector<32x256xbf16>
    %cst_203 = arith.constant dense<0.000000e+00> : vector<1x256xf32>
    %268 = tpu.matmul %265, %267, %cst_203 {dimension_numbers = #tpu.dot_dimension_numbers<[1], [0], [0], [1], [0, 0, 1, 1], [], []>} : vector<1x32xbf16>, vector<32x256xbf16>, vector<1x256xf32> -> vector<1x256xf32>
    %269 = arith.addf %264, %268 : vector<1x256xf32>
    %270 = vector.extract_strided_slice %203 {offsets = [49, 0], sizes = [1, 32], strides = [1, 1]} : vector<52x32xbf16> to vector<1x32xbf16>
    %c13 = arith.constant 13 : index
    %c0_204 = arith.constant 0 : index
    %c0_205 = arith.constant 0 : index
    %271 = vector.load %arg13[%c13, %c0_204, %c0_205] : memref<16x32x256xbf16, #tpu.memory_space<vmem>>, vector<1x32x256xbf16>
    %272 = vector.shape_cast %271 : vector<1x32x256xbf16> to vector<32x256xbf16>
    %cst_206 = arith.constant dense<0.000000e+00> : vector<1x256xf32>
    %273 = tpu.matmul %270, %272, %cst_206 {dimension_numbers = #tpu.dot_dimension_numbers<[1], [0], [0], [1], [0, 0, 1, 1], [], []>} : vector<1x32xbf16>, vector<32x256xbf16>, vector<1x256xf32> -> vector<1x256xf32>
    %274 = arith.addf %269, %273 : vector<1x256xf32>
    %275 = vector.extract_strided_slice %203 {offsets = [50, 0], sizes = [1, 32], strides = [1, 1]} : vector<52x32xbf16> to vector<1x32xbf16>
    %c14 = arith.constant 14 : index
    %c0_207 = arith.constant 0 : index
    %c0_208 = arith.constant 0 : index
    %276 = vector.load %arg13[%c14, %c0_207, %c0_208] : memref<16x32x256xbf16, #tpu.memory_space<vmem>>, vector<1x32x256xbf16>
    %277 = vector.shape_cast %276 : vector<1x32x256xbf16> to vector<32x256xbf16>
    %cst_209 = arith.constant dense<0.000000e+00> : vector<1x256xf32>
    %278 = tpu.matmul %275, %277, %cst_209 {dimension_numbers = #tpu.dot_dimension_numbers<[1], [0], [0], [1], [0, 0, 1, 1], [], []>} : vector<1x32xbf16>, vector<32x256xbf16>, vector<1x256xf32> -> vector<1x256xf32>
    %279 = arith.addf %274, %278 : vector<1x256xf32>
    %280 = vector.extract_strided_slice %203 {offsets = [51, 0], sizes = [1, 32], strides = [1, 1]} : vector<52x32xbf16> to vector<1x32xbf16>
    %c15 = arith.constant 15 : index
    %c0_210 = arith.constant 0 : index
    %c0_211 = arith.constant 0 : index
    %281 = vector.load %arg13[%c15, %c0_210, %c0_211] : memref<16x32x256xbf16, #tpu.memory_space<vmem>>, vector<1x32x256xbf16>
    %282 = vector.shape_cast %281 : vector<1x32x256xbf16> to vector<32x256xbf16>
    %cst_212 = arith.constant dense<0.000000e+00> : vector<1x256xf32>
    %283 = tpu.matmul %280, %282, %cst_212 {dimension_numbers = #tpu.dot_dimension_numbers<[1], [0], [0], [1], [0, 0, 1, 1], [], []>} : vector<1x32xbf16>, vector<32x256xbf16>, vector<1x256xf32> -> vector<1x256xf32>
    %284 = arith.addf %279, %283 : vector<1x256xf32>
    %cst_213 = arith.constant 0.000000e+00 : f32
    %285 = vector.broadcast %cst_213 : f32 to vector<1x256xf32>
    %286 = arith.maximumf %284, %285 : vector<1x256xf32>
    %287 = arith.truncf %286 : vector<1x256xf32> to vector<1x256xbf16>
    %c0_214 = arith.constant 0 : index
    %c0_215 = arith.constant 0 : index
    %288 = vector.load %arg15[%c0_214, %c0_215] : memref<256x128xbf16, #tpu.memory_space<vmem>>, vector<256x128xbf16>
    %cst_216 = arith.constant dense<0.000000e+00> : vector<1x128xf32>
    %289 = tpu.matmul %287, %288, %cst_216 {dimension_numbers = #tpu.dot_dimension_numbers<[1], [0], [0], [1], [0, 0, 1, 1], [], []>} : vector<1x256xbf16>, vector<256x128xbf16>, vector<1x128xf32> -> vector<1x128xf32>
    %c0_217 = arith.constant 0 : index
    %c0_218 = arith.constant 0 : index
    %290 = vector.load %arg16[%c0_217, %c0_218] : memref<1x128xf32, #tpu.memory_space<vmem>>, vector<1x128xf32>
    %291 = arith.addf %289, %290 : vector<1x128xf32>
    %cst_219 = arith.constant 0.000000e+00 : f32
    %292 = vector.broadcast %cst_219 : f32 to vector<1x128xf32>
    %293 = arith.subf %292, %291 : vector<1x128xf32>
    %294 = math.exp %293 : vector<1x128xf32>
    %cst_220 = arith.constant 1.000000e+00 : f32
    %295 = vector.broadcast %cst_220 : f32 to vector<1x128xf32>
    %296 = arith.addf %295, %294 : vector<1x128xf32>
    %cst_221 = arith.constant 1.000000e+00 : f32
    %297 = vector.broadcast %cst_221 : f32 to vector<1x128xf32>
    %298 = arith.divf %297, %296 : vector<1x128xf32>
    %299 = vector.shape_cast %298 : vector<1x128xf32> to vector<1x1x128xf32>
    %c0_222 = arith.constant 0 : index
    %c0_223 = arith.constant 0 : index
    %c0_224 = arith.constant 0 : index
    %300 = vector.load %arg17[%c0_222, %c0_223, %c0_224] : memref<1x1x128xf32, #tpu.memory_space<vmem>>, vector<1x1x128xf32>
    tpu.vector_store %arg17[%c0_222, %c0_223, %c0_224], %299 {strides = array<i32>} : memref<1x1x128xf32, #tpu.memory_space<vmem>>, vector<1x1x128xf32>,
    return
  }
  func.func @transform_0(%arg0: i32) -> (i32, i32, i32) {
    %c0_i32 = arith.constant 0 : i32
    %c0_i32_0 = arith.constant 0 : i32
    %c0_i32_1 = arith.constant 0 : i32
    return %arg0, %c0_i32, %c0_i32_0 : i32, i32, i32
  }
  func.func @transform_1(%arg0: i32) -> (i32, i32) {
    %c0_i32 = arith.constant 0 : i32
    %c0_i32_0 = arith.constant 0 : i32
    %c0_i32_1 = arith.constant 0 : i32
    return %c0_i32, %c0_i32_0 : i32, i32
  }
  func.func @transform_2(%arg0: i32) -> (i32, i32) {
    %c0_i32 = arith.constant 0 : i32
    %c0_i32_0 = arith.constant 0 : i32
    %c0_i32_1 = arith.constant 0 : i32
    return %c0_i32, %c0_i32_0 : i32, i32
  }
  func.func @transform_3(%arg0: i32) -> (i32, i32, i32) {
    %c0_i32 = arith.constant 0 : i32
    %c0_i32_0 = arith.constant 0 : i32
    %c0_i32_1 = arith.constant 0 : i32
    return %arg0, %c0_i32, %c0_i32_0 : i32, i32, i32
  }
  func.func @transform_4(%arg0: i32) -> (i32, i32, i32, i32) {
    %c0_i32 = arith.constant 0 : i32
    %c0_i32_0 = arith.constant 0 : i32
    %c0_i32_1 = arith.constant 0 : i32
    %c0_i32_2 = arith.constant 0 : i32
    %c0_i32_3 = arith.constant 0 : i32
    return %c0_i32, %c0_i32_0, %c0_i32_1, %c0_i32_2 : i32, i32, i32, i32
  }
  func.func @transform_5(%arg0: i32) -> (i32, i32) {
    %c0_i32 = arith.constant 0 : i32
    %c0_i32_0 = arith.constant 0 : i32
    %c0_i32_1 = arith.constant 0 : i32
    return %c0_i32, %c0_i32_0 : i32, i32
  }
  func.func @transform_6(%arg0: i32) -> (i32, i32, i32) {
    %c0_i32 = arith.constant 0 : i32
    %c0_i32_0 = arith.constant 0 : i32
    %c0_i32_1 = arith.constant 0 : i32
    return %arg0, %c0_i32, %c0_i32_0 : i32, i32, i32
  }
  func.func @transform_7(%arg0: i32) -> (i32, i32, i32, i32) {
    %c0_i32 = arith.constant 0 : i32
    %c0_i32_0 = arith.constant 0 : i32
    %c0_i32_1 = arith.constant 0 : i32
    %c0_i32_2 = arith.constant 0 : i32
    %c0_i32_3 = arith.constant 0 : i32
    return %c0_i32, %c0_i32_0, %c0_i32_1, %c0_i32_2 : i32, i32, i32, i32
  }
  func.func @transform_8(%arg0: i32) -> (i32, i32) {
    %c0_i32 = arith.constant 0 : i32
    %c0_i32_0 = arith.constant 0 : i32
    %c0_i32_1 = arith.constant 0 : i32
    return %c0_i32, %c0_i32_0 : i32, i32
  }
  func.func @transform_9(%arg0: i32) -> (i32, i32, i32) {
    %c0_i32 = arith.constant 0 : i32
    %c0_i32_0 = arith.constant 0 : i32
    %c0_i32_1 = arith.constant 0 : i32
    return %arg0, %c0_i32, %c0_i32_0 : i32, i32, i32
  }
  func.func @transform_10(%arg0: i32) -> (i32, i32, i32, i32) {
    %c0_i32 = arith.constant 0 : i32
    %c0_i32_0 = arith.constant 0 : i32
    %c0_i32_1 = arith.constant 0 : i32
    %c0_i32_2 = arith.constant 0 : i32
    %c0_i32_3 = arith.constant 0 : i32
    return %c0_i32, %c0_i32_0, %c0_i32_1, %c0_i32_2 : i32, i32, i32, i32
  }
  func.func @transform_11(%arg0: i32) -> (i32, i32) {
    %c0_i32 = arith.constant 0 : i32
    %c0_i32_0 = arith.constant 0 : i32
    %c0_i32_1 = arith.constant 0 : i32
    return %c0_i32, %c0_i32_0 : i32, i32
  }
  func.func @transform_12(%arg0: i32) -> (i32, i32, i32) {
    %c0_i32 = arith.constant 0 : i32
    %c0_i32_0 = arith.constant 0 : i32
    %c0_i32_1 = arith.constant 0 : i32
    %c0_i32_2 = arith.constant 0 : i32
    return %c0_i32, %c0_i32_0, %c0_i32_1 : i32, i32, i32
  }
  func.func @transform_13(%arg0: i32) -> (i32, i32) {
    %c0_i32 = arith.constant 0 : i32
    %c0_i32_0 = arith.constant 0 : i32
    %c0_i32_1 = arith.constant 0 : i32
    return %c0_i32, %c0_i32_0 : i32, i32
  }
  func.func @transform_14(%arg0: i32) -> (i32, i32) {
    %c0_i32 = arith.constant 0 : i32
    %c0_i32_0 = arith.constant 0 : i32
    %c0_i32_1 = arith.constant 0 : i32
    return %c0_i32, %c0_i32_0 : i32, i32
  }
  func.func @transform_15(%arg0: i32) -> (i32, i32) {
    %c0_i32 = arith.constant 0 : i32
    %c0_i32_0 = arith.constant 0 : i32
    %c0_i32_1 = arith.constant 0 : i32
    return %c0_i32, %c0_i32_0 : i32, i32
  }
  func.func @transform_16(%arg0: i32) -> (i32, i32, i32) {
    %c0_i32 = arith.constant 0 : i32
    %c0_i32_0 = arith.constant 0 : i32
    %c0_i32_1 = arith.constant 0 : i32
    return %arg0, %c0_i32, %c0_i32_0 : i32, i32, i32
  }
}

</mosaic_0001>

<bundles_post_ra>
// kernel: embedder_forward.3
= control target key start
LH: loop header
LB: loop body
LE: loop exit
PB: predicated region body
PF: predicated region fallthrough
CT: control target
= control target key end

     0   :  { %s11141_s0 = inlined_call_operand.vmem [shape: bf16[2,256,27], index: 0, kind: input, shape index: {}]   ;;  %s11142_s1 = inlined_call_operand.vmem [shape: bf16[27,64], index: 1, kind: input, shape index: {}]   ;;  %s11143_s2 = inlined_call_operand.vmem [shape: f32[1,64], index: 2, kind: input, shape index: {}]   ;;  %s11144_s3 = inlined_call_operand.vmem [shape: f32[2,1,64], index: 3, kind: input, shape index: {}]   ;;  %s11145_s4 = inlined_call_operand.vmem [shape: bf16[3,3,64,128], index: 4, kind: input, shape index: {}]   ;;  %s11146_s5 = inlined_call_operand.vmem [shape: f32[1,128], index: 5, kind: input, shape index: {}]   ;;  %s11147_s6 = inlined_call_operand.vmem [shape: f32[2,1,128], index: 6, kind: input, shape index: {}]   ;;  %s11148_s7 = inlined_call_operand.vmem [shape: bf16[3,3,128,64], index: 7, kind: input, shape index: {}]   ;;  %s11149_s8 = inlined_call_operand.vmem [shape: f32[1,64], index: 8, kind: input, shape index: {}]   ;;  %s11150_s9 = inlined_call_operand.vmem [shape: f32[2,1,64], index: 9, kind: input, shape index: {}]   ;;  %s11151_s10 = inlined_call_operand.vmem [shape: bf16[3,3,64,32], index: 10, kind: input, shape index: {}]   ;;  %s11152_s11 = inlined_call_operand.vmem [shape: f32[1,32], index: 11, kind: input, shape index: {}]   ;;  %s11153_s12 = inlined_call_operand.vmem [shape: bf16[16,32,256], index: 12, kind: input, shape index: {}]   ;;  %s11154_s13 = inlined_call_operand.vmem [shape: f32[1,256], index: 13, kind: input, shape index: {}]   ;;  %s11155_s14 = inlined_call_operand.vmem [shape: bf16[256,128], index: 14, kind: input, shape index: {}]   ;;  %s11156_s15 = inlined_call_operand.vmem [shape: f32[1,128], index: 15, kind: input, shape index: {}]   ;;  %s11157_s16 = inlined_call_operand.hbm [shape: f32[2,1,128], index: 16, kind: output, shape index: {}]  }
   0x1   :  { %11171 = sst [smem:[#allocation31_spill]] %s11141_s0 }
   0x2   :  { %11172 = sst [smem:[#allocation32_spill]] %s11142_s1 }
   0x3   :  { %21 = vsyncpa [#allocation3], 0 }
   0x4   :  { %23 = vsyncpa [#allocation3 + $0x1], 0  ;;  %s8297_s21 = smov 0   ;;  %s8299_s22 = smov 0  }
   0x5   :  { %s8301_s23 = smov 0   ;;  %s8303_s24 = smov 0  }
   0x6 LB: > { %11173 = sst [smem:[#allocation5_spill]] %s8197_s21  ;;  %s8318_s25 = sadd.s32 4294967295, %s8209_s24   ;;  %s8209_s24 = sphi %s8303_s24, %s11246_s24   ;;  %s8205_s23 = sphi %s8301_s23, %s11248_s23   ;;  %s8201_s22 = sphi %s8299_s22, %s11250_s22   ;;  %s8197_s21 = sphi %s8297_s21, %s11249_s21  }
   0x7   : > { %11174 = sst [smem:[#allocation6_spill]] %s8205_s23  ;;  %s6365_s26 = sadd.s32 4294967294, %s8209_s24  }
   0x8   : > { %s8322_s27 = sadd.s32 1, %s8209_s24   ;;  %s392_s28 = sadd.s32 1, %s8205_s23 }
   0x9   : > { %11175 = sst [smem:[#allocation7_spill]] %s8322_s27  ;;  %s389_s29 = ssub.s32 %s8209_s24, %s8322_s27 }
   0xa   : > { %p402_p0 = scmp.ne.s32.totalorder %s8205_s23, %s8201_s22  ;;  %p390_p1 = scmp.eq.s32.totalorder %s389_s29, 0 }
   0xb   : > { %p403_p2 = scmp.eq.s32.totalorder %s8318_s25, 1  ;;  %p408_p3 = scmp.ne.s32.totalorder %s8201_s22, %s8197_s21 }
   0xc   : > { %p409_p4 = scmp.eq.s32.totalorder %s6365_s26, 1  ;;  %p6368_p7 = scmp.ge.s32.totalorder %s8209_s24, 1 }
   0xd   : > { %s8333_s30 = scalar_select %p390_p1, %s8205_s23, %s392_s28  }
   0xe   : > { %p8335_p5 = por %p403_p2, %p402_p0  ;;  %p8339_p6 = por %p409_p4, %p408_p3 }
   0xf   : > { %11176 = sst [smem:[#allocation8_spill]] %s8333_s30  ;;  %p489_p8 = scmp.lt.s32.totalorder %s8209_s24, 3 }
  0x10   : > { %s11178_s17 = scalar_select %p8339_p6, 1, 0 }
  0x11   : > { %p490_p9 = pnand %p6368_p7, %p489_p8 }
  0x12   : > { %11179 = sst [smem:[#allocation9_spill]] %s11178_s17 }
  0x13   : > { %493 = sbr.rel (%p490_p9) target bundleno = 2216 (0x8a8), region = 84 }
  0x18   : > { %s11180_s1 = sld [smem:[#allocation32_spill]]  ;;  %vm742_vm0 = vcmask 1044480   ;;  %vm743_vm1 = vcmask 1045504   ;;  %p547_p10 = scmp.lt.s32.totalorder %s8318_s25, 1  ;;  %v8211_v3 = vmov 65535   ;;  %vm693_vm2 = vcmask 220160  }
  0x19   : > { %v744_v4 = vsel %vm742_vm0, 4294967295, %v8211_v3  ;;  %s11181_s17 = sld [smem:[#allocation31_spill]]  ;;  %v7879_v21 = vld [vmem:[%s11145_s4 + $0x58] sm:$0xff]  ;;  %v8394_v22 = vld [vmem:[%s11143_s2] ss:$0 sm:$0xff]  ;;  %v7878_v27 = vld [vmem:[%s11145_s4 + $0x50] sm:$0xff] }
  0x1a   : > { %v745_v5 = vsel %vm743_vm1, %v744_v4, 0  ;;  %s8353_s28 = scalar_select %p547_p10, %s8318_s25, 1  ;;  %1591 = vmatpush.bf16.msra.mxu3 %v7879_v21  ;;  %v7875_v23 = vld [vmem:[%s11145_s4 + $0x38] sm:$0xff]  ;;  %v7874_v29 = vld [vmem:[%s11145_s4 + $0x30] sm:$0xff]  ;;  %vm860_vm3 = vcmask 1046528   ;;  %v7877_v33 = vld [vmem:[%s11145_s4 + $0x48] sm:$0xff] }
  0x1b   : > { %1329 = vmatpush.bf16.msra.mxu1 %v7875_v23  ;;  %8092 = vmatpush.bf16.msra.mxu2 %v7875_v23  ;;  %v7873_v35 = vld [vmem:[%s11145_s4 + $0x28] sm:$0xff]  ;;  %v7876_v41 = vld [vmem:[%s11145_s4 + $0x40] sm:$0xff]  ;;  %vm1291_vm4 = vcmask 523264   ;;  %vm1179_vm5 = vsmask.f32 7424  ;;  %vm5118_vm6 = vcmask 261120  }
  0x1c   : > { %s7849_s29 = sshll.u32 %s8353_s28, 7  ;;  %s554_s30 = scalar_lea.vmem %s11144_s3, %s8353_s28  ;;  %v7872_v45 = vld [vmem:[%s11145_s4 + $0x20] sm:$0xff]  ;;  %vm5151_vm7 = vcmask 1040384  }
  0x1d   : > { %v8434_v56 = vld [vmem:[%s554_s30] ss:$0 sm:$0xff]  ;;  %s557_s19 = scalar_lea.vmem %s11147_s6, %s8353_s28 }
  0x1e   : > { %v6441_v0 = vld [vmem:[%s11180_s1 + $0x8] sm:$0xf]  ;;  %v7867_v1 = vld [vmem:[%s11180_s1 + $0x8] sm:$0x30]  ;;  %v7866_v7 = vld [vmem:[%s11180_s1] sm:$0xff]  ;;  %1592 = vmatpush.bf16.msra.mxu3 %v7878_v27 }
  0x1f   : > { %v6442_v2 = vor.u32 %v7867_v1, %v6441_v0  ;;  %s8366_s21 = scalar_lea.vmem %s11181_s17, %s7849_s29  ;;  %1330 = vmatpush.bf16.msra.mxu1 %v7874_v29  ;;  %8093 = vmatpush.bf16.msra.mxu2 %v7874_v29  ;;  %s545_s17 = sand.u32 1, %s8201_s22  }
  0x20   : > { %v7850_v8 = vld [vmem:[%s8366_s21] sm:$0xff]  ;;  %v7851_v9 = vld [vmem:[%s8366_s21 + $0x8] sm:$0xff]  ;;  %v7852_v10 = vld [vmem:[%s8366_s21 + $0x10] sm:$0xff]  ;;  %s6271_s20 = scalar_lea.sflag [#allocation3], %s545_s17 }
  0x21   : > { %v747_v6 = vand.u32 %v6442_v2, %v745_v5  ;;  %v7853_v11 = vld [vmem:[%s8366_s21 + $0x18] sm:$0xff]  ;;  %v7854_v12 = vld [vmem:[%s8366_s21 + $0x20] sm:$0xff]  ;;  %v7855_v13 = vld [vmem:[%s8366_s21 + $0x28] sm:$0xff] }
  0x22   : > { %v7856_v14 = vld [vmem:[%s8366_s21 + $0x30] sm:$0xff]  ;;  %v7857_v15 = vld [vmem:[%s8366_s21 + $0x38] sm:$0xff]  ;;  %v7858_v16 = vld [vmem:[%s8366_s21 + $0x40] sm:$0xff]  ;;  %1593 = vmatpush.bf16.msra.mxu3 %v7877_v33 }
  0x23   : > { %755 = vmatpush.bf16.msra.mxu0 %v747_v6  ;;  %v7859_v19 = vld [vmem:[%s8366_s21 + $0x48] sm:$0xff]  ;;  %v7860_v39 = vld [vmem:[%s8366_s21 + $0x50] sm:$0xff]  ;;  %1331 = vmatpush.bf16.msra.mxu1 %v7873_v35  ;;  %v7861_v1 = vld [vmem:[%s8366_s21 + $0x58] sm:$0xff] }
  0x24   : > { %8094 = vmatpush.bf16.msra.mxu2 %v7873_v35 }
  0x26   : > { %1594 = vmatpush.bf16.msra.mxu3 %v7876_v41 }
  0x27   : > { %756 = vmatpush.bf16.msra.mxu0 %v7866_v7  ;;  %1332 = vmatpush.bf16.msra.mxu1 %v7872_v45 }
  0x28   : > { %8095 = vmatpush.bf16.msra.mxu2 %v7872_v45 }
  0x2a   : > { %6443 = vmatmul.msk.bf16.vlgmr.msra.gmra.mxu0 %vm693_vm2, %v7850_v8 }
  0x3a   : > { %6444 = vmatmul.msk.bf16.gmra.mxu0 %vm693_vm2, %v7851_v9 }
  0x4a   : > { %6445 = vmatmul.msk.bf16.gmra.mxu0 %vm693_vm2, %v7852_v10 }
  0x5a   : > { %6446 = vmatmul.msk.bf16.gmra.mxu0 %vm693_vm2, %v7853_v11 }
  0x6a   : > { %6447 = vmatmul.msk.bf16.gmra.mxu0 %vm693_vm2, %v7854_v12 }
  0x7a   : > { %6448 = vmatmul.msk.bf16.gmra.mxu0 %vm693_vm2, %v7855_v13 }
  0x8a   : > { %6449 = vmatmul.msk.bf16.gmra.mxu0 %vm693_vm2, %v7856_v14 }
  0x9a   : > { %6450 = vmatmul.msk.bf16.gmra.mxu0 %vm693_vm2, %v7857_v15 }
  0xa7   : > { %v758_v17 = vpop.f32.mrf.mxu0 }
  0xa8   : > { %v759_v28 = vadd.f32 %v8394_v22, %v758_v17 }
  0xaa   : > { %6451 = vmatmul.msk.bf16.gmra.mxu0 %vm693_vm2, %v7858_v16  ;;  %v861_v34 = vrot.slane %v759_v28, 1 }
  0xaf   : > { %v760_v18 = vpop.f32.mrf.mxu0 }
  0xb0   : > { %v761_v24 = vadd.f32 %v8394_v22, %v760_v18 }
  0xb2   : > { %v862_v30 = vrot.slane %v761_v24, 1 }
  0xb4   : > { %v863_v36 = vsel %vm860_vm3, %v861_v34, %v862_v30 }
  0xb5   : > { %v938_v43 = vmax.f32 %v759_v28, %v863_v36 }
  0xb7   : > { %v763_v20 = vpop.f32.mrf.mxu0 }
  0xb8   : > { %v764_v25 = vadd.f32 %v8394_v22, %v763_v20 }
  0xba   : > { %6452 = vmatmul.msk.bf16.gmra.mxu0 %vm693_vm2, %v7859_v19  ;;  %v864_v31 = vrot.slane %v764_v25, 1  ;;  %v964_v48 = vmax.f32 %v938_v43, %v764_v25 }
  0xbc   : > { %v865_v37 = vsel %vm860_vm3, %v862_v30, %v864_v31 }
  0xbd   : > { %v939_v44 = vmax.f32 %v761_v24, %v865_v37 }
  0xbf   : > { %v765_v26 = vpop.f32.mrf.mxu0 }
  0xc0   : > { %v766_v32 = vadd.f32 %v8394_v22, %v765_v26 }
  0xc2   : > { %v866_v38 = vrot.slane %v766_v32, 1  ;;  %v965_v49 = vmax.f32 %v939_v44, %v766_v32 }
  0xc4   : > { %v867_v46 = vsel %vm860_vm3, %v864_v31, %v866_v38  ;;  %v7862_v31 = vld [vmem:[%s8366_s21 + $0x60] sm:$0xff] }
  0xc5   : > { %v999_v51 = vmax.f32 %v964_v48, %v867_v46  ;;  %v940_v57 = vmax.f32 %v764_v25, %v867_v46 }
  0xc7   : > { %v768_v40 = vpop.f32.mrf.mxu0  ;;  %v1025_v58 = vmax.f32 %v999_v51, 0.0 }
  0xc8   : > { %v769_v42 = vadd.f32 %v8394_v22, %v768_v40 }
  0xc9   : > { %v1055_v63 = vmul.f32 %v8434_v56, %v1025_v58 }
  0xca   : > { %v868_v47 = vrot.slane %v769_v42, 1  ;;  %6453 = vmatmul.msk.bf16.gmra.mxu0 %vm693_vm2, %v7860_v39  ;;  %v966_v60 = vmax.f32 %v940_v57, %v769_v42 }
  0xcb   : > { %v1081_v5 = vpack.c.bf16 %v1055_v63, %v1055_v63 }
  0xcc   : > { %v869_v50 = vsel %vm860_vm3, %v866_v38, %v868_v47 }
  0xcd   : > { %v1000_v52 = vmax.f32 %v965_v49, %v869_v50  ;;  %v941_v6 = vmax.f32 %v766_v32, %v869_v50  ;;  %v1146_v12 = vunpack.c.l.b16 %v1081_v5 }
  0xcf   : > { %v770_v53 = vpop.f32.mrf.mxu0  ;;  %v1026_v54 = vmax.f32 %v1000_v52, 0.0 }
  0xd0   : > { %v771_v55 = vadd.f32 %v8394_v22, %v770_v53 }
  0xd1   : > { %v1056_v61 = vmul.f32 %v8434_v56, %v1026_v54 }
  0xd2   : > { %v870_v59 = vrot.slane %v771_v55, 1  ;;  %v967_v9 = vmax.f32 %v941_v6, %v771_v55 }
  0xd3   : > { %v1082_v2 = vpack.c.bf16 %v1056_v61, %v1056_v61 }
  0xd4   : > { %v871_v62 = vsel %vm860_vm3, %v868_v47, %v870_v59 }
  0xd5   : > { %v1001_v0 = vmax.f32 %v966_v60, %v871_v62  ;;  %v1147_v10 = vunpack.c.l.b16 %v1082_v2  ;;  %v942_v19 = vmax.f32 %v769_v42, %v871_v62 }
  0xd7   : > { %v773_v3 = vpop.f32.mrf.mxu0  ;;  %v1027_v7 = vmax.f32 %v1001_v0, 0.0  ;;  %v8444_v17 = vpack.c.b16 %v1147_v10, %v1146_v12 }
  0xd8   : > { %v774_v4 = vadd.f32 %v8394_v22, %v773_v3 }
  0xd9   : > { %v1057_v13 = vmul.f32 %v8434_v56, %v1027_v7  ;;  %v1183_v26 = vshll.u32 %v8444_v17, 16  ;;  %v1509_v36 = vrot.slane %v8444_v17, 1  ;;  %v1181_v37 = vshrl.u32 %v8444_v17, 16 }
  0xda   : > { %v872_v8 = vrot.slane %v774_v4, 1  ;;  %6454 = vmatmul.msk.bf16.gmra.mxu0 %vm693_vm2, %v7861_v1  ;;  %v968_v24 = vmax.f32 %v942_v19, %v774_v4  ;;  %v7863_v1 = vld [vmem:[%s8366_s21 + $0x68] sm:$0xff] }
  0xdb   : > { %v1083_v20 = vpack.c.bf16 %v1057_v13, %v1057_v13  ;;  %v1185_v34 = vrot.slane %v1183_v26, 1 }
  0xdc   : > { %v873_v11 = vsel %vm860_vm3, %v870_v59, %v872_v8 }
  0xdd   : > { %v1002_v14 = vmax.f32 %v967_v9, %v873_v11  ;;  %v1148_v28 = vunpack.c.l.b16 %v1083_v20  ;;  %v943_v38 = vmax.f32 %v771_v55, %v873_v11  ;;  %v1186_v45 = vor.u32 %v1185_v34, %v1181_v37  ;;  %v7895_v11 = vld [vmem:[%s11145_s4 + $0xd8] sm:$0xff] }
  0xde   : > { %2104 = vmatpush.bf16.msrb.mxu0 %v7895_v11 }
  0xdf   : > { %v775_v15 = vpop.f32.mrf.mxu0  ;;  %v1028_v16 = vmax.f32 %v1002_v14, 0.0 }
  0xe0   : > { %v8447_v18 = vadd.f32 %v8394_v22, %v775_v15 }
  0xe1   : > { %v1058_v21 = vmul.f32 %v8434_v56, %v1028_v16 }
  0xe2   : > { %v874_v23 = vrot.slane %v8447_v18, 1  ;;  %v969_v43 = vmax.f32 %v943_v38, %v8447_v18 }
  0xe3   : > { %v1084_v25 = vpack.c.bf16 %v1058_v21, %v1058_v21  ;;  %v7894_v21 = vld [vmem:[%s11145_s4 + $0xd0] sm:$0xff] }
  0xe4   : > { %v875_v27 = vsel %vm860_vm3, %v872_v8, %v874_v23  ;;  %2105 = vmatpush.bf16.msrb.mxu0 %v7894_v21 }
  0xe5   : > { %v1149_v29 = vunpack.c.l.b16 %v1084_v25  ;;  %v1003_v30 = vmax.f32 %v968_v24, %v875_v27  ;;  %v944_v54 = vmax.f32 %v774_v4, %v875_v27 }
  0xe7   : > { %v8454_v32 = vpack.c.b16 %v1149_v29, %v1148_v28  ;;  %v778_v33 = vpop.f32.mrf.mxu0  ;;  %v1029_v39 = vmax.f32 %v1003_v30, 0.0  ;;  %v7893_v30 = vld [vmem:[%s11145_s4 + $0xc8] sm:$0xff] }
  0xe8   : > { %v8457_v35 = vadd.f32 %v8394_v22, %v778_v33  ;;  %2106 = vmatpush.bf16.msrb.mxu0 %v7893_v30 }
  0xe9   : > { %v1510_v40 = vrot.slane %v8454_v32, 1  ;;  %v1188_v41 = vshll.u32 %v8454_v32, 16  ;;  %v1059_v48 = vmul.f32 %v8434_v56, %v1029_v39  ;;  %v1192_v4 = vshrl.u32 %v8454_v32, 16  ;;  %v7864_v39 = vld [vmem:[%s8366_s21 + $0x70] sm:$0xff] }
  0xea   : > { %v876_v42 = vrot.slane %v8457_v35, 1  ;;  %6455 = vmatmul.msk.bf16.gmra.mxu0 %vm693_vm2, %v7862_v31  ;;  %v970_v59 = vmax.f32 %v944_v54, %v8457_v35 }
  0xeb   : > { %v1511_v44 = vsel %vm860_vm3, %v1509_v36, %v1510_v40  ;;  %v1190_v46 = vrot.slane %v1188_v41, 1  ;;  %v1085_v55 = vpack.c.bf16 %v1059_v48, %v1059_v48 }
  0xec   : > { %6545 = vmatmul.msk.bf16.vlgmr.msra.gmra.mxu3 %vm1291_vm4, %v1511_v44  ;;  %v877_v47 = vsel %vm860_vm3, %v874_v23, %v876_v42 }
  0xed   : > { %v1191_v49 = vsel %vm1179_vm5, %v1186_v45, %v1190_v46  ;;  %v1004_v50 = vmax.f32 %v969_v43, %v877_v47  ;;  %v1150_v62 = vunpack.c.l.b16 %v1085_v55  ;;  %v945_v6 = vmax.f32 %v8447_v18, %v877_v47 }
  0xee   : > { %6483 = vmatmul.msk.bf16.vlgmr.msra.gmra.mxu1 %vm1291_vm4, %v1191_v49  ;;  %v1194_v14 = vor.u32 %v1192_v4, %v1190_v46 }
  0xef   : > { %v780_v51 = vpop.f32.mrf.mxu0  ;;  %v1030_v52 = vmax.f32 %v1004_v50, 0.0 }
  0xf0   : > { %v8473_v53 = vadd.f32 %v8394_v22, %v780_v51 }
  0xf1   : > { %v1060_v57 = vmul.f32 %v8434_v56, %v1030_v52 }
  0xf2   : > { %v878_v58 = vrot.slane %v8473_v53, 1  ;;  %v971_v12 = vmax.f32 %v945_v6, %v8473_v53 }
  0xf3   : > { %v1086_v60 = vpack.c.bf16 %v1060_v57, %v1060_v57 }
  0xf4   : > { %v879_v61 = vsel %vm860_vm3, %v876_v42, %v878_v58 }
  0xf5   : > { %v1151_v63 = vunpack.c.l.b16 %v1086_v60  ;;  %v1005_v0 = vmax.f32 %v970_v59, %v879_v61  ;;  %v946_v26 = vmax.f32 %v8457_v35, %v879_v61  ;;  %v7892_v35 = vld [vmem:[%s11145_s4 + $0xc0] sm:$0xff] }
  0xf6   : > { %2107 = vmatpush.bf16.msrb.mxu0 %v7892_v35 }
  0xf7   : > { %v8480_v2 = vpack.c.b16 %v1151_v63, %v1150_v62  ;;  %v783_v3 = vpop.f32.mrf.mxu0  ;;  %v1031_v7 = vmax.f32 %v1005_v0, 0.0 }
  0xf8   : > { %v8483_v5 = vadd.f32 %v8394_v22, %v783_v3 }
  0xf9   : > { %v1512_v8 = vrot.slane %v8480_v2, 1  ;;  %v1196_v9 = vshll.u32 %v8480_v2, 16  ;;  %v1061_v18 = vmul.f32 %v8434_v56, %v1031_v7  ;;  %v1200_v43 = vshrl.u32 %v8480_v2, 16 }
  0xfa   : > { %v880_v10 = vrot.slane %v8483_v5, 1  ;;  %6456 = vmatmul.msk.bf16.gmra.mxu0 %vm693_vm2, %v7863_v1  ;;  %v972_v31 = vmax.f32 %v946_v26, %v8483_v5 }
  0xfb   : > { %v8496_v13 = vsel %vm860_vm3, %v1510_v40, %v1512_v8  ;;  %v1198_v15 = vrot.slane %v1196_v9, 1  ;;  %v1087_v27 = vpack.c.bf16 %v1061_v18, %v1061_v18  ;;  %v7865_v9 = vld [vmem:[%s8366_s21 + $0x78] sm:$0xff]  ;;  %s8167_s21 = scalar_lea.hbm %s11157_s16, 2 }
  0xfc   : > { %6546 = vmatmul.msk.bf16.gmra.mxu3 %vm1291_vm4, %v8496_v13  ;;  %v881_v16 = vsel %vm860_vm3, %v878_v58, %v880_v10 }
  0xfd   : > { %v8503_v19 = vsel %vm1179_vm5, %v1194_v14, %v1198_v15  ;;  %v1006_v20 = vmax.f32 %v971_v12, %v881_v16  ;;  %v1152_v36 = vunpack.c.l.b16 %v1087_v27  ;;  %v947_v44 = vmax.f32 %v8473_v53, %v881_v16 }
  0xfe   : > { %6484 = vmatmul.msk.bf16.gmra.mxu1 %vm1291_vm4, %v8503_v19  ;;  %v1202_v51 = vor.u32 %v1200_v43, %v1198_v15 }
  0xff   : > { %v785_v23 = vpop.f32.mrf.mxu0  ;;  %v1032_v24 = vmax.f32 %v1006_v20, 0.0 }
 0x100   : > { %v786_v25 = vadd.f32 %v8394_v22, %v785_v23 }
 0x101   : > { %v1062_v28 = vmul.f32 %v8434_v56, %v1032_v24 }
 0x102   : > { %v882_v29 = vrot.slane %v786_v25, 1  ;;  %v973_v49 = vmax.f32 %v947_v44, %v786_v25 }
 0x103   : > { %v1088_v33 = vpack.c.bf16 %v1062_v28, %v1062_v28 }
 0x104   : > { %v883_v34 = vsel %vm860_vm3, %v880_v10, %v882_v29 }
 0x105   : > { %v1153_v37 = vunpack.c.l.b16 %v1088_v33  ;;  %v1007_v38 = vmax.f32 %v972_v31, %v883_v34  ;;  %v948_v61 = vmax.f32 %v8483_v5, %v883_v34 }
 0x107   : > { %v8522_v40 = vpack.c.b16 %v1153_v37, %v1152_v36  ;;  %v788_v41 = vpop.f32.mrf.mxu0  ;;  %v1033_v45 = vmax.f32 %v1007_v38, 0.0 }
 0x108   : > { %v789_v42 = vadd.f32 %v8394_v22, %v788_v41 }
 0x109   : > { %v1514_v46 = vrot.slane %v8522_v40, 1  ;;  %v1204_v47 = vshll.u32 %v8522_v40, 16  ;;  %v1063_v53 = vmul.f32 %v8434_v56, %v1033_v45  ;;  %v1208_v14 = vshrl.u32 %v8522_v40, 16 }
 0x10a   : > { %v884_v48 = vrot.slane %v789_v42, 1  ;;  %6457 = vmatmul.msk.bf16.gmra.mxu0 %vm693_vm2, %v7864_v39  ;;  %v974_v1 = vmax.f32 %v948_v61, %v789_v42 }
 0x10b   : > { %v8531_v50 = vsel %vm860_vm3, %v1512_v8, %v1514_v46  ;;  %v1206_v52 = vrot.slane %v1204_v47, 1  ;;  %v1089_v62 = vpack.c.bf16 %v1063_v53, %v1063_v53 }
 0x10c   : > { %11182 = vst [vmem:[#allocation10_spill] sm:$0xff] %v8531_v50  ;;  %6547 = vmatmul.msk.bf16.gmra.mxu3 %vm1291_vm4, %v8531_v50  ;;  %v885_v54 = vsel %vm860_vm3, %v882_v29, %v884_v48 }
 0x10d   : > { %v8538_v55 = vsel %vm1179_vm5, %v1202_v51, %v1206_v52  ;;  %v1008_v57 = vmax.f32 %v973_v49, %v885_v54  ;;  %v1154_v6 = vunpack.c.l.b16 %v1089_v62  ;;  %v949_v5 = vmax.f32 %v786_v25, %v885_v54 }
 0x10e   : > { %6485 = vmatmul.msk.bf16.gmra.mxu1 %vm1291_vm4, %v8538_v55  ;;  %v1210_v24 = vor.u32 %v1208_v14, %v1206_v52 }
 0x10f   : > { %v790_v58 = vpop.f32.mrf.mxu0  ;;  %v1034_v59 = vmax.f32 %v1008_v57, 0.0 }
 0x110   : > { %v791_v60 = vadd.f32 %v8394_v22, %v790_v58 }
 0x111   : > { %v1064_v63 = vmul.f32 %v8434_v56, %v1034_v59 }
 0x112   : > { %v886_v0 = vrot.slane %v791_v60, 1  ;;  %v975_v21 = vmax.f32 %v949_v5, %v791_v60 }
 0x113   : > { %v1090_v3 = vpack.c.bf16 %v1064_v63, %v1064_v63 }
 0x114   : > { %v887_v4 = vsel %vm860_vm3, %v884_v48, %v886_v0 }
 0x115   : > { %v1155_v7 = vunpack.c.l.b16 %v1090_v3  ;;  %v1009_v8 = vmax.f32 %v974_v1, %v887_v4  ;;  %v950_v34 = vmax.f32 %v789_v42, %v887_v4 }
 0x117   : > { %v8547_v10 = vpack.c.b16 %v1155_v7, %v1154_v6  ;;  %v793_v11 = vpop.f32.mrf.mxu0  ;;  %v1035_v15 = vmax.f32 %v1009_v8, 0.0 }
 0x118   : > { %v794_v12 = vadd.f32 %v8394_v22, %v793_v11 }
 0x119   : > { %v1516_v16 = vrot.slane %v8547_v10, 1  ;;  %v1212_v18 = vshll.u32 %v8547_v10, 16  ;;  %v1065_v25 = vmul.f32 %v8434_v56, %v1035_v15  ;;  %v1216_v49 = vshrl.u32 %v8547_v10, 16 }
 0x11a   : > { %v888_v20 = vrot.slane %v794_v12, 1  ;;  %6458 = vmatmul.msk.bf16.gmra.mxu0 %vm693_vm2, %v7865_v9  ;;  %v976_v39 = vmax.f32 %v950_v34, %v794_v12 }
 0x11b   : > { %v8555_v23 = vsel %vm860_vm3, %v1514_v46, %v1516_v16  ;;  %v1214_v26 = vrot.slane %v1212_v18, 1  ;;  %v1091_v36 = vpack.c.bf16 %v1065_v25, %v1065_v25 }
 0x11c   : > { %11183 = vst [vmem:[#allocation11_spill] sm:$0xff] %v8555_v23  ;;  %6548 = vmatmul.msk.bf16.gmra.mxu3 %vm1291_vm4, %v8555_v23  ;;  %v889_v27 = vsel %vm860_vm3, %v886_v0, %v888_v20 }
 0x11d   : > { %v8562_v28 = vsel %vm1179_vm5, %v1210_v24, %v1214_v26  ;;  %v1010_v29 = vmax.f32 %v975_v21, %v889_v27  ;;  %v1156_v43 = vunpack.c.l.b16 %v1091_v36  ;;  %v951_v51 = vmax.f32 %v791_v60, %v889_v27 }
 0x11e   : > { %6486 = vmatmul.msk.bf16.gmra.mxu1 %vm1291_vm4, %v8562_v28  ;;  %v1218_v59 = vor.u32 %v1216_v49, %v1214_v26 }
 0x11f   : > { %v795_v30 = vpop.f32.mrf.mxu0  ;;  %v1036_v31 = vmax.f32 %v1010_v29, 0.0 }
 0x120   : > { %v796_v33 = vadd.f32 %v8394_v22, %v795_v30 }
 0x121   : > { %v1066_v37 = vmul.f32 %v8434_v56, %v1036_v31 }
 0x122   : > { %v890_v38 = vrot.slane %v796_v33, 1  ;;  %v977_v57 = vmax.f32 %v951_v51, %v796_v33 }
 0x123   : > { %v1092_v35 = vpack.c.bf16 %v1066_v37, %v1066_v37 }
 0x124   : > { %v891_v41 = vsel %vm860_vm3, %v888_v20, %v890_v38 }
 0x125   : > { %v1157_v44 = vunpack.c.l.b16 %v1092_v35  ;;  %v1011_v45 = vmax.f32 %v976_v39, %v891_v41  ;;  %v952_v6 = vmax.f32 %v794_v12, %v891_v41 }
 0x127   : > { %v8569_v46 = vpack.c.b16 %v1157_v44, %v1156_v43  ;;  %v798_v47 = vpop.f32.mrf.mxu0  ;;  %v1037_v42 = vmax.f32 %v1011_v45, 0.0 }
 0x128   : > { %v799_v48 = vadd.f32 %v8394_v22, %v798_v47 }
 0x129   : > { %v1518_v52 = vrot.slane %v8569_v46, 1  ;;  %v1220_v54 = vshll.u32 %v8569_v46, 16  ;;  %v1067_v62 = vmul.f32 %v8434_v56, %v1037_v42  ;;  %v1224_v26 = vshrl.u32 %v8569_v46, 16 }
 0x12a   : > { %v892_v53 = vrot.slane %v799_v48, 1  ;;  %6685 = vmatmul.msk.bf16.vlgmr.msrb.gmra.mxu0 %vm1291_vm4, %v8480_v2  ;;  %v978_v11 = vmax.f32 %v952_v6, %v799_v48 }
 0x12b   : > { %v8578_v58 = vsel %vm860_vm3, %v1516_v16, %v1518_v52  ;;  %v1222_v61 = vrot.slane %v1220_v54, 1  ;;  %v1093_v7 = vpack.c.bf16 %v1067_v62, %v1067_v62 }
 0x12c   : > { %11184 = vst [vmem:[#allocation12_spill] sm:$0xff] %v8578_v58  ;;  %6549 = vmatmul.msk.bf16.gmra.mxu3 %vm1291_vm4, %v8578_v58  ;;  %v893_v60 = vsel %vm860_vm3, %v890_v38, %v892_v53 }
 0x12d   : > { %v8585_v63 = vsel %vm1179_vm5, %v1218_v59, %v1222_v61  ;;  %v1012_v0 = vmax.f32 %v977_v57, %v893_v60  ;;  %v1158_v15 = vunpack.c.l.b16 %v1093_v7  ;;  %v953_v27 = vmax.f32 %v796_v33, %v893_v60 }
 0x12e   : > { %6487 = vmatmul.msk.bf16.gmra.mxu1 %vm1291_vm4, %v8585_v63  ;;  %v1226_v36 = vor.u32 %v1224_v26, %v1222_v61 }
 0x12f   : > { %v800_v1 = vpop.f32.mrf.mxu0  ;;  %v1038_v3 = vmax.f32 %v1012_v0, 0.0 }
 0x130   : > { %v801_v4 = vadd.f32 %v8394_v22, %v800_v1 }
 0x131   : > { %v1068_v8 = vmul.f32 %v8434_v56, %v1038_v3 }
 0x132   : > { %v894_v9 = vrot.slane %v801_v4, 1  ;;  %v979_v31 = vmax.f32 %v953_v27, %v801_v4 }
 0x133   : > { %v1094_v14 = vpack.c.bf16 %v1068_v8, %v1068_v8 }
 0x134   : > { %v895_v5 = vsel %vm860_vm3, %v892_v53, %v894_v9 }
 0x135   : > { %v1159_v16 = vunpack.c.l.b16 %v1094_v14  ;;  %v1013_v18 = vmax.f32 %v978_v11, %v895_v5  ;;  %v954_v45 = vmax.f32 %v799_v48, %v895_v5 }
 0x137   : > { %v8592_v20 = vpack.c.b16 %v1159_v16, %v1158_v15  ;;  %v803_v21 = vpop.f32.mrf.mxu0  ;;  %v1039_v12 = vmax.f32 %v1013_v18, 0.0 }
 0x138   : > { %v804_v24 = vadd.f32 %v8394_v22, %v803_v21 }
 0x139   : > { %v1520_v25 = vrot.slane %v8592_v20, 1  ;;  %v1228_v29 = vshll.u32 %v8592_v20, 16  ;;  %v1069_v38 = vmul.f32 %v8434_v56, %v1039_v12  ;;  %v1232_v0 = vshrl.u32 %v8592_v20, 16 }
 0x13a   : > { %v896_v30 = vrot.slane %v804_v24, 1  ;;  %6686 = vmatmul.msk.bf16.gmra.mxu0 %vm1291_vm4, %v8522_v40  ;;  %v980_v42 = vmax.f32 %v954_v45, %v804_v24 }
 0x13b   : > { %v8601_v34 = vsel %vm860_vm3, %v1518_v52, %v1520_v25  ;;  %v1230_v37 = vrot.slane %v1228_v29, 1  ;;  %v1095_v47 = vpack.c.bf16 %v1069_v38, %v1069_v38 }
 0x13c   : > { %11185 = vst [vmem:[#allocation13_spill] sm:$0xff] %v8601_v34  ;;  %6550 = vmatmul.msk.bf16.gmra.mxu3 %vm1291_vm4, %v8601_v34  ;;  %v897_v33 = vsel %vm860_vm3, %v894_v9, %v896_v30 }
 0x13d   : > { %v8608_v39 = vsel %vm1179_vm5, %v1226_v36, %v1230_v37  ;;  %v1014_v35 = vmax.f32 %v979_v31, %v897_v33  ;;  %v1160_v53 = vunpack.c.l.b16 %v1095_v47  ;;  %v955_v48 = vmax.f32 %v801_v4, %v897_v33 }
 0x13e   : > { %6488 = vmatmul.msk.bf16.gmra.mxu1 %vm1291_vm4, %v8608_v39  ;;  %v1234_v11 = vor.u32 %v1232_v0, %v1230_v37 }
 0x13f   : > { %v805_v41 = vpop.f32.mrf.mxu0  ;;  %v1040_v43 = vmax.f32 %v1014_v35, 0.0 }
 0x140   : > { %v806_v44 = vadd.f32 %v8394_v22, %v805_v41 }
 0x141   : > { %v1070_v49 = vmul.f32 %v8434_v56, %v1040_v43 }
 0x142   : > { %v898_v51 = vrot.slane %v806_v44, 1  ;;  %v981_v8 = vmax.f32 %v955_v48, %v806_v44  ;;  %v7883_v48 = vld [vmem:[%s11145_s4 + $0x78] sm:$0xff] }
 0x143   : > { %v1096_v52 = vpack.c.bf16 %v1070_v49, %v1070_v49  ;;  %1718 = vmatpush.bf16.msrb.mxu1 %v7883_v48 }
 0x144   : > { %v899_v54 = vsel %vm860_vm3, %v896_v30, %v898_v51 }
 0x145   : > { %v1161_v57 = vunpack.c.l.b16 %v1096_v52  ;;  %v1015_v59 = vmax.f32 %v980_v42, %v899_v54  ;;  %v956_v27 = vmax.f32 %v804_v24, %v899_v54 }
 0x147   : > { %v8615_v61 = vpack.c.b16 %v1161_v57, %v1160_v53  ;;  %v808_v60 = vpop.f32.mrf.mxu0  ;;  %v1041_v1 = vmax.f32 %v1015_v59, 0.0 }
 0x148   : > { %v8618_v62 = vadd.f32 %v8394_v22, %v808_v60 }
 0x149   : > { %v1522_v3 = vrot.slane %v8615_v61, 1  ;;  %v1236_v6 = vshll.u32 %v8615_v61, 16  ;;  %v1071_v5 = vmul.f32 %v8434_v56, %v1041_v1  ;;  %v1240_v24 = vshrl.u32 %v8615_v61, 16 }
 0x14a   : > { %v900_v7 = vrot.slane %v8618_v62, 1  ;;  %6687 = vmatmul.msk.bf16.gmra.mxu0 %vm1291_vm4, %v8547_v10  ;;  %v982_v30 = vmax.f32 %v956_v27, %v8618_v62 }
 0x14b   : > { %v8627_v9 = vsel %vm860_vm3, %v1520_v25, %v1522_v3  ;;  %v1238_v14 = vrot.slane %v1236_v6, 1  ;;  %v1097_v12 = vpack.c.bf16 %v1071_v5, %v1071_v5  ;;  %v7871_v6 = vld [vmem:[%s11145_s4 + $0x18] sm:$0xff]  ;;  %v7882_v5 = vld [vmem:[%s11145_s4 + $0x70] sm:$0xff] }
 0x14c   : > { %11186 = vst [vmem:[#allocation14_spill] sm:$0xff] %v8627_v9  ;;  %6551 = vmatmul.msk.bf16.gmra.mxu3 %vm1291_vm4, %v8627_v9  ;;  %v901_v4 = vsel %vm860_vm3, %v898_v51, %v900_v7  ;;  %1439 = vmatpush.bf16.msrb.mxu2 %v7871_v6 }
 0x14d   : > { %v8634_v15 = vsel %vm1179_vm5, %v1234_v11, %v1238_v14  ;;  %v1016_v16 = vmax.f32 %v981_v8, %v901_v4  ;;  %v1162_v37 = vunpack.c.l.b16 %v1097_v12  ;;  %v957_v45 = vmax.f32 %v806_v44, %v901_v4  ;;  %1719 = vmatpush.bf16.msrb.mxu1 %v7882_v5 }
 0x14e   : > { %6489 = vmatmul.msk.bf16.gmra.mxu1 %vm1291_vm4, %v8634_v15  ;;  %v1242_v53 = vor.u32 %v1240_v24, %v1238_v14 }
 0x14f   : > { %v810_v18 = vpop.f32.mrf.mxu0  ;;  %v1042_v21 = vmax.f32 %v1016_v16, 0.0 }
 0x150   : > { %v8639_v26 = vadd.f32 %v8394_v22, %v810_v18 }
 0x151   : > { %v1072_v25 = vmul.f32 %v8434_v56, %v1042_v21  ;;  %v7870_v21 = vld [vmem:[%s11145_s4 + $0x10] sm:$0xff] }
 0x152   : > { %v902_v29 = vrot.slane %v8639_v26, 1  ;;  %v983_v52 = vmax.f32 %v957_v45, %v8639_v26  ;;  %1440 = vmatpush.bf16.msrb.mxu2 %v7870_v21 }
 0x153   : > { %v1098_v31 = vpack.c.bf16 %v1072_v25, %v1072_v25 }
 0x154   : > { %v903_v36 = vsel %vm860_vm3, %v900_v7, %v902_v29 }
 0x155   : > { %v1163_v33 = vunpack.c.l.b16 %v1098_v31  ;;  %v1017_v38 = vmax.f32 %v982_v30, %v903_v36  ;;  %v958_v8 = vmax.f32 %v8618_v62, %v903_v36  ;;  %v7869_v36 = vld [vmem:[%s11145_s4 + $0x8] sm:$0xff] }
 0x156   : > { %1441 = vmatpush.bf16.msrb.mxu2 %v7869_v36 }
 0x157   : > { %v8645_v35 = vpack.c.b16 %v1163_v33, %v1162_v37  ;;  %v813_v41 = vpop.f32.mrf.mxu0  ;;  %v1043_v47 = vmax.f32 %v1017_v38, 0.0 }
 0x158   : > { %v814_v43 = vadd.f32 %v8394_v22, %v813_v41 }
 0x159   : > { %v1524_v49 = vrot.slane %v8645_v35, 1  ;;  %v1244_v51 = vshll.u32 %v8645_v35, 16  ;;  %v1073_v59 = vmul.f32 %v8434_v56, %v1043_v47  ;;  %v1248_v38 = vshrl.u32 %v8645_v35, 16 }
 0x15a   : > { %v904_v42 = vrot.slane %v814_v43, 1  ;;  %6688 = vmatmul.msk.bf16.gmra.mxu0 %vm1291_vm4, %v8569_v46  ;;  %v984_v16 = vmax.f32 %v958_v8, %v814_v43 }
 0x15b   : > { %v8655_v54 = vsel %vm860_vm3, %v1522_v3, %v1524_v49  ;;  %v1246_v57 = vrot.slane %v1244_v51, 1  ;;  %v1099_v11 = vpack.c.bf16 %v1073_v59, %v1073_v59 }
 0x15c   : > { %11187 = vst [vmem:[#allocation15_spill] sm:$0xff] %v8655_v54  ;;  %6552 = vmatmul.msk.bf16.gmra.mxu3 %vm1291_vm4, %v8655_v54  ;;  %v905_v44 = vsel %vm860_vm3, %v902_v29, %v904_v42  ;;  %v7881_v29 = vld [vmem:[%s11145_s4 + $0x68] sm:$0xff] }
 0x15d   : > { %v8662_v60 = vsel %vm1179_vm5, %v1242_v53, %v1246_v57  ;;  %v1018_v0 = vmax.f32 %v983_v52, %v905_v44  ;;  %v1164_v62 = vunpack.c.l.b16 %v1099_v11  ;;  %1720 = vmatpush.bf16.msrb.mxu1 %v7881_v29  ;;  %v959_v41 = vmax.f32 %v8639_v26, %v905_v44  ;;  %v7890_v11 = vld [vmem:[%s11145_s4 + $0xb0] sm:$0xff] }
 0x15e   : > { %6490 = vmatmul.msk.bf16.gmra.mxu1 %vm1291_vm4, %v8662_v60  ;;  %v1250_v44 = vor.u32 %v1248_v38, %v1246_v57  ;;  %v7888_v38 = vld [vmem:[%s11145_s4 + $0xa0] sm:$0xff] }
 0x15f   : > { %v815_v1 = vpop.f32.mrf.mxu0  ;;  %v1044_v3 = vmax.f32 %v1018_v0, 0.0  ;;  %v7868_v0 = vld [vmem:[%s11145_s4] sm:$0xff] }
 0x160   : > { %v8673_v7 = vadd.f32 %v8394_v22, %v815_v1  ;;  %v7891_v1 = vld [vmem:[%s11145_s4 + $0xb8] sm:$0xff]  ;;  %1442 = vmatpush.bf16.msrb.mxu2 %v7868_v0 }
 0x161   : > { %v1074_v14 = vmul.f32 %v8434_v56, %v1044_v3  ;;  %1977 = vmatpush.bf16.msrb.mxu3 %v7891_v1 }
 0x162   : > { %v906_v4 = vrot.slane %v8673_v7, 1  ;;  %v985_v52 = vmax.f32 %v959_v41, %v8673_v7 }
 0x163   : > { %v1100_v18 = vpack.c.bf16 %v1074_v14, %v1074_v14 }
 0x164   : > { %v907_v27 = vsel %vm860_vm3, %v904_v42, %v906_v4 }
 0x165   : > { %v1165_v12 = vunpack.c.l.b16 %v1100_v18  ;;  %v1019_v25 = vmax.f32 %v984_v16, %v907_v27  ;;  %v960_v33 = vmax.f32 %v814_v43, %v907_v27  ;;  %v7880_v43 = vld [vmem:[%s11145_s4 + $0x60] sm:$0xff]  ;;  %1978 = vmatpush.bf16.msrb.mxu3 %v7890_v11  ;;  %v7889_v27 = vld [vmem:[%s11145_s4 + $0xa8] sm:$0xff] }
 0x166   : > { %1721 = vmatpush.bf16.msrb.mxu1 %v7880_v43 }
 0x167   : > { %v8688_v30 = vpack.c.b16 %v1165_v12, %v1164_v62  ;;  %v818_v31 = vpop.f32.mrf.mxu0  ;;  %v1045_v24 = vmax.f32 %v1019_v25, 0.0 }
 0x168   : > { %v8694_v37 = vadd.f32 %v8394_v22, %v818_v31 }
 0x169   : > { %v1526_v45 = vrot.slane %v8688_v30, 1  ;;  %v1252_v47 = vshll.u32 %v8688_v30, 16  ;;  %v1075_v3 = vmul.f32 %v8434_v56, %v1045_v24  ;;  %1979 = vmatpush.bf16.msrb.mxu3 %v7889_v27  ;;  %v1256_v24 = vshrl.u32 %v8688_v30, 16 }
 0x16a   : > { %v908_v51 = vrot.slane %v8694_v37, 1  ;;  %v986_v42 = vmax.f32 %v960_v33, %v8694_v37  ;;  %6689 = vmatmul.msk.bf16.gmra.mxu0 %vm1291_vm4, %v8592_v20 }
 0x16b   : > { %v8708_v26 = vpop.f32.mrf.mxu1  ;;  %v8711_v53 = vsel %vm860_vm3, %v1524_v49, %v1526_v45  ;;  %v1254_v59 = vrot.slane %v1252_v47, 1 }
 0x16c   : > { %11188 = vst [vmem:[#allocation16_spill] sm:$0xff] %v8711_v53  ;;  %6553 = vmatmul.msk.bf16.gmra.mxu3 %vm1291_vm4, %v8711_v53  ;;  %v909_v48 = vsel %vm860_vm3, %v906_v4, %v908_v51  ;;  %v1101_v4 = vpack.c.bf16 %v1075_v3, %v1075_v3 }
 0x16d   : > { %v8724_v49 = vsel %vm1179_vm5, %v1250_v44, %v1254_v59  ;;  %v1020_v57 = vmax.f32 %v985_v52, %v909_v48  ;;  %v961_v47 = vmax.f32 %v8673_v7, %v909_v48  ;;  %v1258_v44 = vor.u32 %v1256_v24, %v1254_v59  ;;  %1980 = vmatpush.bf16.msrb.mxu3 %v7888_v38  ;;  %v7887_v59 = vld [vmem:[%s11145_s4 + $0x98] sm:$0xff] }
 0x16e   : > { %6491 = vmatmul.msk.bf16.gmra.mxu1 %vm1291_vm4, %v8724_v49  ;;  %v1166_v12 = vunpack.c.l.b16 %v1101_v4 }
 0x16f   : > { %v820_v6 = vpop.f32.mrf.mxu0  ;;  %v1046_v8 = vmax.f32 %v1020_v57, 0.0  ;;  %v8788_v4 = vpop.f32.mrf.mxu3 }
 0x170   : > { %v8732_v14 = vadd.f32 %v8394_v22, %v820_v6 }
 0x171   : > { %v1076_v5 = vmul.f32 %v8434_v56, %v1046_v8 }
 0x172   : > { %v8736_v16 = vrot.slane %v8732_v14, 1  ;;  %v987_v0 = vmax.f32 %v961_v47, %v8732_v14 }
 0x173   : > { %v1102_v18 = vpack.c.bf16 %v1076_v5, %v1076_v5  ;;  %v8738_v21 = vpop.f32.mrf.mxu1 }
 0x174   : > { %v8745_v62 = vsel %vm860_vm3, %v908_v51, %v8736_v16 }
 0x175   : > { %v1167_v25 = vunpack.c.l.b16 %v1102_v18  ;;  %v962_v29 = vmax.f32 %v8694_v37, %v8745_v62  ;;  %v1021_v31 = vmax.f32 %v986_v42, %v8745_v62 }
 0x177   : > { %v8750_v36 = vpack.c.b16 %v1167_v25, %v1166_v12  ;;  %v823_v33 = vpop.f32.mrf.mxu0  ;;  %v1047_v51 = vmax.f32 %v1021_v31, 0.0 }
 0x178   : > { %v8756_v41 = vadd.f32 %v8394_v22, %v823_v33 }
 0x179   : > { %v8761_v43 = vrot.slane %v8750_v36, 1  ;;  %v1260_v42 = vshll.u32 %v8750_v36, 16  ;;  %v1264_v3 = vshrl.u32 %v8750_v36, 16  ;;  %v1077_v8 = vmul.f32 %v8434_v56, %v1047_v51  ;;  %v8799_v51 = vpop.f32.mrf.mxu3 }
 0x17a   : > { %v992_v52 = vrot.slane %v8756_v41, 1  ;;  %6690 = vmatmul.msk.bf16.gmra.mxu0 %vm1291_vm4, %v8615_v61 }
 0x17b   : > { %v8768_v1 = vpop.f32.mrf.mxu1  ;;  %v8772_v7 = vsel %vm860_vm3, %v1526_v45, %v8761_v43  ;;  %v1262_v48 = vrot.slane %v1260_v42, 1  ;;  %v1103_v12 = vpack.c.bf16 %v1077_v8, %v1077_v8 }
 0x17c   : > { %11189 = vst [vmem:[#allocation17_spill] sm:$0xff] %v8772_v7  ;;  %v993_v57 = vsel %vm860_vm3, %v8736_v16, %v992_v52  ;;  %6554 = vmatmul.msk.bf16.gmra.mxu3 %vm1291_vm4, %v8772_v7 }
 0x17d   : > { %v1022_v6 = vmax.f32 %v987_v0, %v993_v57  ;;  %v8784_v11 = vsel %vm1179_vm5, %v1258_v44, %v1262_v48  ;;  %v8786_v45 = vor.u32 %v1264_v3, %v1262_v48  ;;  %v1684_v33 = vunpack.c.l.b16 %v1103_v12 }
 0x17e   : > { %6492 = vmatmul.msk.bf16.gmra.mxu1 %vm1291_vm4, %v8784_v11 }
 0x17f   : > { %v1048_v5 = vmax.f32 %v1022_v6, 0.0  ;;  %v825_v18 = vpop.f32.mrf.mxu0  ;;  %6493 = vmatmul.msk.bf16.vlgmr.msra.gmra.mxu2 %vm1291_vm4, %v8786_v45 }
 0x180   : > { %1850 = vmatpush.bf16.msra.mxu2 %v7887_v59  ;;  %v7886_v59 = vld [vmem:[%s11145_s4 + $0x90] sm:$0xff] }
 0x181   : > { %v1078_v27 = vmul.f32 %v8434_v56, %v1048_v5  ;;  %v8811_v0 = vpop.f32.mrf.mxu3 }
 0x183   : > { %v1104_v25 = vpack.c.bf16 %v1078_v27, %v1078_v27  ;;  %v8795_v31 = vpop.f32.mrf.mxu1  ;;  %v826_v27 = vadd.f32 %v8394_v22, %v825_v18 }
 0x184   : > { %1851 = vmatpush.bf16.msra.mxu2 %v7886_v59 }
 0x185   : > { %v1685_v38 = vunpack.c.l.b16 %v1104_v25  ;;  %v963_v25 = vmax.f32 %v8732_v14, %v8736_v16 }
 0x187   : > { %v828_v24 = vpop.f32.mrf.mxu0  ;;  %v8797_v47 = vpack.c.b16 %v1685_v38, %v1684_v33  ;;  %v988_v33 = vmax.f32 %v962_v29, %v8756_v41 }
 0x189   : > { %v8822_v6 = vpop.f32.mrf.mxu3 }
 0x18a   : > { %6691 = vmatmul.msk.bf16.gmra.mxu0 %vm1291_vm4, %v8645_v35 }
 0x18b   : > { %v8803_v42 = vpop.f32.mrf.mxu1 }
 0x18c   : > { %6555 = vmatmul.msk.bf16.gmra.mxu3 %vm1291_vm4, %v8761_v43 }
 0x18e   : > { %6580 = vmatmul.msk.bf16.vlgmr.msrb.gmra.mxu1 %vm1291_vm4, %v8454_v32 }
 0x18f   : > { %v829_v44 = vpop.f32.mrf.mxu0  ;;  %6510 = vmatmul.msk.bf16.vlgmr.msrb.gmra.mxu2 %vm1291_vm4, %v8444_v17 }
 0x191   : > { %v8832_v5 = vpop.f32.mrf.mxu3 }
 0x193   : > { %v8813_v48 = vpop.f32.mrf.mxu1 }
 0x197   : > { %v831_v3 = vpop.f32.mrf.mxu0 }
 0x199   : > { %v8847_v22 = vpop.f32.mrf.mxu3 }
 0x19a   : > { %6692 = vmatmul.msk.bf16.gmra.mxu0 %vm1291_vm4, %v8688_v30 }
 0x19b   : > { %v8817_v57 = vpop.f32.mrf.mxu1 }
 0x19c   : > { %6650 = vmatmul.msk.bf16.vlgmr.msrb.gmra.mxu3 %vm1291_vm4, %v8496_v13  ;;  %v994_v13 = vrot.slane %v826_v27, 1 }
 0x19e   : > { %6581 = vmatmul.msk.bf16.gmra.mxu1 %vm1291_vm4, %v8480_v2  ;;  %v995_v18 = vsel %vm860_vm3, %v992_v52, %v994_v13 }
 0x19f   : > { %v832_v17 = vpop.f32.mrf.mxu0  ;;  %6511 = vmatmul.msk.bf16.gmra.mxu2 %vm1291_vm4, %v8454_v32  ;;  %v989_v32 = vmax.f32 %v963_v25, %v826_v27  ;;  %v1023_v24 = vmax.f32 %v988_v33, %v995_v18 }
 0x1a1   : > { %v1024_v14 = vmax.f32 %v989_v32, %v994_v13  ;;  %v1049_v16 = vmax.f32 %v1023_v24, 0.0  ;;  %v8856_v3 = vpop.f32.mrf.mxu3  ;;  %v7885_v13 = vld [vmem:[%s11145_s4 + $0x88] sm:$0xff] }
 0x1a2   : > { %1852 = vmatpush.bf16.msra.mxu2 %v7885_v13 }
 0x1a3   : > { %v8830_v8 = vpop.f32.mrf.mxu1  ;;  %v1050_v44 = vmax.f32 %v1024_v14, 0.0  ;;  %v1079_v37 = vmul.f32 %v8434_v56, %v1049_v16 }
 0x1a5   : > { %v1080_v52 = vmul.f32 %v8434_v56, %v1050_v44  ;;  %v1105_v29 = vpack.c.bf16 %v1079_v37, %v1079_v37 }
 0x1a7   : > { %v1106_v62 = vpack.c.bf16 %v1080_v52, %v1080_v52  ;;  %v2070_v27 = vunpack.c.l.b16 %v1105_v29 }
 0x1a9   : > { %v2071_v59 = vunpack.c.l.b16 %v1106_v62  ;;  %v8872_v17 = vpop.f32.mrf.mxu3 }
 0x1aa   : > { %6693 = vmatmul.msk.bf16.gmra.mxu0 %vm1291_vm4, %v8750_v36 }
 0x1ab   : > { %v8837_v12 = vpop.f32.mrf.mxu1  ;;  %v8877_v25 = vpack.c.b16 %v2071_v59, %v2070_v27 }
 0x1ac   : > { %6651 = vmatmul.msk.bf16.gmra.mxu3 %vm1291_vm4, %v8531_v50 }
 0x1ae   : > { %6582 = vmatmul.msk.bf16.gmra.mxu1 %vm1291_vm4, %v8522_v40 }
 0x1af   : > { %6512 = vmatmul.msk.bf16.gmra.mxu2 %vm1291_vm4, %v8480_v2 }
 0x1b3   : > { %v8854_v38 = vpop.f32.mrf.mxu1 }
 0x1ba   : > { %6694 = vmatmul.msk.bf16.gmra.mxu0 %vm1291_vm4, %v8797_v47 }
 0x1bb   : > { %v8860_v2 = vpop.f32.mrf.mxu1 }
 0x1bc   : > { %6652 = vmatmul.msk.bf16.gmra.mxu3 %vm1291_vm4, %v8555_v23 }
 0x1be   : > { %6583 = vmatmul.msk.bf16.gmra.mxu1 %vm1291_vm4, %v8547_v10 }
 0x1bf   : > { %6513 = vmatmul.msk.bf16.gmra.mxu2 %vm1291_vm4, %v8522_v40  ;;  %v8885_v40 = vpop.f32.mrf.mxu3 }
 0x1c3   : > { %v8870_v41 = vpop.f32.mrf.mxu1 }
 0x1c7   : > { %v8893_v18 = vpop.f32.mrf.mxu3 }
 0x1ca   : > { %6695 = vmatmul.msk.bf16.gmra.mxu0 %vm1291_vm4, %v8877_v25 }
 0x1cb   : > { %v8881_v56 = vpop.f32.mrf.mxu1 }
 0x1cc   : > { %6653 = vmatmul.msk.bf16.gmra.mxu3 %vm1291_vm4, %v8578_v58  ;;  %v7897_v58 = vld [vmem:[%s11145_s4 + $0xe8] sm:$0xff] }
 0x1ce   : > { %6584 = vmatmul.msk.bf16.gmra.mxu1 %vm1291_vm4, %v8569_v46 }
 0x1cf   : > { %6514 = vmatmul.msk.bf16.gmra.mxu2 %vm1291_vm4, %v8547_v10  ;;  %v8903_v24 = vpop.f32.mrf.mxu3 }
 0x1d3   : > { %v8891_v32 = vpop.f32.mrf.mxu1 }
 0x1d7   : > { %v8909_v16 = vpop.f32.mrf.mxu3 }
 0x1db   : > { %v8895_v33 = vpop.f32.mrf.mxu1 }
 0x1dc   : > { %6654 = vmatmul.msk.bf16.gmra.mxu3 %vm1291_vm4, %v8601_v34 }
 0x1de   : > { %6585 = vmatmul.msk.bf16.gmra.mxu1 %vm1291_vm4, %v8592_v20 }
 0x1df   : > { %6515 = vmatmul.msk.bf16.gmra.mxu2 %vm1291_vm4, %v8569_v46  ;;  %v7884_v46 = vld [vmem:[%s11145_s4 + $0x80] sm:$0xff]  ;;  %v8922_v52 = vpop.f32.mrf.mxu3 }
 0x1e0   : > { %1853 = vmatpush.bf16.msra.mxu2 %v7884_v46 }
 0x1e3   : > { %v8905_v14 = vpop.f32.mrf.mxu1 }
 0x1eb   : > { %v8907_v10 = vpop.f32.mrf.mxu1 }
 0x1ec   : > { %6655 = vmatmul.msk.bf16.gmra.mxu3 %vm1291_vm4, %v8627_v9 }
 0x1ee   : > { %6586 = vmatmul.msk.bf16.gmra.mxu1 %vm1291_vm4, %v8615_v61 }
 0x1ef   : > { %6516 = vmatmul.msk.bf16.gmra.mxu2 %vm1291_vm4, %v8592_v20  ;;  %v8932_v20 = vpop.f32.mrf.mxu3 }
 0x1f3   : > { %v8917_v44 = vpop.f32.mrf.mxu1 }
 0x1f7   : > { %v8938_v59 = vpop.f32.mrf.mxu3 }
 0x1fb   : > { %v8924_v37 = vpop.f32.mrf.mxu1 }
 0x1fc   : > { %6656 = vmatmul.msk.bf16.gmra.mxu3 %vm1291_vm4, %v8655_v54 }
 0x1fe   : > { %6587 = vmatmul.msk.bf16.gmra.mxu1 %vm1291_vm4, %v8645_v35 }
 0x1ff   : > { %6517 = vmatmul.msk.bf16.gmra.mxu2 %vm1291_vm4, %v8615_v61  ;;  %v7899_v61 = vld [vmem:[%s11145_s4 + $0xf8] sm:$0xff] }
 0x200   : > { %2236 = vmatpush.bf16.msra.mxu1 %v7899_v61  ;;  %v7896_v61 = vld [vmem:[%s11145_s4 + $0xe0] sm:$0xff] }
 0x202   : > { %v8934_v62 = vpop.f32.mrf.mxu2 }
 0x203   : > { %v8936_v29 = vpop.f32.mrf.mxu1 }
 0x20a   : > { %v8940_v27 = vpop.f32.mrf.mxu2 }
 0x20b   : > { %11190 = vst [vmem:[#allocation18_spill] sm:$0xff] %v8940_v27  ;;  %v1723_v13 = vpop.f32.mrf.mxu1  ;;  %v7898_v27 = vld [vmem:[%s11145_s4 + $0xf0] sm:$0xff] }
 0x20c   : > { %6657 = vmatmul.msk.bf16.gmra.mxu3 %vm1291_vm4, %v8711_v53  ;;  %v8955_v53 = vpop.f32.mrf.mxu3  ;;  %2237 = vmatpush.bf16.msra.mxu1 %v7898_v27 }
 0x20e   : > { %6588 = vmatmul.msk.bf16.gmra.mxu1 %vm1291_vm4, %v8688_v30 }
 0x20f   : > { %6518 = vmatmul.msk.bf16.gmra.mxu2 %vm1291_vm4, %v8645_v35 }
 0x210   : > { %2238 = vmatpush.bf16.msra.mxu1 %v7897_v58  ;;  %v7903_v58 = vld [vmem:[%s11145_s4 + $0x118] sm:$0xff] }
 0x211   : > { %2363 = vmatpush.bf16.msrb.mxu2 %v7903_v58 }
 0x212   : > { %v1444_v46 = vpop.f32.mrf.mxu2 }
 0x213   : > { %v1445_v54 = vadd.f32 %v1444_v46, %v8708_v26  ;;  %v1725_v9 = vpop.f32.mrf.mxu1 }
 0x214   : > { %2239 = vmatpush.bf16.msra.mxu1 %v7896_v61 }
 0x215   : > { %v1651_v34 = vadd.f32 %v8788_v4, %v1445_v54  ;;  %v8970_v4 = vpop.f32.mrf.mxu3 }
 0x217   : > { %v8961_v23 = vadd.f32 %v1723_v13, %v1651_v34 }
 0x21a   : > { %v1446_v35 = vpop.f32.mrf.mxu2 }
 0x21b   : > { %v1447_v26 = vadd.f32 %v1446_v35, %v8738_v21  ;;  %v1728_v46 = vpop.f32.mrf.mxu1  ;;  %v8984_v35 = vrot.slane %v8797_v47, 1 }
 0x21c   : > { %6658 = vmatmul.msk.bf16.gmra.mxu3 %vm1291_vm4, %v8772_v7 }
 0x21d   : > { %v1652_v54 = vadd.f32 %v8799_v51, %v1447_v26  ;;  %v8988_v26 = vpop.f32.mrf.mxu3 }
 0x21e   : > { %6589 = vmatmul.msk.bf16.gmra.mxu1 %vm1291_vm4, %v8750_v36 }
 0x21f   : > { %6519 = vmatmul.msk.bf16.gmra.mxu2 %vm1291_vm4, %v8688_v30  ;;  %v8979_v34 = vadd.f32 %v1725_v9, %v1652_v54  ;;  %v8994_v9 = vsel %vm860_vm3, %v8761_v43, %v8984_v35 }
 0x222   : > { %v1449_v21 = vpop.f32.mrf.mxu2 }
 0x223   : > { %v1450_v27 = vadd.f32 %v1449_v21, %v8768_v1  ;;  %v1730_v13 = vpop.f32.mrf.mxu1 }
 0x225   : > { %v1653_v51 = vadd.f32 %v8811_v0, %v1450_v27 }
 0x227   : > { %v8986_v61 = vadd.f32 %v1728_v46, %v1653_v51 }
 0x22a   : > { %v1451_v30 = vpop.f32.mrf.mxu2 }
 0x22b   : > { %v1452_v7 = vadd.f32 %v1451_v30, %v8795_v31  ;;  %v1733_v50 = vpop.f32.mrf.mxu1  ;;  %v9005_v31 = vpop.f32.mrf.mxu3 }
 0x22c   : > { %6659 = vmatmul.msk.bf16.gmra.mxu3 %vm1291_vm4, %v8994_v9 }
 0x22d   : > { %v1654_v1 = vadd.f32 %v8822_v6, %v1452_v7 }
 0x22e   : > { %6590 = vmatmul.msk.bf16.gmra.mxu1 %vm1291_vm4, %v8797_v47 }
 0x22f   : > { %6520 = vmatmul.msk.bf16.gmra.mxu2 %vm1291_vm4, %v8750_v36  ;;  %v9003_v0 = vadd.f32 %v1730_v13, %v1654_v1 }
 0x232   : > { %v1454_v46 = vpop.f32.mrf.mxu2 }
 0x233   : > { %v1455_v54 = vadd.f32 %v1454_v46, %v8803_v42  ;;  %v1735_v43 = vpop.f32.mrf.mxu1  ;;  %v9012_v51 = vpop.f32.mrf.mxu3 }
 0x235   : > { %v1655_v58 = vadd.f32 %v8832_v5, %v1455_v54 }
 0x237   : > { %v9009_v21 = vadd.f32 %v1733_v50, %v1655_v58 }
 0x23a   : > { %v1456_v27 = vpop.f32.mrf.mxu2 }
 0x23b   : > { %v1457_v7 = vadd.f32 %v1456_v27, %v8813_v48  ;;  %v1738_v6 = vpop.f32.mrf.mxu1 }
 0x23c   : > { %6660 = vmatmul.msk.bf16.gmra.mxu3 %vm1291_vm4, %v8984_v35 }
 0x23d   : > { %v1656_v36 = vadd.f32 %v8847_v22, %v1457_v7 }
 0x23e   : > { %6720 = vmatmul.msk.bf16.vlgmr.msra.gmra.mxu1 %vm1291_vm4, %v8538_v55 }
 0x23f   : > { %6615 = vmatmul.msk.bf16.vlgmr.msra.gmra.mxu2 %vm1291_vm4, %v8503_v19  ;;  %v9021_v42 = vadd.f32 %v1735_v43, %v1656_v36  ;;  %v7902_v19 = vld [vmem:[%s11145_s4 + $0x110] sm:$0xff] }
 0x240   : > { %2364 = vmatpush.bf16.msrb.mxu2 %v7902_v19 }
 0x242   : > { %v1459_v50 = vpop.f32.mrf.mxu2 }
 0x243   : > { %v1460_v5 = vadd.f32 %v1459_v50, %v8817_v57  ;;  %v1740_v48 = vpop.f32.mrf.mxu1 }
 0x245   : > { %v1657_v13 = vadd.f32 %v8856_v3, %v1460_v5 }
 0x247   : > { %v9025_v30 = vadd.f32 %v1738_v6, %v1657_v13 }
 0x24a   : > { %v1461_v1 = vpop.f32.mrf.mxu2 }
 0x24b   : > { %v1462_v46 = vadd.f32 %v1461_v1, %v8830_v8  ;;  %v1743_v22 = vpop.f32.mrf.mxu1 }
 0x24d   : > { %v1658_v54 = vadd.f32 %v8872_v17, %v1462_v46 }
 0x24e   : > { %6721 = vmatmul.msk.bf16.gmra.mxu1 %vm1291_vm4, %v8562_v28 }
 0x24f   : > { %6616 = vmatmul.msk.bf16.gmra.mxu2 %vm1291_vm4, %v8538_v55  ;;  %v9036_v57 = vadd.f32 %v1740_v48, %v1658_v54 }
 0x252   : > { %v1464_v3 = vpop.f32.mrf.mxu2 }
 0x253   : > { %v1465_v43 = vadd.f32 %v1464_v3, %v8837_v12  ;;  %v1745_v8 = vpop.f32.mrf.mxu1 }
 0x255   : > { %v1659_v58 = vadd.f32 %v8885_v40, %v1465_v43 }
 0x257   : > { %v9040_v17 = vadd.f32 %v1743_v22, %v1659_v58 }
 0x25a   : > { %v1466_v27 = vpop.f32.mrf.mxu2 }
 0x25b   : > { %v1467_v7 = vadd.f32 %v1466_v27, %v8854_v38  ;;  %v1748_v6 = vpop.f32.mrf.mxu1  ;;  %v1646_v27 = vpop.f32.mrf.mxu3 }
 0x25d   : > { %v1660_v36 = vadd.f32 %v8893_v18, %v1467_v7 }
 0x25e   : > { %6722 = vmatmul.msk.bf16.gmra.mxu1 %vm1291_vm4, %v8585_v63 }
 0x25f   : > { %6617 = vmatmul.msk.bf16.gmra.mxu2 %vm1291_vm4, %v8562_v28  ;;  %v9048_v55 = vadd.f32 %v1745_v8, %v1660_v36 }
 0x262   : > { %v1469_v12 = vpop.f32.mrf.mxu2 }
 0x263   : > { %v1470_v50 = vadd.f32 %v1469_v12, %v8860_v2  ;;  %v1750_v40 = vpop.f32.mrf.mxu1 }
 0x265   : > { %v1661_v5 = vadd.f32 %v8903_v24, %v1470_v50 }
 0x267   : > { %v9052_v48 = vadd.f32 %v1748_v6, %v1661_v5 }
 0x26a   : > { %v1471_v38 = vpop.f32.mrf.mxu2 }
 0x26b   : > { %v1472_v13 = vadd.f32 %v1471_v38, %v8870_v41  ;;  %v1753_v18 = vpop.f32.mrf.mxu1  ;;  %v7901_v41 = vld [vmem:[%s11145_s4 + $0x108] sm:$0xff] }
 0x26c   : > { %2365 = vmatpush.bf16.msrb.mxu2 %v7901_v41 }
 0x26d   : > { %v1662_v1 = vadd.f32 %v8909_v16, %v1472_v13 }
 0x26e   : > { %6723 = vmatmul.msk.bf16.gmra.mxu1 %vm1291_vm4, %v8608_v39 }
 0x26f   : > { %6618 = vmatmul.msk.bf16.gmra.mxu2 %vm1291_vm4, %v8585_v63  ;;  %v9060_v28 = vadd.f32 %v1750_v40, %v1662_v1 }
 0x272   : > { %v1474_v2 = vpop.f32.mrf.mxu2 }
 0x273   : > { %v1475_v46 = vadd.f32 %v1474_v2, %v8881_v56  ;;  %v1755_v24 = vpop.f32.mrf.mxu1 }
 0x275   : > { %v1663_v22 = vadd.f32 %v8922_v52, %v1475_v46 }
 0x277   : > { %v9067_v54 = vadd.f32 %v1753_v18, %v1663_v22 }
 0x27a   : > { %v1476_v16 = vpop.f32.mrf.mxu2 }
 0x27b   : > { %v1477_v19 = vadd.f32 %v1476_v16, %v8891_v32  ;;  %v1758_v3 = vpop.f32.mrf.mxu1 }
 0x27d   : > { %v1664_v63 = vadd.f32 %v8932_v20, %v1477_v19 }
 0x27e   : > { %6724 = vmatmul.msk.bf16.gmra.mxu1 %vm1291_vm4, %v8634_v15 }
 0x27f   : > { %6619 = vmatmul.msk.bf16.gmra.mxu2 %vm1291_vm4, %v8608_v39  ;;  %v9075_v56 = vadd.f32 %v1755_v24, %v1664_v63 }
 0x282   : > { %v1479_v52 = vpop.f32.mrf.mxu2 }
 0x283   : > { %v1480_v43 = vadd.f32 %v1479_v52, %v8895_v33  ;;  %v1760_v8 = vpop.f32.mrf.mxu1  ;;  %v9089_v33 = vpop.f32.mrf.mxu3 }
 0x285   : > { %v1665_v58 = vadd.f32 %v8938_v59, %v1480_v43 }
 0x287   : > { %v9079_v7 = vadd.f32 %v1758_v3, %v1665_v58  ;;  %v1809_v3 = vshll.u32 %v8797_v47, 16 }
 0x289   : > { %v1811_v52 = vrot.slane %v1809_v3, 1 }
 0x28a   : > { %v1481_v32 = vpop.f32.mrf.mxu2 }
 0x28b   : > { %v1482_v20 = vadd.f32 %v1481_v32, %v8905_v14  ;;  %v1763_v36 = vpop.f32.mrf.mxu1  ;;  %v1813_v32 = vshrl.u32 %v8797_v47, 16 }
 0x28d   : > { %v1666_v6 = vadd.f32 %v8955_v53, %v1482_v20  ;;  %v9095_v53 = vpop.f32.mrf.mxu3 }
 0x28e   : > { %6725 = vmatmul.msk.bf16.gmra.mxu1 %vm1291_vm4, %v8662_v60 }
 0x28f   : > { %6620 = vmatmul.msk.bf16.gmra.mxu2 %vm1291_vm4, %v8634_v15  ;;  %v9087_v39 = vadd.f32 %v1760_v8, %v1666_v6  ;;  %v1812_v8 = vsel %vm1179_vm5, %v8786_v45, %v1811_v52  ;;  %v1815_v45 = vor.u32 %v1813_v32, %v1811_v52 }
 0x292   : > { %v1484_v59 = vpop.f32.mrf.mxu2 }
 0x293   : > { %v1485_v12 = vadd.f32 %v1484_v59, %v8907_v10  ;;  %v1765_v14 = vpop.f32.mrf.mxu1 }
 0x295   : > { %v1667_v50 = vadd.f32 %v8970_v4, %v1485_v12  ;;  %v9106_v1 = vpop.f32.mrf.mxu3 }
 0x297   : > { %v9093_v40 = vadd.f32 %v1763_v36, %v1667_v50 }
 0x29a   : > { %v1486_v5 = vpop.f32.mrf.mxu2 }
 0x29b   : > { %v1487_v38 = vadd.f32 %v1486_v5, %v8917_v44  ;;  %v1768_v10 = vpop.f32.mrf.mxu1  ;;  %v7900_v44 = vld [vmem:[%s11145_s4 + $0x100] sm:$0xff] }
 0x29c   : > { %2366 = vmatpush.bf16.msrb.mxu2 %v7900_v44 }
 0x29d   : > { %v1668_v13 = vadd.f32 %v8988_v26, %v1487_v38  ;;  %v9116_v41 = vpop.f32.mrf.mxu3 }
 0x29e   : > { %6726 = vmatmul.msk.bf16.gmra.mxu1 %vm1291_vm4, %v8724_v49 }
 0x29f   : > { %6621 = vmatmul.msk.bf16.gmra.mxu2 %vm1291_vm4, %v8662_v60  ;;  %v9103_v15 = vadd.f32 %v1765_v14, %v1668_v13  ;;  %v2199_v14 = vshrl.u32 %v8877_v25, 16 }
 0x2a2   : > { %v1489_v4 = vpop.f32.mrf.mxu2 }
 0x2a3   : > { %v1490_v18 = vadd.f32 %v1489_v4, %v8924_v37  ;;  %v1770_v24 = vpop.f32.mrf.mxu1 }
 0x2a5   : > { %v1669_v2 = vadd.f32 %v9005_v31, %v1490_v18 }
 0x2a7   : > { %v9112_v26 = vadd.f32 %v1768_v10, %v1669_v2  ;;  %v11191_v2 = vld [vmem:[#allocation10_spill] sm:$0xff] }
 0x2aa   : > { %v1491_v46 = vpop.f32.mrf.mxu2 }
 0x2ab   : > { %v1492_v60 = vadd.f32 %v1491_v46, %v8936_v29  ;;  %v1773_v29 = vpop.f32.mrf.mxu1 }
 0x2ad   : > { %v1670_v22 = vadd.f32 %v9012_v51, %v1492_v60  ;;  %v9128_v51 = vpop.f32.mrf.mxu3 }
 0x2ae   : > { %6727 = vmatmul.msk.bf16.gmra.mxu1 %vm1291_vm4, %v8784_v11 }
 0x2af   : > { %6622 = vmatmul.msk.bf16.gmra.mxu2 %vm1291_vm4, %v8724_v49  ;;  %v9122_v37 = vadd.f32 %v1770_v24, %v1670_v22  ;;  %v11192_v22 = vld [vmem:[#allocation11_spill] sm:$0xff] }
 0x2b2   : > { %v1494_v31 = vpop.f32.mrf.mxu2 }
 0x2b3   : > { %v1495_v16 = vadd.f32 %v1494_v31, %v8934_v62  ;;  %v7918_v31 = vld [vmem:[%s11148_s7 + $0x70] sm:$0xff] }
 0x2b5   : > { %v1671_v19 = vadd.f32 %v1646_v27, %v1495_v16  ;;  %v9137_v49 = vpop.f32.mrf.mxu3  ;;  %v2195_v27 = vshll.u32 %v8877_v25, 16 }
 0x2b7   : > { %v9126_v63 = vadd.f32 %v1773_v29, %v1671_v19  ;;  %v2197_v20 = vrot.slane %v2195_v27, 1  ;;  %v11193_v29 = vld [vmem:[#allocation12_spill] sm:$0xff] }
 0x2b9   : > { %v2201_v5 = vor.u32 %v2199_v14, %v2197_v20 }
 0x2ba   : > { %v9130_v43 = vpop.f32.mrf.mxu2 }
 0x2bd   : > { %v9147_v59 = vpop.f32.mrf.mxu3 }
 0x2be   : > { %6728 = vmatmul.msk.bf16.gmra.mxu1 %vm1291_vm4, %v1812_v8 }
 0x2bf   : > { %6623 = vmatmul.msk.bf16.gmra.mxu2 %vm1291_vm4, %v8784_v11  ;;  %v2198_v11 = vsel %vm1179_vm5, %v1815_v45, %v2197_v20  ;;  %v11194_v20 = vld [vmem:[#allocation13_spill] sm:$0xff] }
 0x2c2   : > { %v1855_v62 = vpop.f32.mrf.mxu2 }
 0x2c3   : > { %v9140_v58 = vadd.f32 %v1855_v62, %v8961_v23 }
 0x2c5   : > { %v9155_v50 = vpop.f32.mrf.mxu3 }
 0x2ca   : > { %v1857_v6 = vpop.f32.mrf.mxu2 }
 0x2cb   : > { %v9145_v36 = vadd.f32 %v1857_v6, %v8979_v34 }
 0x2cd   : > { %v9163_v38 = vpop.f32.mrf.mxu3 }
 0x2ce   : > { %6729 = vmatmul.msk.bf16.gmra.mxu1 %vm1291_vm4, %v2198_v11 }
 0x2cf   : > { %6624 = vmatmul.msk.bf16.gmra.mxu2 %vm1291_vm4, %v1812_v8 }
 0x2d2   : > { %v1860_v23 = vpop.f32.mrf.mxu2 }
 0x2d3   : > { %v9153_v12 = vadd.f32 %v1860_v23, %v8986_v61 }
 0x2d5   : > { %v9168_v61 = vpop.f32.mrf.mxu3 }
 0x2da   : > { %v1862_v47 = vpop.f32.mrf.mxu2 }
 0x2db   : > { %v9159_v34 = vadd.f32 %v1862_v47, %v9003_v0  ;;  %v7919_v0 = vld [vmem:[%s11148_s7 + $0x78] sm:$0xff]  ;;  %v11195_v47 = vld [vmem:[#allocation14_spill] sm:$0xff] }
 0x2dc   : > { %2875 = vmatpush.bf16.msra.mxu3 %v7919_v0  ;;  %v1775_v0 = vpop.f32.mrf.mxu1 }
 0x2de   : > { %6730 = vmatmul.msk.bf16.gmra.mxu1 %vm1291_vm4, %v2201_v5 }
 0x2df   : > { %6625 = vmatmul.msk.bf16.gmra.mxu2 %vm1291_vm4, %v1815_v45 }
 0x2e0   : > { %2876 = vmatpush.bf16.msra.mxu3 %v7918_v31 }
 0x2e2   : > { %v1865_v13 = vpop.f32.mrf.mxu2 }
 0x2e3   : > { %v9166_v10 = vadd.f32 %v1865_v13, %v9009_v21  ;;  %v9181_v21 = vpop.f32.mrf.mxu3 }
 0x2ea   : > { %v1867_v4 = vpop.f32.mrf.mxu2 }
 0x2eb   : > { %v9171_v18 = vadd.f32 %v1867_v4, %v9021_v42  ;;  %v9186_v42 = vpop.f32.mrf.mxu3 }
 0x2ef   : > { %6755 = vmatmul.msk.bf16.vlgmr.msrb.gmra.mxu2 %vm1291_vm4, %v11191_v2  ;;  %v11196_v2 = vld [vmem:[#allocation15_spill] sm:$0xff] }
 0x2f2   : > { %v1870_v44 = vpop.f32.mrf.mxu2 }
 0x2f3   : > { %v9179_v46 = vadd.f32 %v1870_v44, %v9025_v30  ;;  %v9196_v19 = vpop.f32.mrf.mxu3  ;;  %v2109_v44 = vpop.f32.mrf.mxu0 }
 0x2fa   : > { %v1872_v60 = vpop.f32.mrf.mxu2 }
 0x2fb   : > { %v9184_v24 = vadd.f32 %v1872_v60, %v9036_v57  ;;  %v9207_v52 = vpop.f32.mrf.mxu3 }
 0x2ff   : > { %6756 = vmatmul.msk.bf16.gmra.mxu2 %vm1291_vm4, %v11192_v22 }
 0x302   : > { %v1875_v16 = vpop.f32.mrf.mxu2 }
 0x303   : > { %v9194_v30 = vadd.f32 %v1875_v16, %v9040_v17  ;;  %v7917_v17 = vld [vmem:[%s11148_s7 + $0x68] sm:$0xff]  ;;  %v9218_v32 = vpop.f32.mrf.mxu3  ;;  %v2241_v16 = vpop.f32.mrf.mxu1 }
 0x304   : > { %2877 = vmatpush.bf16.msra.mxu3 %v7917_v17  ;;  %v11197_v17 = vld [vmem:[#allocation16_spill] sm:$0xff] }
 0x30a   : > { %v1877_v3 = vpop.f32.mrf.mxu2 }
 0x30b   : > { %v9199_v57 = vadd.f32 %v1877_v3, %v9048_v55 }
 0x30f   : > { %6757 = vmatmul.msk.bf16.gmra.mxu2 %vm1291_vm4, %v11193_v29  ;;  %v2111_v29 = vpop.f32.mrf.mxu0 }
 0x312   : > { %v1880_v8 = vpop.f32.mrf.mxu2 }
 0x313   : > { %v9210_v62 = vadd.f32 %v1880_v8, %v9052_v48  ;;  %v9225_v48 = vpop.f32.mrf.mxu3 }
 0x31a   : > { %v1882_v55 = vpop.f32.mrf.mxu2 }
 0x31b   : > { %v9216_v27 = vadd.f32 %v1882_v55, %v9060_v28  ;;  %v7916_v28 = vld [vmem:[%s11148_s7 + $0x60] sm:$0xff]  ;;  %v9235_v14 = vpop.f32.mrf.mxu3 }
 0x31c   : > { %2878 = vmatpush.bf16.msra.mxu3 %v7916_v28 }
 0x31f   : > { %6758 = vmatmul.msk.bf16.gmra.mxu2 %vm1291_vm4, %v11194_v20 }
 0x322   : > { %v1885_v6 = vpop.f32.mrf.mxu2 }
 0x323   : > { %v9223_v45 = vadd.f32 %v1885_v6, %v9067_v54  ;;  %v9240_v13 = vpop.f32.mrf.mxu3  ;;  %v2114_v6 = vpop.f32.mrf.mxu0 }
 0x32a   : > { %v1887_v11 = vpop.f32.mrf.mxu2 }
 0x32b   : > { %v9228_v23 = vadd.f32 %v1887_v11, %v9075_v56  ;;  %v9250_v31 = vpop.f32.mrf.mxu3  ;;  %v7914_v11 = vld [vmem:[%s11148_s7 + $0x50] sm:$0xff] }
 0x32f   : > { %6759 = vmatmul.msk.bf16.gmra.mxu2 %vm1291_vm4, %v11195_v47 }
 0x332   : > { %v1890_v5 = vpop.f32.mrf.mxu2 }
 0x333   : > { %v9238_v54 = vadd.f32 %v1890_v5, %v9079_v7  ;;  %v7915_v7 = vld [vmem:[%s11148_s7 + $0x58] sm:$0xff]  ;;  %v9258_v8 = vpop.f32.mrf.mxu3 }
 0x334   : > { %2879 = vmatpush.bf16.msra.mxu3 %v7915_v7 }
 0x338   : > { %2880 = vmatpush.bf16.msra.mxu3 %v7914_v11 }
 0x33a   : > { %v1892_v4 = vpop.f32.mrf.mxu2 }
 0x33b   : > { %v9243_v56 = vadd.f32 %v1892_v4, %v9087_v39  ;;  %v9268_v28 = vpop.f32.mrf.mxu3  ;;  %v11199_v4 = vld [vmem:[#allocation17_spill] sm:$0xff] }
 0x33c   : > { %11198 = vst [vmem:[#allocation10_spill] sm:$0xff] %v9268_v28 }
 0x33f   : > { %6760 = vmatmul.msk.bf16.gmra.mxu2 %vm1291_vm4, %v11196_v2  ;;  %v9277_v2 = vpop.f32.mrf.mxu0 }
 0x342   : > { %v1895_v60 = vpop.f32.mrf.mxu2 }
 0x343   : > { %v9248_v22 = vadd.f32 %v1895_v60, %v9093_v40  ;;  %v2243_v40 = vpop.f32.mrf.mxu1  ;;  %v9281_v7 = vpop.f32.mrf.mxu3 }
 0x34a   : > { %v1897_v3 = vpop.f32.mrf.mxu2 }
 0x34b   : > { %v9256_v39 = vadd.f32 %v1897_v3, %v9103_v15  ;;  %v9270_v15 = vpop.f32.mrf.mxu1 }
 0x34f   : > { %6761 = vmatmul.msk.bf16.gmra.mxu2 %vm1291_vm4, %v11197_v17 }
 0x352   : > { %v1900_v55 = vpop.f32.mrf.mxu2 }
 0x353   : > { %v9263_v20 = vadd.f32 %v1900_v55, %v9112_v26  ;;  %v11200_v26 = vld [vmem:[#allocation18_spill] sm:$0xff]  ;;  %v9286_v55 = vpop.f32.mrf.mxu1 }
 0x354   : > { %v1497_v60 = vadd.f32 %v9130_v43, %v11200_v26  ;;  %v7910_v43 = vld [vmem:[%s11148_s7 + $0x30] sm:$0xff] }
 0x356   : > { %v1672_v11 = vadd.f32 %v9089_v33, %v1497_v60 }
 0x35a   : > { %v1902_v47 = vpop.f32.mrf.mxu2 }
 0x35b   : > { %v9273_v5 = vadd.f32 %v1902_v47, %v9122_v37  ;;  %v7911_v37 = vld [vmem:[%s11148_s7 + $0x38] sm:$0xff]  ;;  %v1799_v47 = vadd.f32 %v1775_v0, %v1672_v11  ;;  %v9301_v60 = vpop.f32.mrf.mxu1  ;;  %v7909_v0 = vld [vmem:[%s11148_s7 + $0x28] sm:$0xff] }
 0x35c   : > { %2980 = vmatpush.bf16.msra.mxu0 %v7911_v37  ;;  %v7943_v11 = vld [vmem:[%s11148_s7 + $0x138] sm:$0xff] }
 0x35d   : > { %3390 = vmatpush.bf16.msra.mxu2 %v7943_v11  ;;  %v7906_v11 = vld [vmem:[%s11148_s7 + $0x10] sm:$0xff] }
 0x35f   : > { %6762 = vmatmul.msk.bf16.gmra.mxu2 %vm1291_vm4, %v11199_v4  ;;  %v9292_v4 = vpop.f32.mrf.mxu0 }
 0x360   : > { %2981 = vmatpush.bf16.msra.mxu0 %v7910_v43 }
 0x362   : > { %v1905_v3 = vpop.f32.mrf.mxu2 }
 0x363   : > { %v9284_v17 = vadd.f32 %v1905_v3, %v9126_v63  ;;  %v2034_v63 = vpop.f32.mrf.mxu3  ;;  %v2037_v3 = vadd.f32 %v9095_v53, %v9140_v58  ;;  %v2038_v53 = vadd.f32 %v9106_v1, %v9145_v36  ;;  %v7907_v1 = vld [vmem:[%s11148_s7 + $0x18] sm:$0xff] }
 0x364   : > { %2982 = vmatpush.bf16.msra.mxu0 %v7909_v0 }
 0x365   : > { %v2164_v58 = vadd.f32 %v2109_v44, %v2037_v3  ;;  %v9330_v44 = vld [vmem:[%s11146_s5] ss:$0 sm:$0xff]  ;;  %v9332_v3 = vpop.f32.mrf.mxu1 }
 0x367   : > { %v2296_v43 = vadd.f32 %v2241_v16, %v2164_v58  ;;  %v2039_v16 = vadd.f32 %v9116_v41, %v9153_v12 }
 0x369   : > { %v2166_v41 = vadd.f32 %v2114_v6, %v2039_v16  ;;  %v2040_v6 = vadd.f32 %v9128_v51, %v9159_v34 }
 0x36a   : > { %v1907_v28 = vpop.f32.mrf.mxu2 }
 0x36b   : > { %v1931_v26 = vadd.f32 %v1907_v28, %v1799_v47  ;;  %v7913_v28 = vld [vmem:[%s11148_s7 + $0x48] sm:$0xff]  ;;  %v9319_v47 = vpop.f32.mrf.mxu0  ;;  %v2167_v34 = vadd.f32 %v9277_v2, %v2040_v6  ;;  %v2041_v2 = vadd.f32 %v9137_v49, %v9166_v10 }
 0x36c   : > { %2881 = vmatpush.bf16.msra.mxu3 %v7913_v28  ;;  %v2327_v28 = vrot.slane %v8877_v25, 1  ;;  %v7929_v10 = vld [vmem:[%s11148_s7 + $0xc8] sm:$0xff] }
 0x36d   : > { %v9299_v33 = vadd.f32 %v2034_v63, %v1931_v26  ;;  %v2165_v26 = vadd.f32 %v2111_v29, %v2038_v53  ;;  %v7935_v63 = vld [vmem:[%s11148_s7 + $0xf8] sm:$0xff]  ;;  %v7934_v53 = vld [vmem:[%s11148_s7 + $0xf0] sm:$0xff]  ;;  %v2168_v49 = vadd.f32 %v9292_v4, %v2041_v2 }
 0x36e   : > { %3249 = vmatpush.bf16.msrb.mxu1 %v7935_v63  ;;  %v2328_v25 = vsel %vm860_vm3, %v8984_v35, %v2327_v28 }
 0x36f   : > { %6763 = vmatmul.msk.bf16.gmra.mxu2 %vm1291_vm4, %v8994_v9  ;;  %v7908_v9 = vld [vmem:[%s11148_s7 + $0x20] sm:$0xff]  ;;  %v2297_v29 = vadd.f32 %v2243_v40, %v2165_v26  ;;  %v7905_v40 = vld [vmem:[%s11148_s7 + $0x8] sm:$0xff] }
 0x370   : > { %2983 = vmatpush.bf16.msra.mxu0 %v7908_v9 }
 0x372   : > { %v2368_v37 = vpop.f32.mrf.mxu2  ;;  %3250 = vmatpush.bf16.msrb.mxu1 %v7934_v53 }
 0x373   : > { %v2423_v36 = vadd.f32 %v2368_v37, %v2296_v43  ;;  %v9345_v12 = vpop.f32.mrf.mxu0  ;;  %v7933_v43 = vld [vmem:[%s11148_s7 + $0xe8] sm:$0xff] }
 0x374   : > { %2984 = vmatpush.bf16.msra.mxu0 %v7907_v1  ;;  %v2298_v1 = vadd.f32 %v9270_v15, %v2166_v41  ;;  %v7931_v15 = vld [vmem:[%s11148_s7 + $0xd8] sm:$0xff] }
 0x375   : > { %v2449_v58 = vadd.f32 %v9330_v44, %v2423_v36  ;;  %v9360_v36 = vpop.f32.mrf.mxu1 }
 0x376   : > { %3251 = vmatpush.bf16.msrb.mxu1 %v7933_v43  ;;  %v2299_v43 = vadd.f32 %v9286_v55, %v2167_v34 }
 0x377   : > { %v2491_v26 = vrot.slane %v2449_v58, 1 }
 0x378   : > { %2985 = vmatpush.bf16.msra.mxu0 %v7906_v11  ;;  %v7932_v11 = vld [vmem:[%s11148_s7 + $0xe0] sm:$0xff] }
 0x37a   : > { %v2370_v0 = vpop.f32.mrf.mxu2  ;;  %3252 = vmatpush.bf16.msrb.mxu1 %v7932_v11  ;;  %v2300_v11 = vadd.f32 %v9301_v60, %v2168_v49 }
 0x37b   : > { %v2424_v37 = vadd.f32 %v2370_v0, %v2297_v29  ;;  %v7904_v0 = vld [vmem:[%s11148_s7] sm:$0xff]  ;;  %v9373_v41 = vpop.f32.mrf.mxu0 }
 0x37c   : > { %2986 = vmatpush.bf16.msra.mxu0 %v7905_v40  ;;  %v7942_v40 = vld [vmem:[%s11148_s7 + $0x130] sm:$0xff] }
 0x37d   : > { %v2450_v9 = vadd.f32 %v9330_v44, %v2424_v37  ;;  %3391 = vmatpush.bf16.msra.mxu2 %v7942_v40  ;;  %v7928_v40 = vld [vmem:[%s11148_s7 + $0xc0] sm:$0xff] }
 0x37e   : > { %3253 = vmatpush.bf16.msrb.mxu1 %v7931_v15 }
 0x37f   : > { %v2492_v63 = vrot.slane %v2450_v9, 1  ;;  %6764 = vmatmul.msk.bf16.gmra.mxu2 %vm1291_vm4, %v2328_v25  ;;  %v7912_v25 = vld [vmem:[%s11148_s7 + $0x40] sm:$0xff] }
 0x380   : > { %2987 = vmatpush.bf16.msra.mxu0 %v7904_v0  ;;  %2882 = vmatpush.bf16.msra.mxu3 %v7912_v25 }
 0x381   : > { %v2493_v35 = vsel %vm860_vm3, %v2491_v26, %v2492_v63 }
 0x382   : > { %v2373_v16 = vpop.f32.mrf.mxu2  ;;  %v2550_v29 = vmax.f32 %v2449_v58, %v2493_v35  ;;  %v7930_v35 = vld [vmem:[%s11148_s7 + $0xd0] sm:$0xff] }
 0x383   : > { %v2425_v53 = vadd.f32 %v2373_v16, %v2298_v1  ;;  %3254 = vmatpush.bf16.msrb.mxu1 %v7930_v35  ;;  %v9400_v34 = vpop.f32.mrf.mxu0 }
 0x385   : > { %v2451_v51 = vadd.f32 %v9330_v44, %v2425_v53 }
 0x387   : > { %v2494_v58 = vrot.slane %v2451_v51, 1  ;;  %v2570_v37 = vmax.f32 %v2550_v29, %v2451_v51  ;;  %v9388_v29 = vpop.f32.mrf.mxu1  ;;  %3255 = vmatpush.bf16.msrb.mxu1 %v7929_v10 }
 0x389   : > { %v2495_v26 = vsel %vm860_vm3, %v2492_v63, %v2494_v58  ;;  %v2042_v63 = vadd.f32 %v9147_v59, %v9171_v18 }
 0x38a   : > { %v2375_v6 = vpop.f32.mrf.mxu2  ;;  %v2551_v1 = vmax.f32 %v2450_v9, %v2495_v26  ;;  %v7940_v26 = vld [vmem:[%s11148_s7 + $0x120] sm:$0xff] }
 0x38b   : > { %v2426_v16 = vadd.f32 %v2375_v6, %v2299_v43  ;;  %3256 = vmatpush.bf16.msrb.mxu1 %v7928_v40  ;;  %v2169_v18 = vadd.f32 %v9319_v47, %v2042_v63  ;;  %v2043_v6 = vadd.f32 %v9155_v50, %v9179_v46 }
 0x38d   : > { %v2452_v0 = vadd.f32 %v9330_v44, %v2426_v16  ;;  %v2301_v47 = vadd.f32 %v9332_v3, %v2169_v18  ;;  %v2170_v46 = vadd.f32 %v9345_v12, %v2043_v6 }
 0x38f   : > { %v2496_v55 = vrot.slane %v2452_v0, 1  ;;  %v2571_v9 = vmax.f32 %v2551_v1, %v2452_v0  ;;  %6765 = vmatmul.msk.bf16.gmra.mxu2 %vm1291_vm4, %v2327_v28  ;;  %v7941_v28 = vld [vmem:[%s11148_s7 + $0x128] sm:$0xff]  ;;  %v9410_v60 = vpop.f32.mrf.mxu1 }
 0x390   : > { %3392 = vmatpush.bf16.msra.mxu2 %v7941_v28  ;;  %v2302_v28 = vadd.f32 %v9360_v36, %v2170_v46 }
 0x391   : > { %v2497_v53 = vsel %vm860_vm3, %v2494_v58, %v2496_v55 }
 0x392   : > { %v2378_v4 = vpop.f32.mrf.mxu2  ;;  %v2552_v15 = vmax.f32 %v2451_v51, %v2497_v53  ;;  %v2599_v25 = vmax.f32 %v2570_v37, %v2497_v53  ;;  %v9417_v51 = vld [vmem:[%s557_s19] ss:$0 sm:$0xff]  ;;  %v9430_v53 = vpop.f32.mrf.mxu0  ;;  %s560_s19 = scalar_lea.vmem %s11150_s9, %s8353_s28  ;;  %s6279_s28 = scalar_lea.hbm %s11157_s16, %s8318_s25 }
 0x393   : > { %v2427_v2 = vadd.f32 %v2378_v4, %v2300_v11  ;;  %v7939_v11 = vld [vmem:[%s11148_s7 + $0x118] sm:$0xff]  ;;  %s6283_s18 = sshll.u32 %s6279_s28, 4  ;;  %s6284_s18 = int_to_ptr.hbm [resolvable:$true] %s6283_s18 }
 0x394   : > { %v2619_v58 = vmax.f32 %v2599_v25, 0.0  ;;  %3393 = vmatpush.bf16.msra.mxu2 %v7940_v26  ;;  %s8161_s25 = sshra.s32 %s6284_s18, 4  ;;  %s8162_s25 = int_to_ptr.hbm [resolvable:$true] %s8161_s25 }
 0x395   : > { %v2453_v59 = vadd.f32 %v9330_v44, %v2427_v2  ;;  %v2044_v2 = vadd.f32 %v9163_v38, %v9184_v24  ;;  %s8163_s26 = scalar_lea.hbm %s8162_s25, 1  ;;  %p8168_p0 = scmp.lt.s32.totalorder %s8162_s25, %s11157_s16 }
 0x396   : > { %v2643_v35 = vmul.f32 %v9417_v51, %v2619_v58  ;;  %p8164_p11 = scmp.ne.s32.totalorder %s8162_s25, %s8163_s26  ;;  %p8169_p1 = scmp.lt.s32.totalorder %s8167_s21, %s8163_s26 }
 0x397   : > { %v2498_v37 = vrot.slane %v2453_v59, 1  ;;  %v2572_v43 = vmax.f32 %v2552_v15, %v2453_v59  ;;  %v2171_v36 = vadd.f32 %v9373_v41, %v2044_v2 }
 0x398   : > { %3394 = vmatpush.bf16.msra.mxu2 %v7939_v11  ;;  %v2663_v3 = vpack.c.bf16 %v2643_v35, %v2643_v35  ;;  %p8165_p12 = pnand %p8164_p11, %p8335_p5  ;;  %p8170_p2 = por %p8169_p1, %p8168_p0 }
 0x399   : > { %v2499_v1 = vsel %vm860_vm3, %v2496_v55, %v2498_v37  ;;  %v2303_v11 = vadd.f32 %v9388_v29, %v2171_v36  ;;  %v7926_v36 = vld [vmem:[%s11148_s7 + $0xb0] sm:$0xff] }
 0x39a   : > { %v2380_v16 = vpop.f32.mrf.mxu2  ;;  %v2553_v49 = vmax.f32 %v2452_v0, %v2499_v1  ;;  %v2600_v10 = vmax.f32 %v2571_v9, %v2499_v1  ;;  %v7938_v0 = vld [vmem:[%s11148_s7 + $0x110] sm:$0xff]  ;;  %v9438_v9 = vpop.f32.mrf.mxu1  ;;  %v2732_v6 = vunpack.c.l.b16 %v2663_v3  ;;  %v7927_v1 = vld [vmem:[%s11148_s7 + $0xb8] sm:$0xff]  ;;  %p8166_p13 = pneg %p8165_p12 }
 0x39b   : > { %v2428_v63 = vadd.f32 %v2380_v16, %v2301_v47  ;;  %v7937_v16 = vld [vmem:[%s11148_s7 + $0x108] sm:$0xff]  ;;  %3116 = vmatpush.bf16.msrb.mxu3 %v7927_v1 }
 0x39c   : > { %v2620_v4 = vmax.f32 %v2600_v10, 0.0  ;;  %3395 = vmatpush.bf16.msra.mxu2 %v7938_v0  ;;  %v7936_v10 = vld [vmem:[%s11148_s7 + $0x100] sm:$0xff]  ;;  %p8171_p3 = pnand %p8170_p2, %p8166_p13 }
 0x39d   : > { %v2454_v50 = vadd.f32 %v9330_v44, %v2428_v63  ;;  %v2045_v63 = vadd.f32 %v9168_v61, %v9194_v30 }
 0x39e   : > { %v2644_v55 = vmul.f32 %v9417_v51, %v2620_v4 }
 0x39f   : > { %v2500_v15 = vrot.slane %v2454_v50, 1  ;;  %v2573_v25 = vmax.f32 %v2553_v49, %v2454_v50  ;;  %3117 = vmatpush.bf16.msrb.mxu3 %v7926_v36 }
 0x3a0   : > { %v2664_v40 = vpack.c.bf16 %v2644_v55, %v2644_v55  ;;  %3396 = vmatpush.bf16.msra.mxu2 %v7937_v16 }
 0x3a1   : > { %v2501_v12 = vsel %vm860_vm3, %v2498_v37, %v2500_v15 }
 0x3a2   : > { %v2383_v18 = vpop.f32.mrf.mxu2  ;;  %v2554_v58 = vmax.f32 %v2453_v59, %v2501_v12  ;;  %v2601_v26 = vmax.f32 %v2572_v43, %v2501_v12  ;;  %v2733_v47 = vunpack.c.l.b16 %v2664_v40  ;;  %v9452_v59 = vpop.f32.mrf.mxu0  ;;  %v2172_v12 = vadd.f32 %v9400_v34, %v2045_v63 }
 0x3a3   : > { %v2429_v35 = vadd.f32 %v2383_v18, %v2302_v28  ;;  %v9461_v41 = vpop.f32.mrf.mxu1 }
 0x3a4   : > { %v2748_v38 = vpack.c.b16 %v2733_v47, %v2732_v6  ;;  %v2621_v37 = vmax.f32 %v2601_v26, 0.0  ;;  %3397 = vmatpush.bf16.msra.mxu2 %v7936_v10  ;;  %v2046_v6 = vadd.f32 %v9181_v21, %v9199_v57 }
 0x3a5   : > { %v2455_v24 = vadd.f32 %v9330_v44, %v2429_v35 }
 0x3a6   : > { %2988 = vmatmul.bf16.vlgmr.msra.gmra.mxu0 %v2748_v38  ;;  %v2645_v46 = vmul.f32 %v9417_v51, %v2621_v37  ;;  %v2759_v26 = vshll.u32 %v2748_v38, 16  ;;  %v2173_v57 = vadd.f32 %v9430_v53, %v2046_v6  ;;  %v2047_v53 = vadd.f32 %v9186_v42, %v9210_v62 }
 0x3a7   : > { %v2502_v43 = vrot.slane %v2455_v24, 1  ;;  %v2574_v49 = vmax.f32 %v2554_v58, %v2455_v24 }
 0x3a8   : > { %v2665_v18 = vpack.c.bf16 %v2645_v46, %v2645_v46 }
 0x3a9   : > { %v2503_v4 = vsel %vm860_vm3, %v2500_v15, %v2502_v43 }
 0x3aa   : > { %v2385_v3 = vpop.f32.mrf.mxu2  ;;  %v2555_v55 = vmax.f32 %v2454_v50, %v2503_v4  ;;  %v2602_v0 = vmax.f32 %v2573_v25, %v2503_v4  ;;  %v9467_v15 = vpop.f32.mrf.mxu0  ;;  %v2304_v50 = vadd.f32 %v9410_v60, %v2172_v12  ;;  %v2734_v34 = vunpack.c.l.b16 %v2665_v18 }
 0x3ab   : > { %v2430_v40 = vadd.f32 %v2385_v3, %v2303_v11  ;;  %v9476_v10 = vpop.f32.mrf.mxu1  ;;  %v2761_v11 = vrot.slane %v2759_v26, 1  ;;  %v2757_v60 = vshrl.u32 %v2748_v38, 16  ;;  %v3045_v4 = vrot.slane %v2748_v38, 1 }
 0x3ac   : > { %v2622_v2 = vmax.f32 %v2602_v0, 0.0 }
 0x3ad   : > { %v2456_v28 = vadd.f32 %v9330_v44, %v2430_v40 }
 0x3ae   : > { %v2646_v61 = vmul.f32 %v9417_v51, %v2622_v2  ;;  %v2305_v2 = vadd.f32 %v9438_v9, %v2173_v57 }
 0x3af   : > { %v2504_v30 = vrot.slane %v2456_v28, 1  ;;  %v2575_v29 = vmax.f32 %v2555_v55, %v2456_v28  ;;  %v2762_v55 = vor.u32 %v2761_v11, %v2757_v60 }
 0x3b0   : > { %v2666_v58 = vpack.c.bf16 %v2646_v61, %v2646_v61 }
 0x3b1   : > { %v2505_v25 = vsel %vm860_vm3, %v2502_v43, %v2504_v30 }
 0x3b2   : > { %v2388_v47 = vpop.f32.mrf.mxu2  ;;  %v2556_v1 = vmax.f32 %v2455_v24, %v2505_v25  ;;  %v2603_v35 = vmax.f32 %v2574_v49, %v2505_v25  ;;  %v2735_v16 = vunpack.c.l.b16 %v2666_v58  ;;  %v2139_v18 = vpop.f32.mrf.mxu0 }
 0x3b3   : > { %v2431_v37 = vadd.f32 %v2388_v47, %v2304_v50  ;;  %v2271_v42 = vpop.f32.mrf.mxu1 }
 0x3b4   : > { %v9478_v63 = vpack.c.b16 %v2735_v16, %v2734_v34  ;;  %v2623_v24 = vmax.f32 %v2603_v35, 0.0 }
 0x3b5   : > { %v2457_v21 = vadd.f32 %v9330_v44, %v2431_v37 }
 0x3b6   : > { %2993 = vmatmul.bf16.gmra.mxu0 %v9478_v63  ;;  %3257 = vmatmul.bf16.vlgmr.msrb.gmra.mxu1 %v9478_v63  ;;  %v2764_v43 = vshll.u32 %v9478_v63, 16  ;;  %v3046_v49 = vrot.slane %v9478_v63, 1  ;;  %v2647_v61 = vmul.f32 %v9417_v51, %v2623_v24 }
 0x3b7   : > { %v2506_v46 = vrot.slane %v2457_v21, 1  ;;  %v2576_v3 = vmax.f32 %v2556_v1, %v2457_v21  ;;  %v2174_v1 = vadd.f32 %v9452_v59, %v2047_v53  ;;  %v7925_v59 = vld [vmem:[%s11148_s7 + $0xa8] sm:$0xff] }
 0x3b8   : > { %v2766_v0 = vrot.slane %v2764_v43, 1  ;;  %v9489_v40 = vsel %vm860_vm3, %v3045_v4, %v3046_v49  ;;  %v2667_v62 = vpack.c.bf16 %v2647_v61, %v2647_v61  ;;  %3118 = vmatpush.bf16.msrb.mxu3 %v7925_v59  ;;  %v2049_v61 = vadd.f32 %v9207_v52, %v9223_v45 }
 0x3b9   : > { %v2507_v12 = vsel %vm860_vm3, %v2504_v30, %v2506_v46 }
 0x3ba   : > { %v2390_v38 = vpop.f32.mrf.mxu2  ;;  %v2557_v58 = vmax.f32 %v2456_v28, %v2507_v12  ;;  %v2604_v26 = vmax.f32 %v2575_v29, %v2507_v12  ;;  %v2767_v6 = vsel %vm1179_vm5, %v2762_v55, %v2766_v0  ;;  %v2048_v28 = vadd.f32 %v9196_v19, %v9216_v27  ;;  %v2141_v43 = vpop.f32.mrf.mxu0 }
 0x3bb   : > { %v2432_v50 = vadd.f32 %v2390_v38, %v2305_v2  ;;  %2883 = vmatmul.bf16.vlgmr.msra.gmra.mxu3 %v2767_v6  ;;  %v2306_v29 = vadd.f32 %v9461_v41, %v2174_v1  ;;  %v2736_v36 = vunpack.c.l.b16 %v2667_v62  ;;  %v2273_v53 = vpop.f32.mrf.mxu1 }
 0x3bc   : > { %v2624_v25 = vmax.f32 %v2604_v26, 0.0  ;;  %v2175_v27 = vadd.f32 %v9467_v15, %v2048_v28 }
 0x3bd   : > { %v2458_v47 = vadd.f32 %v9330_v44, %v2432_v50 }
 0x3be   : > { %v2648_v9 = vmul.f32 %v9417_v51, %v2624_v25  ;;  %v2307_v38 = vadd.f32 %v9476_v10, %v2175_v27 }
 0x3bf   : > { %v2508_v30 = vrot.slane %v2458_v47, 1  ;;  %v2577_v35 = vmax.f32 %v2557_v58, %v2458_v47 }
 0x3c0   : > { %v2668_v34 = vpack.c.bf16 %v2648_v9, %v2648_v9  ;;  %v2176_v9 = vadd.f32 %v2139_v18, %v2049_v61  ;;  %v7924_v18 = vld [vmem:[%s11148_s7 + $0xa0] sm:$0xff] }
 0x3c1   : > { %v2509_v16 = vsel %vm860_vm3, %v2506_v46, %v2508_v30  ;;  %3119 = vmatpush.bf16.msrb.mxu3 %v7924_v18 }
 0x3c2   : > { %v2737_v37 = vunpack.c.l.b16 %v2668_v34  ;;  %v2393_v11 = vpop.f32.mrf.mxu2  ;;  %v2558_v57 = vmax.f32 %v2457_v21, %v2509_v16  ;;  %v2605_v60 = vmax.f32 %v2576_v3, %v2509_v16  ;;  %v2768_v21 = vshrl.u32 %v9478_v63, 16  ;;  %v2144_v34 = vpop.f32.mrf.mxu0 }
 0x3c3   : > { %v2433_v24 = vadd.f32 %v2393_v11, %v2306_v29  ;;  %v2276_v16 = vpop.f32.mrf.mxu1 }
 0x3c4   : > { %v9507_v4 = vpack.c.b16 %v2737_v37, %v2736_v36  ;;  %v2625_v41 = vmax.f32 %v2605_v60, 0.0  ;;  %v2770_v2 = vor.u32 %v2768_v21, %v2766_v0 }
 0x3c5   : > { %v2459_v19 = vadd.f32 %v9330_v44, %v2433_v24 }
 0x3c6   : > { %2998 = vmatmul.bf16.gmra.mxu0 %v9507_v4  ;;  %3262 = vmatmul.bf16.gmra.mxu1 %v9507_v4  ;;  %v2772_v46 = vshll.u32 %v9507_v4, 16  ;;  %v2649_v58 = vmul.f32 %v9417_v51, %v2625_v41 }
 0x3c7   : > { %v2510_v3 = vrot.slane %v2459_v19, 1  ;;  %v2578_v55 = vmax.f32 %v2558_v57, %v2459_v19 }
 0x3c8   : > { %v2774_v12 = vrot.slane %v2772_v46, 1  ;;  %v2669_v52 = vpack.c.bf16 %v2649_v58, %v2649_v58 }
 0x3c9   : > { %v2511_v15 = vsel %vm860_vm3, %v2508_v30, %v2510_v3 }
 0x3ca   : > { %v2395_v26 = vpop.f32.mrf.mxu2  ;;  %v2559_v6 = vmax.f32 %v2458_v47, %v2511_v15  ;;  %v2606_v50 = vmax.f32 %v2577_v35, %v2511_v15  ;;  %v2775_v25 = vsel %vm1179_vm5, %v2770_v2, %v2774_v12  ;;  %v2050_v47 = vadd.f32 %v9218_v32, %v9228_v23  ;;  %v2146_v46 = vpop.f32.mrf.mxu0 }
 0x3cb   : > { %v2434_v1 = vadd.f32 %v2395_v26, %v2307_v38  ;;  %2888 = vmatmul.bf16.gmra.mxu3 %v2775_v25  ;;  %3398 = vmatmul.bf16.vlgmr.msra.gmra.mxu2 %v2775_v25  ;;  %v2308_v35 = vadd.f32 %v2271_v42, %v2176_v9  ;;  %v2738_v36 = vunpack.c.l.b16 %v2669_v52  ;;  %v2776_v42 = vshrl.u32 %v9507_v4, 16 }
 0x3cc   : > { %v2626_v62 = vmax.f32 %v2606_v50, 0.0  ;;  %v2177_v32 = vadd.f32 %v2141_v43, %v2050_v47  ;;  %v2051_v2 = vadd.f32 %v9225_v48, %v9238_v54  ;;  %v2052_v52 = vadd.f32 %v9235_v14, %v9243_v56 }
 0x3cd   : > { %v2460_v0 = vadd.f32 %v9330_v44, %v2434_v1 }
 0x3ce   : > { %v2650_v45 = vmul.f32 %v9417_v51, %v2626_v62  ;;  %v2309_v61 = vadd.f32 %v2273_v53, %v2177_v32  ;;  %v2178_v54 = vadd.f32 %v2144_v34, %v2051_v2  ;;  %v7923_v34 = vld [vmem:[%s11148_s7 + $0x98] sm:$0xff]  ;;  %v2179_v14 = vadd.f32 %v2146_v46, %v2052_v52 }
 0x3cf   : > { %v2512_v10 = vrot.slane %v2460_v0, 1  ;;  %v2579_v30 = vmax.f32 %v2559_v6, %v2460_v0  ;;  %3120 = vmatpush.bf16.msrb.mxu3 %v7923_v34 }
 0x3d0   : > { %v2670_v28 = vpack.c.bf16 %v2650_v45, %v2650_v45  ;;  %v2310_v45 = vadd.f32 %v2276_v16, %v2178_v54  ;;  %v7922_v54 = vld [vmem:[%s11148_s7 + $0x90] sm:$0xff] }
 0x3d1   : > { %v2513_v29 = vsel %vm860_vm3, %v2510_v3, %v2512_v10  ;;  %v2778_v3 = vor.u32 %v2776_v42, %v2774_v12  ;;  %v2278_v12 = vpop.f32.mrf.mxu1 }
 0x3d2   : > { %v2739_v37 = vunpack.c.l.b16 %v2670_v28  ;;  %v2398_v11 = vpop.f32.mrf.mxu2  ;;  %v2560_v57 = vmax.f32 %v2459_v19, %v2513_v29  ;;  %v2607_v60 = vmax.f32 %v2578_v55, %v2513_v29 }
 0x3d3   : > { %v2435_v59 = vadd.f32 %v2398_v11, %v2308_v35  ;;  %3121 = vmatpush.bf16.msrb.mxu3 %v7922_v54 }
 0x3d4   : > { %v9529_v24 = vpack.c.b16 %v2739_v37, %v2738_v36  ;;  %v2627_v23 = vmax.f32 %v2607_v60, 0.0 }
 0x3d5   : > { %v2461_v27 = vadd.f32 %v9330_v44, %v2435_v59  ;;  %v7951_v59 = vld [vmem:[%s11148_s7 + $0x178] sm:$0xff] }
 0x3d6   : > { %3003 = vmatmul.bf16.gmra.mxu0 %v9529_v24  ;;  %3267 = vmatmul.bf16.gmra.mxu1 %v9529_v24  ;;  %v2780_v19 = vshll.u32 %v9529_v24, 16  ;;  %v2651_v38 = vmul.f32 %v9417_v51, %v2627_v23  ;;  %v2784_v60 = vshrl.u32 %v9529_v24, 16 }
 0x3d7   : > { %v2514_v41 = vrot.slane %v2461_v27, 1  ;;  %v2580_v21 = vmax.f32 %v2560_v57, %v2461_v27  ;;  %3522 = vmatpush.bf16.msrb.mxu0 %v7951_v59 }
 0x3d8   : > { %v2782_v55 = vrot.slane %v2780_v19, 1  ;;  %v2671_v53 = vpack.c.bf16 %v2651_v38, %v2651_v38  ;;  %v2053_v19 = vadd.f32 %v9240_v13, %v9248_v22 }
 0x3d9   : > { %v2515_v43 = vsel %vm860_vm3, %v2512_v10, %v2514_v41  ;;  %v2281_v56 = vpop.f32.mrf.mxu1 }
 0x3da   : > { %v2400_v15 = vpop.f32.mrf.mxu2  ;;  %v2561_v58 = vmax.f32 %v2460_v0, %v2515_v43  ;;  %v2608_v26 = vmax.f32 %v2579_v30, %v2515_v43  ;;  %v9541_v6 = vsel %vm1179_vm5, %v2778_v3, %v2782_v55  ;;  %v2149_v30 = vpop.f32.mrf.mxu0  ;;  %v2740_v28 = vunpack.c.l.b16 %v2671_v53 }
 0x3db   : > { %v2436_v50 = vadd.f32 %v2400_v15, %v2309_v61  ;;  %2893 = vmatmul.bf16.gmra.mxu3 %v9541_v6  ;;  %3403 = vmatmul.bf16.gmra.mxu2 %v9541_v6  ;;  %v2786_v23 = vor.u32 %v2784_v60, %v2782_v55  ;;  %v7950_v55 = vld [vmem:[%s11148_s7 + $0x170] sm:$0xff] }
 0x3dc   : > { %v2628_v25 = vmax.f32 %v2608_v26, 0.0  ;;  %3523 = vmatpush.bf16.msrb.mxu0 %v7950_v55 }
 0x3dd   : > { %v2462_v48 = vadd.f32 %v9330_v44, %v2436_v50 }
 0x3de   : > { %v2652_v1 = vmul.f32 %v9417_v51, %v2628_v25 }
 0x3df   : > { %v2516_v62 = vrot.slane %v2462_v48, 1  ;;  %v2581_v9 = vmax.f32 %v2561_v58, %v2462_v48  ;;  %v2180_v58 = vadd.f32 %v2149_v30, %v2053_v19 }
 0x3e0   : > { %v2672_v0 = vpack.c.bf16 %v2652_v1, %v2652_v1 }
 0x3e1   : > { %v2517_v10 = vsel %vm860_vm3, %v2514_v41, %v2516_v62  ;;  %v2311_v41 = vadd.f32 %v2278_v12, %v2179_v14  ;;  %v7949_v12 = vld [vmem:[%s11148_s7 + $0x168] sm:$0xff]  ;;  %v2283_v53 = vpop.f32.mrf.mxu1  ;;  %v7947_v14 = vld [vmem:[%s11148_s7 + $0x158] sm:$0xff] }
 0x3e2   : > { %v2741_v47 = vunpack.c.l.b16 %v2672_v0  ;;  %v2403_v35 = vpop.f32.mrf.mxu2  ;;  %v2562_v29 = vmax.f32 %v2461_v27, %v2517_v10  ;;  %v2609_v36 = vmax.f32 %v2580_v21, %v2517_v10  ;;  %v2151_v13 = vpop.f32.mrf.mxu0  ;;  %3524 = vmatpush.bf16.msrb.mxu0 %v7949_v12 }
 0x3e3   : > { %v2437_v37 = vadd.f32 %v2403_v35, %v2310_v45 }
 0x3e4   : > { %v9553_v11 = vpack.c.b16 %v2741_v47, %v2740_v28  ;;  %v2629_v16 = vmax.f32 %v2609_v36, 0.0  ;;  %v7948_v47 = vld [vmem:[%s11148_s7 + $0x160] sm:$0xff] }
 0x3e5   : > { %v9556_v57 = vadd.f32 %v9330_v44, %v2437_v37 }
 0x3e6   : > { %3008 = vmatmul.bf16.gmra.mxu0 %v9553_v11  ;;  %3272 = vmatmul.bf16.gmra.mxu1 %v9553_v11  ;;  %v2788_v18 = vshll.u32 %v9553_v11, 16  ;;  %v2653_v46 = vmul.f32 %v9417_v51, %v2629_v16  ;;  %v2792_v37 = vshrl.u32 %v9553_v11, 16 }
 0x3e7   : > { %v2518_v27 = vrot.slane %v9556_v57, 1  ;;  %v2582_v32 = vmax.f32 %v2562_v29, %v9556_v57  ;;  %3525 = vmatpush.bf16.msrb.mxu0 %v7948_v47 }
 0x3e8   : > { %v2790_v42 = vrot.slane %v2788_v18, 1  ;;  %v2673_v26 = vpack.c.bf16 %v2653_v46, %v2653_v46 }
 0x3e9   : > { %v2519_v21 = vsel %vm860_vm3, %v2516_v62, %v2518_v27  ;;  %v2054_v62 = vadd.f32 %v9250_v31, %v9256_v39  ;;  %v2286_v19 = vpop.f32.mrf.mxu1 }
 0x3ea   : > { %v2405_v3 = vpop.f32.mrf.mxu2  ;;  %v2563_v2 = vmax.f32 %v2462_v48, %v2519_v21  ;;  %v2610_v61 = vmax.f32 %v2581_v9, %v2519_v21  ;;  %v9572_v43 = vsel %vm1179_vm5, %v2786_v23, %v2790_v42  ;;  %v2312_v9 = vadd.f32 %v2281_v56, %v2180_v58  ;;  %v2154_v36 = vpop.f32.mrf.mxu0  ;;  %v7967_v56 = vld [vmem:[%s11148_s7 + $0x1f8] sm:$0xff]  ;;  %v7965_v58 = vld [vmem:[%s11148_s7 + $0x1e8] sm:$0xff] }
 0x3eb   : > { %v2438_v38 = vadd.f32 %v2405_v3, %v2311_v41  ;;  %2898 = vmatmul.bf16.gmra.mxu3 %v9572_v43  ;;  %3408 = vmatmul.bf16.gmra.mxu2 %v9572_v43  ;;  %v2742_v52 = vunpack.c.l.b16 %v2673_v26  ;;  %v2181_v39 = vadd.f32 %v2151_v13, %v2054_v62  ;;  %v2794_v18 = vor.u32 %v2792_v37, %v2790_v42  ;;  %v7946_v42 = vld [vmem:[%s11148_s7 + $0x150] sm:$0xff]  ;;  %v7963_v37 = vld [vmem:[%s11148_s7 + $0x1d8] sm:$0xff] }
 0x3ec   : > { %v2630_v22 = vmax.f32 %v2610_v61, 0.0  ;;  %3526 = vmatpush.bf16.msrb.mxu0 %v7947_v14  ;;  %3796 = vmatpush.bf16.msra.mxu1 %v7967_v56 }
 0x3ed   : > { %v9580_v15 = vadd.f32 %v9330_v44, %v2438_v38 }
 0x3ee   : > { %v2654_v50 = vmul.f32 %v9417_v51, %v2630_v22 }
 0x3ef   : > { %v2520_v25 = vrot.slane %v9580_v15, 1  ;;  %v2583_v48 = vmax.f32 %v2563_v2, %v9580_v15 }
 0x3f0   : > { %v2674_v1 = vpack.c.bf16 %v2654_v50, %v2654_v50  ;;  %3527 = vmatpush.bf16.msrb.mxu0 %v7946_v42 }
 0x3f1   : > { %v2521_v0 = vsel %vm860_vm3, %v2518_v27, %v2520_v25  ;;  %v2055_v27 = vadd.f32 %v9258_v8, %v9263_v20  ;;  %v7966_v8 = vld [vmem:[%s11148_s7 + $0x1f0] sm:$0xff]  ;;  %v2288_v47 = vpop.f32.mrf.mxu1 }
 0x3f2   : > { %v2743_v45 = vunpack.c.l.b16 %v2674_v1  ;;  %v2408_v10 = vpop.f32.mrf.mxu2  ;;  %v2564_v30 = vmax.f32 %v9556_v57, %v2521_v0  ;;  %v2611_v28 = vmax.f32 %v2582_v32, %v2521_v0  ;;  %v2313_v32 = vadd.f32 %v2283_v53, %v2181_v39  ;;  %3797 = vmatpush.bf16.msra.mxu1 %v7966_v8  ;;  %v2156_v12 = vpop.f32.mrf.mxu0 }
 0x3f3   : > { %v2439_v35 = vadd.f32 %v2408_v10, %v2312_v9  ;;  %v2182_v38 = vadd.f32 %v2154_v36, %v2055_v27  ;;  %v7944_v10 = vld [vmem:[%s11148_s7 + $0x140] sm:$0xff] }
 0x3f4   : > { %v9598_v29 = vpack.c.b16 %v2743_v45, %v2742_v52  ;;  %v2631_v34 = vmax.f32 %v2611_v28, 0.0 }
 0x3f5   : > { %v9601_v31 = vadd.f32 %v9330_v44, %v2439_v35  ;;  %v2314_v53 = vadd.f32 %v2286_v19, %v2182_v38 }
 0x3f6   : > { %3013 = vmatmul.bf16.gmra.mxu0 %v9598_v29  ;;  %3277 = vmatmul.bf16.gmra.mxu1 %v9598_v29  ;;  %v2796_v57 = vshll.u32 %v9598_v29, 16  ;;  %v2655_v41 = vmul.f32 %v9417_v51, %v2631_v34  ;;  %v2800_v36 = vshrl.u32 %v9598_v29, 16 }
 0x3f7   : > { %v2522_v16 = vrot.slane %v9601_v31, 1  ;;  %v2584_v60 = vmax.f32 %v2564_v30, %v9601_v31  ;;  %3798 = vmatpush.bf16.msra.mxu1 %v7965_v58  ;;  %v7964_v30 = vld [vmem:[%s11148_s7 + $0x1e0] sm:$0xff] }
 0x3f8   : > { %v2798_v59 = vrot.slane %v2796_v57, 1  ;;  %v2675_v13 = vpack.c.bf16 %v2655_v41, %v2655_v41 }
 0x3f9   : > { %v2523_v23 = vsel %vm860_vm3, %v2520_v25, %v2522_v16 }
 0x3fa   : > { %v2410_v21 = vpop.f32.mrf.mxu2  ;;  %v2565_v46 = vmax.f32 %v9580_v15, %v2523_v23  ;;  %v2612_v3 = vmax.f32 %v2583_v48, %v2523_v23  ;;  %v9621_v2 = vsel %vm1179_vm5, %v2794_v18, %v2798_v59  ;;  %v7945_v15 = vld [vmem:[%s11148_s7 + $0x148] sm:$0xff]  ;;  %v2744_v62 = vunpack.c.l.b16 %v2675_v13  ;;  %v2159_v19 = vpop.f32.mrf.mxu0  ;;  %v7974_v13 = vld [vmem:[%s11148_s7 + $0x230] sm:$0xff] }
 0x3fb   : > { %v2440_v20 = vadd.f32 %v2410_v21, %v2313_v32  ;;  %2903 = vmatmul.bf16.gmra.mxu3 %v9621_v2  ;;  %3413 = vmatmul.bf16.gmra.mxu2 %v9621_v2  ;;  %v11201_v48 = vld [vmem:[#allocation10_spill] sm:$0xff]  ;;  %v2802_v56 = vor.u32 %v2800_v36, %v2798_v59  ;;  %v2057_v18 = vadd.f32 %v9281_v7, %v9284_v17  ;;  %v7975_v17 = vld [vmem:[%s11148_s7 + $0x238] sm:$0xff] }
 0x3fc   : > { %v2632_v61 = vmax.f32 %v2612_v3, 0.0  ;;  %3528 = vmatpush.bf16.msrb.mxu0 %v7945_v15  ;;  %v2056_v54 = vadd.f32 %v11201_v48, %v9273_v5  ;;  %3799 = vmatpush.bf16.msra.mxu1 %v7964_v30  ;;  %v7921_v23 = vld [vmem:[%s11148_s7 + $0x88] sm:$0xff]  ;;  %v7962_v3 = vld [vmem:[%s11148_s7 + $0x1d0] sm:$0xff] }
 0x3fd   : > { %v9632_v55 = vadd.f32 %v9330_v44, %v2440_v20  ;;  %3122 = vmatpush.bf16.msrb.mxu3 %v7921_v23  ;;  %v7920_v20 = vld [vmem:[%s11148_s7 + $0x80] sm:$0xff]  ;;  %v2184_v38 = vadd.f32 %v2159_v19, %v2057_v18  ;;  %3928 = vmatpush.bf16.msrb.mxu2 %v7975_v17 }
 0x3fe   : > { %v2656_v22 = vmul.f32 %v9417_v51, %v2632_v61  ;;  %v7961_v61 = vld [vmem:[%s11148_s7 + $0x1c8] sm:$0xff] }
 0x3ff   : > { %v2524_v26 = vrot.slane %v9632_v55, 1  ;;  %v2585_v50 = vmax.f32 %v2565_v46, %v9632_v55 }
 0x400   : > { %v2676_v25 = vpack.c.bf16 %v2656_v22, %v2656_v22  ;;  %3529 = vmatpush.bf16.msrb.mxu0 %v7944_v10  ;;  %3800 = vmatpush.bf16.msra.mxu1 %v7963_v37  ;;  %v2291_v22 = vpop.f32.mrf.mxu1 }
 0x401   : > { %v2525_v1 = vsel %vm860_vm3, %v2522_v16, %v2524_v26  ;;  %3123 = vmatpush.bf16.msrb.mxu3 %v7920_v20  ;;  %3929 = vmatpush.bf16.msrb.mxu2 %v7974_v13  ;;  %v7970_v20 = vld [vmem:[%s11148_s7 + $0x210] sm:$0xff] }
 0x402   : > { %v2745_v9 = vunpack.c.l.b16 %v2676_v25  ;;  %v2413_v0 = vpop.f32.mrf.mxu2  ;;  %v2566_v52 = vmax.f32 %v9601_v31, %v2525_v1  ;;  %v2613_v45 = vmax.f32 %v2584_v60, %v2525_v1  ;;  %v2183_v31 = vadd.f32 %v2156_v12, %v2056_v54  ;;  %v2161_v10 = vpop.f32.mrf.mxu0 }
 0x403   : > { %v2441_v28 = vadd.f32 %v2413_v0, %v2314_v53  ;;  %v2316_v25 = vadd.f32 %v2291_v22, %v2184_v38  ;;  %v7960_v0 = vld [vmem:[%s11148_s7 + $0x1c0] sm:$0xff]  ;;  %v3048_v22 = vrot.slane %v9507_v4, 1 }
 0x404   : > { %v9653_v5 = vpack.c.b16 %v2745_v9, %v2744_v62  ;;  %v2633_v35 = vmax.f32 %v2613_v45, 0.0  ;;  %v2315_v27 = vadd.f32 %v2288_v47, %v2183_v31  ;;  %3801 = vmatpush.bf16.msra.mxu1 %v7962_v3  ;;  %v7973_v45 = vld [vmem:[%s11148_s7 + $0x228] sm:$0xff] }
 0x405   : > { %v9656_v39 = vadd.f32 %v9330_v44, %v2441_v28  ;;  %3930 = vmatpush.bf16.msrb.mxu2 %v7973_v45 }
 0x406   : > { %3018 = vmatmul.bf16.gmra.mxu0 %v9653_v5  ;;  %3282 = vmatmul.bf16.gmra.mxu1 %v9653_v5  ;;  %v2804_v34 = vshll.u32 %v9653_v5, 16  ;;  %v2657_v60 = vmul.f32 %v9417_v51, %v2633_v35  ;;  %v2808_v31 = vshrl.u32 %v9653_v5, 16 }
 0x407   : > { %v2526_v57 = vrot.slane %v9656_v39, 1  ;;  %v2586_v14 = vmax.f32 %v2566_v52, %v9656_v39 }
 0x408   : > { %v2806_v16 = vrot.slane %v2804_v34, 1  ;;  %v2677_v8 = vpack.c.bf16 %v2657_v60, %v2657_v60  ;;  %3802 = vmatpush.bf16.msra.mxu1 %v7961_v61  ;;  %v7972_v34 = vld [vmem:[%s11148_s7 + $0x220] sm:$0xff] }
 0x409   : > { %v2527_v32 = vsel %vm860_vm3, %v2524_v26, %v2526_v57  ;;  %3931 = vmatpush.bf16.msrb.mxu2 %v7972_v34 }
 0x40a   : > { %v2415_v41 = vpop.f32.mrf.mxu2  ;;  %v2567_v21 = vmax.f32 %v9632_v55, %v2527_v32  ;;  %v2614_v46 = vmax.f32 %v2585_v50, %v2527_v32  ;;  %v9676_v59 = vsel %vm1179_vm5, %v2802_v56, %v2806_v16  ;;  %v2746_v12 = vunpack.c.l.b16 %v2677_v8 }
 0x40b   : > { %v2442_v7 = vadd.f32 %v2415_v41, %v2315_v27  ;;  %2908 = vmatmul.bf16.gmra.mxu3 %v9676_v59  ;;  %3418 = vmatmul.bf16.gmra.mxu2 %v9676_v59  ;;  %v2810_v56 = vor.u32 %v2808_v31, %v2806_v16  ;;  %v7959_v16 = vld [vmem:[%s11148_s7 + $0x1b8] sm:$0xff] }
 0x40c   : > { %v2634_v42 = vmax.f32 %v2614_v46, 0.0  ;;  %v2923_v28 = vpack.c.b16 %v2746_v12, %v2746_v12  ;;  %3803 = vmatpush.bf16.msra.mxu1 %v7960_v0  ;;  %3655 = vmatpush.bf16.msra.mxu3 %v7959_v16  ;;  %v3052_v16 = vrot.slane %v9553_v11, 1 }
 0x40d   : > { %v2468_v55 = vadd.f32 %v9330_v44, %v2442_v7 }
 0x40e   : > { %v2658_v15 = vmul.f32 %v9417_v51, %v2634_v42 }
 0x40f   : > { %v2528_v58 = vrot.slane %v2468_v55, 1  ;;  %v2587_v26 = vmax.f32 %v2567_v21, %v2468_v55  ;;  %v7971_v21 = vld [vmem:[%s11148_s7 + $0x218] sm:$0xff] }
 0x410   : > { %v2678_v50 = vpack.c.bf16 %v2658_v15, %v2658_v15  ;;  %3932 = vmatpush.bf16.msrb.mxu2 %v7971_v21 }
 0x411   : > { %v2529_v48 = vsel %vm860_vm3, %v2526_v57, %v2528_v58  ;;  %v2569_v54 = vmax.f32 %v2468_v55, %v2528_v58 }
 0x412   : > { %v2418_v53 = vpop.f32.mrf.mxu2  ;;  %v2568_v1 = vmax.f32 %v9656_v39, %v2529_v48  ;;  %v2615_v62 = vmax.f32 %v2586_v14, %v2529_v48  ;;  %v2747_v9 = vunpack.c.l.b16 %v2678_v50  ;;  %v2185_v39 = vadd.f32 %v2161_v10, %v9299_v33  ;;  %v2293_v14 = vpop.f32.mrf.mxu1  ;;  %v7969_v50 = vld [vmem:[%s11148_s7 + $0x208] sm:$0xff] }
 0x413   : > { %v2443_v52 = vadd.f32 %v2418_v53, %v2316_v25  ;;  %v3049_v53 = vsel %vm860_vm3, %v3046_v49, %v3048_v22 }
 0x414   : > { %v9705_v30 = vpack.c.b16 %v2747_v9, %v2746_v12  ;;  %v2635_v47 = vmax.f32 %v2615_v62, 0.0  ;;  %v2317_v27 = vadd.f32 %v2293_v14, %v2185_v39  ;;  %3933 = vmatpush.bf16.msrb.mxu2 %v7970_v20 }
 0x415   : > { %v2469_v35 = vadd.f32 %v9330_v44, %v2443_v52  ;;  %v7968_v52 = vld [vmem:[%s11148_s7 + $0x200] sm:$0xff] }
 0x416   : > { %3023 = vmatmul.bf16.gmra.mxu0 %v2923_v28  ;;  %3287 = vmatmul.bf16.gmra.mxu1 %v9705_v30  ;;  %v2812_v36 = vshll.u32 %v9705_v30, 16  ;;  %v2659_v18 = vmul.f32 %v9417_v51, %v2635_v47  ;;  %v2816_v62 = vshrl.u32 %v9705_v30, 16 }
 0x417   : > { %v2588_v37 = vmax.f32 %v2568_v1, %v2469_v35  ;;  %v2592_v57 = vrot.slane %v2469_v35, 1  ;;  %v7958_v35 = vld [vmem:[%s11148_s7 + $0x1b0] sm:$0xff] }
 0x418   : > { %v2814_v60 = vrot.slane %v2812_v36, 1  ;;  %v2679_v3 = vpack.c.bf16 %v2659_v18, %v2659_v18  ;;  %3934 = vmatpush.bf16.msrb.mxu2 %v7969_v50  ;;  %3656 = vmatpush.bf16.msra.mxu3 %v7958_v35  ;;  %v7955_v50 = vld [vmem:[%s11148_s7 + $0x198] sm:$0xff] }
 0x419   : > { %v2593_v33 = vsel %vm860_vm3, %v2528_v58, %v2592_v57 }
 0x41a   : > { %v2616_v32 = vmax.f32 %v2587_v26, %v2593_v33  ;;  %v2420_v23 = vpop.f32.mrf.mxu2  ;;  %v9718_v19 = vsel %vm1179_vm5, %v2810_v56, %v2814_v60  ;;  %v3197_v55 = vunpack.c.l.b16 %v2679_v3  ;;  %v2818_v45 = vor.u32 %v2816_v62, %v2814_v60 }
 0x41b   : > { %v2444_v41 = vadd.f32 %v2420_v23, %v2317_v27  ;;  %2913 = vmatmul.bf16.gmra.mxu3 %v9718_v19  ;;  %3423 = vmatmul.bf16.gmra.mxu2 %v9718_v19 }
 0x41c   : > { %v2636_v46 = vmax.f32 %v2616_v32, 0.0  ;;  %v3198_v25 = vpack.c.b16 %v3197_v55, %v3197_v55  ;;  %3935 = vmatpush.bf16.msrb.mxu2 %v7968_v52  ;;  %v7957_v32 = vld [vmem:[%s11148_s7 + $0x1a8] sm:$0xff] }
 0x41d   : > { %v2470_v7 = vadd.f32 %v9330_v44, %v2444_v41  ;;  %3657 = vmatpush.bf16.msra.mxu3 %v7957_v32 }
 0x41e   : > { %v2660_v17 = vmul.f32 %v9417_v51, %v2636_v46 }
 0x41f   : > { %v2589_v42 = vmax.f32 %v2569_v54, %v2470_v7  ;;  %v2594_v8 = vrot.slane %v2470_v7, 1 }
 0x420   : > { %v2680_v61 = vpack.c.bf16 %v2660_v17, %v2660_v17 }
 0x421   : > { %v2595_v38 = vsel %vm860_vm3, %v2592_v57, %v2594_v8  ;;  %v2618_v13 = vmax.f32 %v2589_v42, %v2594_v8  ;;  %v3050_v57 = vrot.slane %v9529_v24, 1  ;;  %v7956_v42 = vld [vmem:[%s11148_s7 + $0x1a0] sm:$0xff] }
 0x422   : > { %v2617_v15 = vmax.f32 %v2588_v37, %v2595_v38  ;;  %v3330_v44 = vunpack.c.l.b16 %v2680_v61  ;;  %3658 = vmatpush.bf16.msra.mxu3 %v7956_v42 }
 0x423   : > { %v2638_v58 = vmax.f32 %v2618_v13, 0.0  ;;  %v2989_v26 = vpop.f32.mrf.mxu0  ;;  %v3051_v18 = vsel %vm860_vm3, %v3048_v22, %v3050_v57 }
 0x424   : > { %v2637_v12 = vmax.f32 %v2617_v15, 0.0  ;;  %v9738_v48 = vpack.c.b16 %v3330_v44, %v3197_v55  ;;  %v3054_v55 = vrot.slane %v9598_v29, 1 }
 0x425   : > { %v2662_v54 = vmul.f32 %v9417_v51, %v2638_v58 }
 0x426   : > { %v2661_v1 = vmul.f32 %v9417_v51, %v2637_v12  ;;  %3292 = vmatmul.bf16.gmra.mxu1 %v3198_v25  ;;  %3530 = vmatmul.bf16.vlgmr.msrb.gmra.mxu0 %v3049_v53  ;;  %v3333_v9 = vshll.u32 %v9738_v48, 16  ;;  %v3337_v31 = vshrl.u32 %v9738_v48, 16  ;;  %v3055_v13 = vsel %vm860_vm3, %v3052_v16, %v3054_v55 }
 0x427   : > { %v2682_v0 = vpack.c.bf16 %v2662_v54, %v2662_v54  ;;  %3659 = vmatpush.bf16.msra.mxu3 %v7955_v50 }
 0x428   : > { %v3335_v10 = vrot.slane %v3333_v9, 1  ;;  %v2681_v28 = vpack.c.bf16 %v2661_v1, %v2661_v1 }
 0x429   : > { %v3736_v63 = vunpack.c.l.b16 %v2682_v0 }
 0x42a   : > { %v9751_v49 = vsel %vm1179_vm5, %v2818_v45, %v3335_v10  ;;  %v9753_v51 = vunpack.c.l.b16 %v2681_v28  ;;  %v3339_v34 = vor.u32 %v3337_v31, %v3335_v10  ;;  %v7954_v28 = vld [vmem:[%s11148_s7 + $0x190] sm:$0xff] }
 0x42b   : > { %2918 = vmatmul.bf16.gmra.mxu3 %v2818_v45  ;;  %v2991_v47 = vpop.f32.mrf.mxu0  ;;  %3428 = vmatmul.bf16.gmra.mxu2 %v9751_v49 }
 0x42c   : > { %v9760_v39 = vpack.c.b16 %v3736_v63, %v9753_v51  ;;  %3660 = vmatpush.bf16.msra.mxu3 %v7954_v28 }
 0x42e   : > { %v3739_v36 = vshll.u32 %v9760_v39, 16 }
 0x430   : > { %v9764_v37 = vrot.slane %v3739_v36, 1 }
 0x432   : > { %v9769_v14 = vsel %vm1179_vm5, %v3339_v34, %v9764_v37 }
 0x433   : > { %v2994_v56 = vpop.f32.mrf.mxu0  ;;  %v9771_v60 = vpop.f32.mrf.mxu1 }
 0x436   : > { %3535 = vmatmul.bf16.gmra.mxu0 %v3051_v18  ;;  %3804 = vmatmul.bf16.vlgmr.msra.gmra.mxu1 %v9541_v6  ;;  %v3053_v6 = vsel %vm860_vm3, %v3050_v57, %v3052_v16 }
 0x43b   : > { %v2996_v33 = vpop.f32.mrf.mxu0  ;;  %3124 = vmatmul.bf16.vlgmr.msrb.gmra.mxu3 %v9489_v40  ;;  %v9776_v27 = vpop.f32.mrf.mxu1  ;;  %3433 = vmatmul.bf16.gmra.mxu2 %v3339_v34 }
 0x43e   : > { %v2884_v23 = vpop.f32.mrf.mxu3 }
 0x43f   : > { %v9781_v41 = vadd.f32 %v2989_v26, %v2884_v23  ;;  %v7953_v23 = vld [vmem:[%s11148_s7 + $0x188] sm:$0xff] }
 0x440   : > { %3661 = vmatpush.bf16.msra.mxu3 %v7953_v23  ;;  %v3743_v23 = vshrl.u32 %v9760_v39, 16 }
 0x443   : > { %v2999_v21 = vpop.f32.mrf.mxu0  ;;  %v9784_v46 = vpop.f32.mrf.mxu1 }
 0x446   : > { %v2886_v3 = vpop.f32.mrf.mxu3  ;;  %3540 = vmatmul.bf16.gmra.mxu0 %v3053_v6  ;;  %3809 = vmatmul.bf16.gmra.mxu1 %v9572_v43 }
 0x447   : > { %v9788_v40 = vadd.f32 %v2991_v47, %v2886_v3 }
 0x44b   : > { %v3001_v7 = vpop.f32.mrf.mxu0  ;;  %3129 = vmatmul.bf16.gmra.mxu3 %v3049_v53  ;;  %v9790_v17 = vpop.f32.mrf.mxu1  ;;  %3936 = vmatmul.bf16.vlgmr.msrb.gmra.mxu2 %v3051_v18  ;;  %v3056_v53 = vrot.slane %v9653_v5, 1 }
 0x44d   : > { %v3057_v62 = vsel %vm860_vm3, %v3054_v55, %v3056_v53 }
 0x44e   : > { %v2889_v8 = vpop.f32.mrf.mxu3  ;;  %v9795_v20 = vpop.f32.mrf.mxu2 }
 0x44f   : > { %v9797_v61 = vadd.f32 %v2994_v56, %v2889_v8 }
 0x453   : > { %v3004_v43 = vpop.f32.mrf.mxu0  ;;  %v9800_v38 = vpop.f32.mrf.mxu1 }
 0x456   : > { %v2891_v22 = vpop.f32.mrf.mxu3  ;;  %v9803_v15 = vpop.f32.mrf.mxu2  ;;  %3545 = vmatmul.bf16.gmra.mxu0 %v3055_v13  ;;  %3814 = vmatmul.bf16.gmra.mxu1 %v9621_v2 }
 0x457   : > { %v9806_v44 = vadd.f32 %v2996_v33, %v2891_v22  ;;  %v7952_v22 = vld [vmem:[%s11148_s7 + $0x180] sm:$0xff] }
 0x458   : > { %3662 = vmatpush.bf16.msra.mxu3 %v7952_v22 }
 0x45b   : > { %v3006_v58 = vpop.f32.mrf.mxu0  ;;  %3134 = vmatmul.bf16.gmra.mxu3 %v3051_v18  ;;  %v9808_v26 = vpop.f32.mrf.mxu1  ;;  %3941 = vmatmul.bf16.gmra.mxu2 %v3053_v6 }
 0x45e   : > { %v2894_v12 = vpop.f32.mrf.mxu3  ;;  %v9813_v25 = vpop.f32.mrf.mxu2 }
 0x45f   : > { %v9815_v54 = vadd.f32 %v2999_v21, %v2894_v12 }
 0x463   : > { %v3009_v2 = vpop.f32.mrf.mxu0  ;;  %v9818_v1 = vpop.f32.mrf.mxu1 }
 0x466   : > { %v2896_v9 = vpop.f32.mrf.mxu3  ;;  %v9821_v0 = vpop.f32.mrf.mxu2  ;;  %3550 = vmatmul.bf16.gmra.mxu0 %v3057_v62  ;;  %3819 = vmatmul.bf16.gmra.mxu1 %v9676_v59  ;;  %v3058_v59 = vrot.slane %v9705_v30, 1 }
 0x467   : > { %v9824_v52 = vadd.f32 %v3001_v7, %v2896_v9 }
 0x468   : > { %v3059_v34 = vsel %vm860_vm3, %v3056_v53, %v3058_v59 }
 0x46b   : > { %v9826_v45 = vpop.f32.mrf.mxu0  ;;  %3139 = vmatmul.bf16.gmra.mxu3 %v3053_v6  ;;  %v9828_v10 = vpop.f32.mrf.mxu1  ;;  %3946 = vmatmul.bf16.gmra.mxu2 %v3055_v13 }
 0x46c   : > { %11202 = vst [vmem:[#allocation11_spill] sm:$0xff] %v9826_v45 }
 0x46e   : > { %v2899_v63 = vpop.f32.mrf.mxu3  ;;  %v9833_v47 = vpop.f32.mrf.mxu2 }
 0x46f   : > { %v9835_v35 = vadd.f32 %v3004_v43, %v2899_v63 }
 0x473   : > { %v3014_v31 = vpop.f32.mrf.mxu0  ;;  %v9838_v36 = vpop.f32.mrf.mxu1 }
 0x476   : > { %v2901_v57 = vpop.f32.mrf.mxu3  ;;  %v9841_v56 = vpop.f32.mrf.mxu2  ;;  %3555 = vmatmul.bf16.gmra.mxu0 %v3059_v34  ;;  %3824 = vmatmul.bf16.gmra.mxu1 %v9718_v19  ;;  %v3470_v19 = vrot.slane %v9738_v48, 1 }
 0x477   : > { %v9844_v18 = vadd.f32 %v3006_v58, %v2901_v57 }
 0x478   : > { %v3471_v42 = vsel %vm860_vm3, %v3058_v59, %v3470_v19 }
 0x47b   : > { %v9846_v33 = vpop.f32.mrf.mxu0  ;;  %3144 = vmatmul.bf16.gmra.mxu3 %v3055_v13  ;;  %v9848_v32 = vpop.f32.mrf.mxu1  ;;  %3951 = vmatmul.bf16.gmra.mxu2 %v3057_v62 }
 0x47c   : > { %11203 = vst [vmem:[#allocation12_spill] sm:$0xff] %v9846_v33 }
 0x47d   : > { %11204 = vst [vmem:[#allocation13_spill] sm:$0xff] %v9848_v32 }
 0x47e   : > { %v2904_v16 = vpop.f32.mrf.mxu3  ;;  %v9853_v21 = vpop.f32.mrf.mxu2 }
 0x47f   : > { %v9855_v6 = vadd.f32 %v3009_v2, %v2904_v16 }
 0x483   : > { %v3019_v3 = vpop.f32.mrf.mxu0  ;;  %v9858_v7 = vpop.f32.mrf.mxu1 }
 0x486   : > { %v9861_v8 = vpop.f32.mrf.mxu3  ;;  %v9863_v55 = vpop.f32.mrf.mxu2  ;;  %3560 = vmatmul.bf16.gmra.mxu0 %v3471_v42  ;;  %3829 = vmatmul.bf16.gmra.mxu1 %v9751_v49 }
 0x48b   : > { %v9866_v43 = vpop.f32.mrf.mxu0  ;;  %3149 = vmatmul.bf16.gmra.mxu3 %v3057_v62  ;;  %v9868_v13 = vpop.f32.mrf.mxu1  ;;  %3956 = vmatmul.bf16.gmra.mxu2 %v3059_v34 }
 0x48c   : > { %11205 = vst [vmem:[#allocation14_spill] sm:$0xff] %v9866_v43 }
 0x48d   : > { %11206 = vst [vmem:[#allocation15_spill] sm:$0xff] %v9868_v13 }
 0x48e   : > { %v2909_v58 = vpop.f32.mrf.mxu3  ;;  %v9873_v50 = vpop.f32.mrf.mxu2 }
 0x48f   : > { %v9875_v12 = vadd.f32 %v3014_v31, %v2909_v58  ;;  %v3745_v58 = vor.u32 %v3743_v23, %v9764_v37 }
 0x493   : > { %v3024_v53 = vpop.f32.mrf.mxu0  ;;  %v9877_v2 = vpop.f32.mrf.mxu1 }
 0x496   : > { %v9879_v49 = vpop.f32.mrf.mxu3  ;;  %v9881_v9 = vpop.f32.mrf.mxu2  ;;  %3565 = vmatmul.bf16.gmra.mxu0 %v3470_v19  ;;  %3834 = vmatmul.bf16.gmra.mxu1 %v9769_v14 }
 0x497   : > { %11207 = vst [vmem:[#allocation16_spill] sm:$0xff] %v9879_v49 }
 0x498   : > { %11208 = vst [vmem:[#allocation17_spill] sm:$0xff] %v9881_v9 }
 0x49b   : > { %v3026_v62 = vpop.f32.mrf.mxu0  ;;  %3154 = vmatmul.bf16.gmra.mxu3 %v3059_v34  ;;  %v9884_v28 = vpop.f32.mrf.mxu1  ;;  %3961 = vmatmul.bf16.gmra.mxu2 %v3471_v42  ;;  %v3876_v34 = vrot.slane %v9760_v39, 1 }
 0x49c   : > { %11209 = vst [vmem:[#allocation18_spill] sm:$0xff] %v9884_v28 }
 0x49d   : > { %v3877_v42 = vsel %vm860_vm3, %v3470_v19, %v3876_v34 }
 0x49e   : > { %v2914_v63 = vpop.f32.mrf.mxu3  ;;  %v9886_v57 = vpop.f32.mrf.mxu2 }
 0x49f   : > { %v9888_v31 = vadd.f32 %v3019_v3, %v2914_v63 }
 0x4a3   : > { %v9891_v16 = vpop.f32.mrf.mxu1  ;;  %v3531_v22 = vpop.f32.mrf.mxu0 }
 0x4a6   : > { %v9894_v43 = vpop.f32.mrf.mxu3  ;;  %v9896_v14 = vpop.f32.mrf.mxu2  ;;  %3839 = vmatmul.bf16.gmra.mxu1 %v3745_v58 }
 0x4a7   : > { %11210 = vst [vmem:[#allocation10_spill] sm:$0xff] %v9894_v43 }
 0x4a8   : > { %11211 = vst [vmem:[#allocation19_spill] sm:$0xff] %v9896_v14 }
 0x4ab   : > { %3159 = vmatmul.bf16.gmra.mxu3 %v3058_v59  ;;  %v3295_v62 = vpop.f32.mrf.mxu1  ;;  %v9900_v3 = vpop.f32.mrf.mxu0  ;;  %3966 = vmatmul.bf16.gmra.mxu2 %v3877_v42 }
 0x4ae   : > { %v2919_v63 = vpop.f32.mrf.mxu3  ;;  %v9902_v28 = vpop.f32.mrf.mxu2 }
 0x4af   : > { %v9904_v13 = vadd.f32 %v3024_v53, %v2919_v63 }
 0x4b3   : > { %v3536_v37 = vpop.f32.mrf.mxu0  ;;  %v9906_v23 = vpop.f32.mrf.mxu1 }
 0x4b6   : > { %v2921_v43 = vpop.f32.mrf.mxu3  ;;  %v9908_v14 = vpop.f32.mrf.mxu2 }
 0x4b7   : > { %11212 = vst [vmem:[#allocation20_spill] sm:$0xff] %v9908_v14 }
 0x4bb   : > { %v9910_v58 = vpop.f32.mrf.mxu0  ;;  %3663 = vmatmul.bf16.vlgmr.msra.gmra.mxu3 %v9507_v4  ;;  %v9913_v39 = vpop.f32.mrf.mxu1  ;;  %3971 = vmatmul.bf16.gmra.mxu2 %v3876_v34 }
 0x4be   : > { %v3125_v59 = vpop.f32.mrf.mxu3  ;;  %v9915_v19 = vpop.f32.mrf.mxu2 }
 0x4bf   : > { %v3164_v42 = vadd.f32 %v3125_v59, %v9781_v41 }
 0x4c1   : > { %v3297_v53 = vadd.f32 %v9771_v60, %v3164_v42 }
 0x4c3   : > { %v3541_v62 = vpop.f32.mrf.mxu0  ;;  %v9919_v63 = vpop.f32.mrf.mxu1  ;;  %v3438_v43 = vadd.f32 %v9795_v20, %v3297_v53 }
 0x4c5   : > { %v9922_v14 = vadd.f32 %v3531_v22, %v3438_v43 }
 0x4c6   : > { %v3127_v33 = vpop.f32.mrf.mxu3  ;;  %v3436_v49 = vpop.f32.mrf.mxu2 }
 0x4c7   : > { %v9925_v4 = vadd.f32 %v3127_v33, %v9788_v40 }
 0x4cb   : > { %v9927_v34 = vpop.f32.mrf.mxu0  ;;  %3668 = vmatmul.bf16.gmra.mxu3 %v9529_v24  ;;  %v9930_v9 = vpop.f32.mrf.mxu1 }
 0x4ce   : > { %v3130_v41 = vpop.f32.mrf.mxu3  ;;  %v9932_v60 = vpop.f32.mrf.mxu2 }
 0x4cf   : > { %v3166_v59 = vadd.f32 %v3130_v41, %v9797_v61 }
 0x4d1   : > { %v3299_v20 = vadd.f32 %v9784_v46, %v3166_v59 }
 0x4d3   : > { %v3546_v22 = vpop.f32.mrf.mxu0  ;;  %v9936_v42 = vpop.f32.mrf.mxu1  ;;  %v3440_v40 = vadd.f32 %v9813_v25, %v3299_v20 }
 0x4d5   : > { %v9939_v33 = vadd.f32 %v3536_v37, %v3440_v40 }
 0x4d6   : > { %v3132_v49 = vpop.f32.mrf.mxu3  ;;  %v9941_v53 = vpop.f32.mrf.mxu2 }
 0x4d7   : > { %v9944_v24 = vadd.f32 %v3132_v49, %v9806_v44 }
 0x4db   : > { %v9946_v43 = vpop.f32.mrf.mxu0  ;;  %3673 = vmatmul.bf16.gmra.mxu3 %v9553_v11  ;;  %v9949_v61 = vpop.f32.mrf.mxu1 }
 0x4de   : > { %v3135_v46 = vpop.f32.mrf.mxu3  ;;  %v9951_v41 = vpop.f32.mrf.mxu2 }
 0x4df   : > { %v3168_v59 = vadd.f32 %v3135_v46, %v9815_v54 }
 0x4e1   : > { %v3301_v25 = vadd.f32 %v9800_v38, %v3168_v59  ;;  %v7983_v38 = vld [vmem:[%s11151_s10 + $0x38] sm:$0xff] }
 0x4e2   : > { %4287 = vmatpush.bf16.msra.mxu0 %v7983_v38 }
 0x4e3   : > { %v3551_v37 = vpop.f32.mrf.mxu0  ;;  %v9959_v44 = vpop.f32.mrf.mxu1  ;;  %v3442_v20 = vadd.f32 %v9833_v47, %v3301_v25 }
 0x4e5   : > { %v9962_v40 = vadd.f32 %v3541_v62, %v3442_v20 }
 0x4e6   : > { %v3137_v11 = vpop.f32.mrf.mxu3  ;;  %v9964_v49 = vpop.f32.mrf.mxu2 }
 0x4e7   : > { %v9967_v32 = vadd.f32 %v3137_v11, %v9824_v52 }
 0x4eb   : > { %v9969_v54 = vpop.f32.mrf.mxu0  ;;  %3678 = vmatmul.bf16.gmra.mxu3 %v9598_v29  ;;  %v9972_v46 = vpop.f32.mrf.mxu1 }
 0x4ec   : > { %11213 = vst [vmem:[#allocation21_spill] sm:$0xff] %v9969_v54 }
 0x4ed   : > { %11214 = vst [vmem:[#allocation22_spill] sm:$0xff] %v9972_v46 }
 0x4ee   : > { %v3140_v47 = vpop.f32.mrf.mxu3  ;;  %v9977_v62 = vpop.f32.mrf.mxu2 }
 0x4ef   : > { %v3170_v59 = vadd.f32 %v3140_v47, %v9835_v35 }
 0x4f1   : > { %v3303_v25 = vadd.f32 %v9818_v1, %v3170_v59 }
 0x4f3   : > { %v3556_v52 = vpop.f32.mrf.mxu0  ;;  %v9981_v20 = vpop.f32.mrf.mxu1  ;;  %v3444_v11 = vadd.f32 %v9853_v21, %v3303_v25 }
 0x4f5   : > { %v9984_v29 = vadd.f32 %v3546_v22, %v3444_v11 }
 0x4f6   : > { %v3142_v54 = vpop.f32.mrf.mxu3  ;;  %v9986_v46 = vpop.f32.mrf.mxu2 }
 0x4f7   : > { %v9989_v45 = vadd.f32 %v3142_v54, %v9844_v18 }
 0x4fb   : > { %v9991_v38 = vpop.f32.mrf.mxu0  ;;  %3683 = vmatmul.bf16.gmra.mxu3 %v9653_v5  ;;  %v9994_v35 = vpop.f32.mrf.mxu1 }
 0x4fc   : > { %11215 = vst [vmem:[#allocation23_spill] sm:$0xff] %v9991_v38 }
 0x4fd   : > { %11216 = vst [vmem:[#allocation24_spill] sm:$0xff] %v9994_v35 }
 0x4fe   : > { %v3145_v1 = vpop.f32.mrf.mxu3  ;;  %v9996_v47 = vpop.f32.mrf.mxu2 }
 0x4ff   : > { %v3172_v59 = vadd.f32 %v3145_v1, %v9855_v6 }
 0x501   : > { %v3305_v21 = vadd.f32 %v9838_v36, %v3172_v59  ;;  %v7982_v36 = vld [vmem:[%s11151_s10 + $0x30] sm:$0xff] }
 0x502   : > { %4288 = vmatpush.bf16.msra.mxu0 %v7982_v36 }
 0x503   : > { %v3561_v22 = vpop.f32.mrf.mxu0  ;;  %v10000_v25 = vpop.f32.mrf.mxu1  ;;  %v3446_v11 = vadd.f32 %v9873_v50, %v3305_v21 }
 0x504   : > { %11217 = vst [vmem:[#allocation25_spill] sm:$0xff] %v10000_v25 }
 0x505   : > { %v10003_v18 = vadd.f32 %v3551_v37, %v3446_v11 }
 0x506   : > { %v10005_v54 = vpop.f32.mrf.mxu3  ;;  %v10007_v38 = vpop.f32.mrf.mxu2 }
 0x50b   : > { %v10009_v5 = vpop.f32.mrf.mxu0  ;;  %3688 = vmatmul.bf16.gmra.mxu3 %v9705_v30  ;;  %v10012_v35 = vpop.f32.mrf.mxu1 }
 0x50c   : > { %11218 = vst [vmem:[#allocation26_spill] sm:$0xff] %v10009_v5 }
 0x50d   : > { %11219 = vst [vmem:[#allocation27_spill] sm:$0xff] %v10012_v35 }
 0x50e   : > { %v3150_v6 = vpop.f32.mrf.mxu3  ;;  %v10017_v1 = vpop.f32.mrf.mxu2 }
 0x50f   : > { %11220 = vst [vmem:[#allocation28_spill] sm:$0xff] %v10017_v1  ;;  %v3174_v50 = vadd.f32 %v3150_v6, %v9875_v12 }
 0x511   : > { %v3307_v37 = vadd.f32 %v9858_v7, %v3174_v50 }
 0x513   : > { %v3566_v59 = vpop.f32.mrf.mxu0  ;;  %v10021_v21 = vpop.f32.mrf.mxu1  ;;  %v3448_v11 = vadd.f32 %v9886_v57, %v3307_v37 }
 0x514   : > { %11221 = vst [vmem:[#allocation29_spill] sm:$0xff] %v10021_v21 }
 0x515   : > { %v10024_v30 = vadd.f32 %v3556_v52, %v3448_v11 }
 0x516   : > { %v10026_v5 = vpop.f32.mrf.mxu3  ;;  %v10028_v35 = vpop.f32.mrf.mxu2 }
 0x51b   : > { %v3568_v25 = vpop.f32.mrf.mxu0  ;;  %3693 = vmatmul.bf16.gmra.mxu3 %v9738_v48  ;;  %v10031_v36 = vpop.f32.mrf.mxu1  ;;  %v3604_v48 = vpack.c.b16 %v9753_v51, %v9753_v51 }
 0x51c   : > { %11222 = vst [vmem:[#allocation30_spill] sm:$0xff] %v10031_v36 }
 0x51e   : > { %v3155_v1 = vpop.f32.mrf.mxu3  ;;  %v10033_v12 = vpop.f32.mrf.mxu2 }
 0x51f   : > { %v3176_v7 = vadd.f32 %v3155_v1, %v9888_v31 }
 0x521   : > { %v3309_v6 = vadd.f32 %v9877_v2, %v3176_v7 }
 0x523   : > { %v10037_v50 = vpop.f32.mrf.mxu1  ;;  %v3450_v57 = vadd.f32 %v9902_v28, %v3309_v6  ;;  %v7981_v28 = vld [vmem:[%s11151_s10 + $0x28] sm:$0xff]  ;;  %v7979_v6 = vld [vmem:[%s11151_s10 + $0x18] sm:$0xff] }
 0x524   : > { %4289 = vmatpush.bf16.msra.mxu0 %v7981_v28  ;;  %4354 = vmatpush.bf16.msrb.mxu3 %v7979_v6 }
 0x525   : > { %v10040_v52 = vadd.f32 %v3561_v22, %v3450_v57 }
 0x526   : > { %v10042_v37 = vpop.f32.mrf.mxu3  ;;  %v10044_v25 = vpop.f32.mrf.mxu2 }
 0x52b   : > { %3698 = vmatmul.bf16.gmra.mxu3 %v3604_v48  ;;  %v3842_v11 = vpop.f32.mrf.mxu1 }
 0x52e   : > { %v3160_v36 = vpop.f32.mrf.mxu3  ;;  %v10048_v21 = vpop.f32.mrf.mxu2 }
 0x52f   : > { %v3178_v2 = vadd.f32 %v3160_v36, %v9904_v13  ;;  %v3298_v13 = vadd.f32 %v9776_v27, %v9925_v4  ;;  %v10078_v4 = vld [vmem:[%s11149_s8] ss:$0 sm:$0xff] }
 0x531   : > { %v3311_v31 = vadd.f32 %v9891_v16, %v3178_v2 }
 0x533   : > { %v3452_v22 = vadd.f32 %v9915_v19, %v3311_v31  ;;  %v7995_v19 = vld [vmem:[%s11151_s10 + $0x98] sm:$0xff] }
 0x534   : > { %4629 = vmatpush.bf16.msra.mxu2 %v7995_v19 }
 0x535   : > { %v10056_v1 = vadd.f32 %v3566_v59, %v3452_v22  ;;  %v3439_v59 = vadd.f32 %v9803_v15, %v3298_v13 }
 0x536   : > { %v3162_v7 = vpop.f32.mrf.mxu3  ;;  %v10058_v51 = vpop.f32.mrf.mxu2 }
 0x537   : > { %v3571_v11 = vadd.f32 %v9900_v3, %v3439_v59  ;;  %v7991_v3 = vld [vmem:[%s11151_s10 + $0x78] sm:$0xff] }
 0x538   : > { %4531 = vmatpush.bf16.msrb.mxu1 %v7991_v3  ;;  %v3302_v3 = vadd.f32 %v9808_v26, %v9967_v32 }
 0x53a   : > { %v3443_v32 = vadd.f32 %v9841_v56, %v3302_v3 }
 0x53e   : > { %v3664_v36 = vpop.f32.mrf.mxu3  ;;  %v10065_v57 = vpop.f32.mrf.mxu2 }
 0x53f   : > { %v3703_v16 = vadd.f32 %v3664_v36, %v9922_v14  ;;  %v7977_v36 = vld [vmem:[%s11151_s10 + $0x8] sm:$0xff] }
 0x541   : > { %v3844_v48 = vadd.f32 %v9906_v23, %v3703_v16  ;;  %v7978_v23 = vld [vmem:[%s11151_s10 + $0x10] sm:$0xff] }
 0x542   : > { %4355 = vmatpush.bf16.msrb.mxu3 %v7978_v23 }
 0x543   : > { %v3976_v27 = vadd.f32 %v9932_v60, %v3844_v48  ;;  %v3300_v60 = vadd.f32 %v9790_v17, %v9944_v24  ;;  %v7980_v24 = vld [vmem:[%s11151_s10 + $0x20] sm:$0xff] }
 0x544   : > { %4290 = vmatpush.bf16.msra.mxu0 %v7980_v24 }
 0x545   : > { %v3995_v22 = vadd.f32 %v10078_v4, %v3976_v27  ;;  %v3441_v59 = vadd.f32 %v9821_v0, %v3300_v60 }
 0x546   : > { %v3666_v2 = vpop.f32.mrf.mxu3  ;;  %v3974_v28 = vpop.f32.mrf.mxu2  ;;  %4356 = vmatpush.bf16.msrb.mxu3 %v7977_v36 }
 0x547   : > { %v3704_v14 = vadd.f32 %v3666_v2, %v3571_v11 }
 0x549   : > { %v3845_v31 = vadd.f32 %v9913_v39, %v3704_v14  ;;  %v4023_v39 = vrot.slane %v3995_v22, 1 }
 0x54b   : > { %v3977_v15 = vadd.f32 %v9941_v53, %v3845_v31 }
 0x54d   : > { %v3996_v7 = vadd.f32 %v10078_v4, %v3977_v15  ;;  %v7990_v15 = vld [vmem:[%s11151_s10 + $0x70] sm:$0xff] }
 0x54e   : > { %v3669_v6 = vpop.f32.mrf.mxu3  ;;  %4532 = vmatpush.bf16.msrb.mxu1 %v7990_v15 }
 0x54f   : > { %v4024_v13 = vrot.slane %v3996_v7, 1  ;;  %v3705_v53 = vadd.f32 %v3669_v6, %v9939_v33  ;;  %v7976_v33 = vld [vmem:[%s11151_s10] sm:$0xff] }
 0x550   : > { %4357 = vmatpush.bf16.msrb.mxu3 %v7976_v33 }
 0x551   : > { %v3846_v16 = vadd.f32 %v9919_v63, %v3705_v53  ;;  %v4025_v19 = vsel %vm860_vm3, %v4023_v39, %v4024_v13  ;;  %v3573_v63 = vadd.f32 %v9910_v58, %v3441_v59 }
 0x552   : > { %v4061_v17 = vadd.f32 %v4025_v19, %v3995_v22 }
 0x553   : > { %v3978_v48 = vadd.f32 %v9951_v41, %v3846_v16  ;;  %v7988_v16 = vld [vmem:[%s11151_s10 + $0x60] sm:$0xff] }
 0x555   : > { %v3997_v11 = vadd.f32 %v10078_v4, %v3978_v48 }
 0x556   : > { %v3671_v2 = vpop.f32.mrf.mxu3 }
 0x557   : > { %v4026_v0 = vrot.slane %v3997_v11, 1  ;;  %v4074_v28 = vadd.f32 %v4061_v17, %v3997_v11  ;;  %v3706_v27 = vadd.f32 %v3671_v2, %v3573_v63 }
 0x559   : > { %v3847_v14 = vadd.f32 %v9930_v9, %v3706_v27  ;;  %v4027_v31 = vsel %vm860_vm3, %v4024_v13, %v4026_v0  ;;  %v3304_v27 = vadd.f32 %v9828_v10, %v9989_v45  ;;  %v7987_v10 = vld [vmem:[%s11151_s10 + $0x58] sm:$0xff] }
 0x55a   : > { %v4062_v22 = vadd.f32 %v4027_v31, %v3996_v7  ;;  %v7994_v7 = vld [vmem:[%s11151_s10 + $0x90] sm:$0xff]  ;;  %4444 = vmatpush.bf16.msrb.mxu0 %v7987_v10 }
 0x55b   : > { %v3979_v41 = vadd.f32 %v9964_v49, %v3847_v14  ;;  %v7989_v49 = vld [vmem:[%s11151_s10 + $0x68] sm:$0xff]  ;;  %4630 = vmatpush.bf16.msra.mxu2 %v7994_v7 }
 0x55c   : > { %4533 = vmatpush.bf16.msrb.mxu1 %v7989_v49 }
 0x55d   : > { %v3998_v58 = vadd.f32 %v10078_v4, %v3979_v41 }
 0x55e   : > { %v3674_v23 = vpop.f32.mrf.mxu3 }
 0x55f   : > { %v4028_v60 = vrot.slane %v3998_v58, 1  ;;  %v4075_v6 = vadd.f32 %v4062_v22, %v3998_v58  ;;  %v3707_v9 = vadd.f32 %v3674_v23, %v9962_v40 }
 0x560   : > { %4534 = vmatpush.bf16.msrb.mxu1 %v7988_v16 }
 0x561   : > { %v3848_v39 = vadd.f32 %v9936_v42, %v3707_v9  ;;  %v4029_v26 = vsel %vm860_vm3, %v4026_v0, %v4028_v60  ;;  %v3575_v42 = vadd.f32 %v9927_v34, %v3443_v32 }
 0x562   : > { %v4063_v13 = vadd.f32 %v4029_v26, %v3997_v11  ;;  %v4096_v53 = vadd.f32 %v4074_v28, %v4029_v26 }
 0x563   : > { %v3980_v40 = vadd.f32 %v9977_v62, %v3848_v39  ;;  %v10138_v62 = vld [vmem:[%s560_s19] ss:$0 sm:$0xff]  ;;  %s546_s19 = scalar_lea.vmem [#allocation2], %s545_s17 }
 0x564   : > { %v4109_v36 = vmul.f32 0.25, %v4096_v53  ;;  %v11223_v53 = vld [vmem:[#allocation11_spill] sm:$0xff]  ;;  %s6281_s30 = sshll.u32 %s546_s19, 4  ;;  %s6282_s30 = int_to_ptr.vmem [resolvable:$true] %s6281_s30 }
 0x565   : > { %v3999_v19 = vadd.f32 %v10078_v4, %v3980_v40  ;;  %v3012_v40 = vadd.f32 %v11223_v53, %v9861_v8 }
 0x566   : > { %v3676_v59 = vpop.f32.mrf.mxu3  ;;  %v4122_v48 = vmax.f32 %v4109_v36, 0.0 }
 0x567   : > { %v4030_v17 = vrot.slane %v3999_v19, 1  ;;  %v4076_v56 = vadd.f32 %v4063_v13, %v3999_v19  ;;  %v3708_v24 = vadd.f32 %v3676_v59, %v3575_v42  ;;  %v11224_v42 = vld [vmem:[#allocation22_spill] sm:$0xff] }
 0x568   : > { %v4139_v0 = vmul.f32 %v10138_v62, %v4122_v48 }
 0x569   : > { %v3849_v33 = vadd.f32 %v9949_v61, %v3708_v24  ;;  %v4031_v11 = vsel %vm860_vm3, %v4028_v60, %v4030_v17  ;;  %v3445_v60 = vadd.f32 %v9863_v55, %v3304_v27  ;;  %v7993_v55 = vld [vmem:[%s11151_s10 + $0x88] sm:$0xff] }
 0x56a   : > { %v4064_v63 = vadd.f32 %v4031_v11, %v3998_v58  ;;  %v4097_v2 = vadd.f32 %v4075_v6, %v4031_v11  ;;  %v4152_v3 = vpack.c.bf16 %v4139_v0, %v4139_v0  ;;  %4631 = vmatpush.bf16.msra.mxu2 %v7993_v55  ;;  %v11230_v55 = vld [vmem:[#allocation12_spill] sm:$0xff] }
 0x56b   : > { %v3981_v34 = vadd.f32 %v9986_v46, %v3849_v33 }
 0x56c   : > { %v4110_v28 = vmul.f32 0.25, %v4097_v2  ;;  %v4191_v49 = vunpack.c.l.b16 %v4152_v3 }
 0x56d   : > { %v4000_v14 = vadd.f32 %v10078_v4, %v3981_v34 }
 0x56e   : > { %v4123_v31 = vmax.f32 %v4110_v28, 0.0  ;;  %v3679_v22 = vpop.f32.mrf.mxu3 }
 0x56f   : > { %v4032_v41 = vrot.slane %v4000_v14, 1  ;;  %v4077_v15 = vadd.f32 %v4064_v63, %v4000_v14  ;;  %v3709_v61 = vadd.f32 %v3679_v22, %v9984_v29  ;;  %v11225_v63 = vld [vmem:[#allocation13_spill] sm:$0xff] }
 0x570   : > { %v4140_v58 = vmul.f32 %v10138_v62, %v4123_v31 }
 0x571   : > { %v3850_v23 = vadd.f32 %v9959_v44, %v3709_v61  ;;  %v4033_v46 = vsel %vm860_vm3, %v4030_v17, %v4032_v41  ;;  %v3577_v44 = vadd.f32 %v9946_v43, %v3445_v60  ;;  %v3173_v43 = vadd.f32 %v10005_v54, %v3012_v40  ;;  %v11227_v60 = vld [vmem:[#allocation28_spill] sm:$0xff] }
 0x572   : > { %v4153_v6 = vpack.c.bf16 %v4140_v58, %v4140_v58  ;;  %v4065_v9 = vadd.f32 %v4033_v46, %v3999_v19  ;;  %v4098_v45 = vadd.f32 %v4076_v56, %v4033_v46  ;;  %v7992_v56 = vld [vmem:[%s11151_s10 + $0x80] sm:$0xff] }
 0x573   : > { %v3982_v7 = vadd.f32 %v9996_v47, %v3850_v23  ;;  %4632 = vmatpush.bf16.msra.mxu2 %v7992_v56  ;;  %v3306_v2 = vadd.f32 %v11225_v63, %v3173_v43 }
 0x574   : > { %v4111_v29 = vmul.f32 0.25, %v4098_v45  ;;  %v4192_v39 = vunpack.c.l.b16 %v4153_v6 }
 0x575   : > { %v4001_v26 = vadd.f32 %v10078_v4, %v3982_v7  ;;  %v11228_v7 = vld [vmem:[#allocation21_spill] sm:$0xff] }
 0x576   : > { %v3681_v32 = vpop.f32.mrf.mxu3  ;;  %v10161_v13 = vpack.c.b16 %v4192_v39, %v4191_v49  ;;  %v4124_v19 = vmax.f32 %v4111_v29, 0.0 }
 0x577   : > { %v4034_v36 = vrot.slane %v4001_v26, 1  ;;  %v4078_v47 = vadd.f32 %v4065_v9, %v4001_v26  ;;  %v3710_v16 = vadd.f32 %v3681_v32, %v3577_v44  ;;  %v11229_v44 = vld [vmem:[#allocation16_spill] sm:$0xff] }
 0x578   : > { %7227 = vmatmul.msk.bf16.vlgmr.msrb.gmra.mxu3 %vm1291_vm4, %v10161_v13  ;;  %v4141_v11 = vmul.f32 %v10138_v62, %v4124_v19  ;;  %v4208_v46 = vshll.u32 %v10161_v13, 16 }
 0x579   : > { %v3851_v59 = vadd.f32 %v11224_v42, %v3710_v16  ;;  %v4035_v17 = vsel %vm860_vm3, %v4032_v41, %v4034_v36  ;;  %v4206_v16 = vshrl.u32 %v10161_v13, 16 }
 0x57a   : > { %v4066_v24 = vadd.f32 %v4035_v17, %v4000_v14  ;;  %v4099_v8 = vadd.f32 %v4077_v15, %v4035_v17  ;;  %v4154_v14 = vpack.c.bf16 %v4141_v11, %v4141_v11  ;;  %v11226_v15 = vld [vmem:[#allocation17_spill] sm:$0xff]  ;;  %v4210_v39 = vrot.slane %v4208_v46, 1 }
 0x57b   : > { %v3983_v48 = vadd.f32 %v10007_v38, %v3851_v59  ;;  %v3447_v61 = vadd.f32 %v11226_v15, %v3306_v2  ;;  %v11231_v59 = vld [vmem:[#allocation24_spill] sm:$0xff]  ;;  %v11233_v15 = vld [vmem:[#allocation25_spill] sm:$0xff] }
 0x57c   : > { %v4112_v33 = vmul.f32 0.25, %v4099_v8  ;;  %v4193_v45 = vunpack.c.l.b16 %v4154_v14 }
 0x57d   : > { %v4002_v54 = vadd.f32 %v10078_v4, %v3983_v48  ;;  %v3579_v49 = vadd.f32 %v11228_v7, %v3447_v61 }
 0x57e   : > { %v3684_v34 = vpop.f32.mrf.mxu3  ;;  %v4125_v0 = vmax.f32 %v4112_v33, 0.0  ;;  %v4211_v33 = vor.u32 %v4210_v39, %v4206_v16  ;;  %v7999_v16 = vld [vmem:[%s11151_s10 + $0xb8] sm:$0xff] }
 0x57f   : > { %v4036_v28 = vrot.slane %v4002_v54, 1  ;;  %v4079_v27 = vadd.f32 %v4066_v24, %v4002_v54  ;;  %v3711_v31 = vadd.f32 %v3684_v34, %v10003_v18  ;;  %v4392_v24 = vrot.slane %v10161_v13, 1  ;;  %4717 = vmatpush.bf16.msra.mxu3 %v7999_v16 }
 0x580   : > { %v4142_v22 = vmul.f32 %v10138_v62, %v4125_v0 }
 0x581   : > { %v3852_v41 = vadd.f32 %v9981_v20, %v3711_v31  ;;  %v4037_v38 = vsel %vm860_vm3, %v4034_v36, %v4036_v28  ;;  %v7986_v36 = vld [vmem:[%s11151_s10 + $0x50] sm:$0xff] }
 0x582   : > { %v4067_v3 = vadd.f32 %v4037_v38, %v4001_v26  ;;  %v4100_v58 = vadd.f32 %v4078_v47, %v4037_v38  ;;  %v4155_v23 = vpack.c.bf16 %v4142_v22, %v4142_v22  ;;  %v3017_v26 = vadd.f32 %v11230_v55, %v11229_v44  ;;  %4445 = vmatpush.bf16.msrb.mxu0 %v7986_v36  ;;  %v11236_v55 = vld [vmem:[#allocation10_spill] sm:$0xff] }
 0x583   : > { %v3984_v6 = vadd.f32 %v11227_v60, %v3852_v41 }
 0x584   : > { %v4113_v9 = vmul.f32 0.25, %v4100_v58  ;;  %v4194_v10 = vunpack.c.l.b16 %v4155_v23  ;;  %v3175_v42 = vadd.f32 %v10026_v5, %v3017_v26  ;;  %v11234_v58 = vld [vmem:[#allocation19_spill] sm:$0xff]  ;;  %v11237_v26 = vld [vmem:[#allocation14_spill] sm:$0xff] }
 0x585   : > { %v4003_v18 = vadd.f32 %v10078_v4, %v3984_v6 }
 0x586   : > { %v3686_v29 = vpop.f32.mrf.mxu3  ;;  %v10186_v20 = vpack.c.b16 %v4194_v10, %v4193_v45  ;;  %v4126_v47 = vmax.f32 %v4113_v9, 0.0 }
 0x587   : > { %v4038_v32 = vrot.slane %v4003_v18, 1  ;;  %v4080_v53 = vadd.f32 %v4067_v3, %v4003_v18  ;;  %v3712_v40 = vadd.f32 %v3686_v29, %v3579_v49 }
 0x588   : > { %7228 = vmatmul.msk.bf16.gmra.mxu3 %vm1291_vm4, %v10186_v20  ;;  %7285 = vmatmul.msk.bf16.vlgmr.msrb.gmra.mxu1 %vm1291_vm4, %v10186_v20  ;;  %v4213_v19 = vshll.u32 %v10186_v20, 16  ;;  %v4393_v43 = vrot.slane %v10186_v20, 1  ;;  %v4143_v5 = vmul.f32 %v10138_v62, %v4126_v47 }
 0x589   : > { %v3853_v17 = vadd.f32 %v11231_v59, %v3712_v40  ;;  %v4039_v56 = vsel %vm860_vm3, %v4036_v28, %v4038_v32  ;;  %v11232_v28 = vld [vmem:[#allocation15_spill] sm:$0xff] }
 0x58a   : > { %v4068_v8 = vadd.f32 %v4039_v56, %v4002_v54  ;;  %v4101_v48 = vadd.f32 %v4079_v27, %v4039_v56  ;;  %v4215_v11 = vrot.slane %v4213_v19, 1  ;;  %v10208_v2 = vsel %vm860_vm3, %v4392_v24, %v4393_v43 }
 0x58b   : > { %v3985_v63 = vadd.f32 %v10028_v35, %v3853_v17  ;;  %v3308_v31 = vadd.f32 %v11232_v28, %v3175_v42  ;;  %v4156_v41 = vpack.c.bf16 %v4143_v5, %v4143_v5  ;;  %v11238_v42 = vld [vmem:[#allocation27_spill] sm:$0xff] }
 0x58c   : > { %v4114_v34 = vmul.f32 0.25, %v4101_v48  ;;  %v4216_v0 = vsel %vm1179_vm5, %v4211_v33, %v4215_v11 }
 0x58d   : > { %v4004_v13 = vadd.f32 %v10078_v4, %v3985_v63  ;;  %7206 = vmatmul.msk.bf16.vlgmr.msra.gmra.mxu0 %vm1291_vm4, %v4216_v0  ;;  %v3449_v23 = vadd.f32 %v11234_v58, %v3308_v31  ;;  %v4195_v45 = vunpack.c.l.b16 %v4156_v41  ;;  %v11239_v0 = vld [vmem:[#allocation18_spill] sm:$0xff]  ;;  %v11240_v41 = vld [vmem:[#allocation29_spill] sm:$0xff] }
 0x58e   : > { %v4127_v54 = vmax.f32 %v4114_v34, 0.0  ;;  %v3689_v27 = vpop.f32.mrf.mxu3 }
 0x58f   : > { %v4040_v22 = vrot.slane %v4004_v13, 1  ;;  %v4081_v35 = vadd.f32 %v4068_v8, %v4004_v13  ;;  %v3713_v14 = vadd.f32 %v3689_v27, %v10024_v30  ;;  %v11235_v30 = vld [vmem:[#allocation23_spill] sm:$0xff] }
 0x590   : > { %v4144_v38 = vmul.f32 %v10138_v62, %v4127_v54  ;;  %v3581_v29 = vadd.f32 %v11235_v30, %v3449_v23 }
 0x591   : > { %v3854_v61 = vadd.f32 %v11233_v15, %v3713_v14  ;;  %v4041_v3 = vsel %vm860_vm3, %v4038_v32, %v4040_v22  ;;  %v3022_v32 = vadd.f32 %v11237_v26, %v11236_v55  ;;  %v7997_v14 = vld [vmem:[%s11151_s10 + $0xa8] sm:$0xff] }
 0x592   : > { %v4157_v46 = vpack.c.bf16 %v4144_v38, %v4144_v38  ;;  %v4069_v60 = vadd.f32 %v4041_v3, %v4003_v18  ;;  %v4102_v6 = vadd.f32 %v4080_v53, %v4041_v3 }
 0x593   : > { %v3986_v9 = vadd.f32 %v10033_v12, %v3854_v61  ;;  %v4217_v12 = vshrl.u32 %v10186_v20, 16  ;;  %v3177_v19 = vadd.f32 %v10042_v37, %v3022_v32  ;;  %v7998_v37 = vld [vmem:[%s11151_s10 + $0xb0] sm:$0xff] }
 0x594   : > { %v4115_v10 = vmul.f32 0.25, %v4102_v6  ;;  %v4196_v7 = vunpack.c.l.b16 %v4157_v46  ;;  %4718 = vmatpush.bf16.msra.mxu3 %v7998_v37  ;;  %v11241_v61 = vld [vmem:[#allocation20_spill] sm:$0xff] }
 0x595   : > { %v4005_v49 = vadd.f32 %v10078_v4, %v3986_v9  ;;  %v4219_v8 = vor.u32 %v4217_v12, %v4215_v11  ;;  %v3310_v28 = vadd.f32 %v11239_v0, %v3177_v19  ;;  %v8007_v12 = vld [vmem:[%s11151_s10 + $0xf8] sm:$0xff]  ;;  %v8006_v37 = vld [vmem:[%s11151_s10 + $0xf0] sm:$0xff] }
 0x596   : > { %v3691_v39 = vpop.f32.mrf.mxu3  ;;  %v10223_v44 = vpack.c.b16 %v4196_v7, %v4195_v45  ;;  %v4128_v18 = vmax.f32 %v4115_v10, 0.0  ;;  %v7996_v45 = vld [vmem:[%s11151_s10 + $0xa0] sm:$0xff]  ;;  %4902 = vmatpush.bf16.msra.mxu1 %v8007_v12 }
 0x597   : > { %v4042_v40 = vrot.slane %v4005_v49, 1  ;;  %v4082_v36 = vadd.f32 %v4069_v60, %v4005_v49  ;;  %v3714_v47 = vadd.f32 %v3691_v39, %v3581_v29  ;;  %v3451_v3 = vadd.f32 %v11241_v61, %v3310_v28  ;;  %v11242_v7 = vld [vmem:[#allocation26_spill] sm:$0xff] }
 0x598   : > { %7229 = vmatmul.msk.bf16.gmra.mxu3 %vm1291_vm4, %v10223_v44  ;;  %7286 = vmatmul.msk.bf16.gmra.mxu1 %vm1291_vm4, %v10223_v44  ;;  %v4221_v53 = vshll.u32 %v10223_v44, 16  ;;  %v4145_v63 = vmul.f32 %v10138_v62, %v4128_v18  ;;  %v7985_v29 = vld [vmem:[%s11151_s10 + $0x48] sm:$0xff]  ;;  %v7984_v18 = vld [vmem:[%s11151_s10 + $0x40] sm:$0xff] }
 0x599   : > { %v3855_v59 = vadd.f32 %v11238_v42, %v3714_v47  ;;  %v4043_v17 = vsel %vm860_vm3, %v4040_v22, %v4042_v40  ;;  %4719 = vmatpush.bf16.msra.mxu3 %v7997_v14  ;;  %v3583_v30 = vadd.f32 %v11242_v7, %v3451_v3  ;;  %4446 = vmatpush.bf16.msrb.mxu0 %v7985_v29  ;;  %v8005_v28 = vld [vmem:[%s11151_s10 + $0xe8] sm:$0xff] }
 0x59a   : > { %v4070_v56 = vadd.f32 %v4043_v17, %v4004_v13  ;;  %v4103_v24 = vadd.f32 %v4081_v35, %v4043_v17  ;;  %v4223_v48 = vrot.slane %v4221_v53, 1  ;;  %v4158_v22 = vpack.c.bf16 %v4145_v63, %v4145_v63  ;;  %v11243_v53 = vld [vmem:[#allocation30_spill] sm:$0xff]  ;;  %4903 = vmatpush.bf16.msra.mxu1 %v8006_v37 }
 0x59b   : > { %v3987_v33 = vadd.f32 %v10044_v25, %v3855_v59 }
 0x59c   : > { %v4116_v5 = vmul.f32 0.25, %v4103_v24  ;;  %v4224_v34 = vsel %vm1179_vm5, %v4219_v8, %v4223_v48 }
 0x59d   : > { %v4006_v31 = vadd.f32 %v10078_v4, %v3987_v33  ;;  %7207 = vmatmul.msk.bf16.gmra.mxu0 %vm1291_vm4, %v4224_v34  ;;  %7314 = vmatmul.msk.bf16.vlgmr.msra.gmra.mxu2 %vm1291_vm4, %v4224_v34 }
 0x59e   : > { %v4129_v11 = vmax.f32 %v4116_v5, 0.0  ;;  %v3694_v13 = vpop.f32.mrf.mxu3  ;;  %4720 = vmatpush.bf16.msra.mxu3 %v7996_v45  ;;  %4447 = vmatpush.bf16.msrb.mxu0 %v7984_v18  ;;  %v8009_v18 = vld [vmem:[%s11151_s10 + $0x108] sm:$0xff] }
 0x59f   : > { %v4044_v25 = vrot.slane %v4006_v31, 1  ;;  %v4083_v54 = vadd.f32 %v4070_v56, %v4006_v31  ;;  %v3715_v27 = vadd.f32 %v3694_v13, %v10040_v52  ;;  %v4197_v52 = vunpack.c.l.b16 %v4158_v22  ;;  %4904 = vmatpush.bf16.msra.mxu1 %v8005_v28 }
 0x5a0   : > { %v4146_v35 = vmul.f32 %v10138_v62, %v4129_v11 }
 0x5a1   : > { %v3856_v38 = vadd.f32 %v11240_v41, %v3715_v27  ;;  %v4045_v15 = vsel %vm860_vm3, %v4042_v40, %v4044_v25  ;;  %v4225_v40 = vshrl.u32 %v10223_v44, 16  ;;  %v8004_v41 = vld [vmem:[%s11151_s10 + $0xe0] sm:$0xff] }
 0x5a2   : > { %v4159_v58 = vpack.c.bf16 %v4146_v35, %v4146_v35  ;;  %v4071_v23 = vadd.f32 %v4045_v15, %v4005_v49  ;;  %v4104_v46 = vadd.f32 %v4082_v36, %v4045_v15 }
 0x5a3   : > { %v3988_v60 = vadd.f32 %v10048_v21, %v3856_v38  ;;  %v4227_v42 = vor.u32 %v4225_v40, %v4223_v48  ;;  %4905 = vmatpush.bf16.msra.mxu1 %v8004_v41  ;;  %v8003_v40 = vld [vmem:[%s11151_s10 + $0xd8] sm:$0xff] }
 0x5a4   : > { %v4198_v6 = vunpack.c.l.b16 %v4159_v58  ;;  %v4117_v9 = vmul.f32 0.25, %v4104_v46  ;;  %4804 = vmatpush.bf16.msra.mxu0 %v8003_v40 }
 0x5a5   : > { %v4007_v10 = vadd.f32 %v10078_v4, %v3988_v60 }
 0x5a6   : > { %v3696_v49 = vpop.f32.mrf.mxu3  ;;  %v10266_v39 = vpack.c.b16 %v4198_v6, %v4197_v52  ;;  %v4130_v55 = vmax.f32 %v4117_v9, 0.0  ;;  %v8011_v9 = vld [vmem:[%s11151_s10 + $0x118] sm:$0xff] }
 0x5a7   : > { %v4046_v21 = vrot.slane %v4007_v10, 1  ;;  %v4084_v26 = vadd.f32 %v4071_v23, %v4007_v10  ;;  %v3716_v32 = vadd.f32 %v3696_v49, %v3583_v30  ;;  %4990 = vmatpush.bf16.msrb.mxu2 %v8011_v9 }
 0x5a8   : > { %7230 = vmatmul.msk.bf16.gmra.mxu3 %vm1291_vm4, %v10266_v39  ;;  %7287 = vmatmul.msk.bf16.gmra.mxu1 %vm1291_vm4, %v10266_v39  ;;  %v4229_v36 = vshll.u32 %v10266_v39, 16  ;;  %v4147_v47 = vmul.f32 %v10138_v62, %v4130_v55 }
 0x5a9   : > { %v3857_v16 = vadd.f32 %v11243_v53, %v3716_v32  ;;  %v4047_v19 = vsel %vm860_vm3, %v4044_v25, %v4046_v21  ;;  %v4073_v59 = vadd.f32 %v4046_v21, %v4007_v10 }
 0x5aa   : > { %v4072_v17 = vadd.f32 %v4047_v19, %v4006_v31  ;;  %v4105_v56 = vadd.f32 %v4083_v54, %v4047_v19  ;;  %v4231_v24 = vrot.slane %v4229_v36, 1  ;;  %v4160_v8 = vpack.c.bf16 %v4147_v47, %v4147_v47  ;;  %v8010_v36 = vld [vmem:[%s11151_s10 + $0x110] sm:$0xff] }
 0x5ab   : > { %v3989_v33 = vadd.f32 %v10058_v51, %v3857_v16  ;;  %4991 = vmatpush.bf16.msrb.mxu2 %v8010_v36  ;;  %v4395_v19 = vrot.slane %v10223_v44, 1 }
 0x5ac   : > { %v4118_v63 = vmul.f32 0.25, %v4105_v56  ;;  %v10285_v5 = vsel %vm1179_vm5, %v4227_v42, %v4231_v24  ;;  %v4199_v34 = vunpack.c.l.b16 %v4160_v8 }
 0x5ad   : > { %v4008_v48 = vadd.f32 %v10078_v4, %v3989_v33  ;;  %7208 = vmatmul.msk.bf16.gmra.mxu0 %vm1291_vm4, %v10285_v5  ;;  %7315 = vmatmul.msk.bf16.gmra.mxu2 %vm1291_vm4, %v10285_v5  ;;  %v4396_v56 = vsel %vm860_vm3, %v4393_v43, %v4395_v19  ;;  %v8008_v33 = vld [vmem:[%s11151_s10 + $0x100] sm:$0xff]  ;;  %v8002_v43 = vld [vmem:[%s11151_s10 + $0xd0] sm:$0xff] }
 0x5ae   : > { %v4131_v0 = vmax.f32 %v4118_v63, 0.0  ;;  %v3699_v51 = vpop.f32.mrf.mxu3  ;;  %v10300_v54 = vpack.c.b16 %v4199_v34, %v4199_v34  ;;  %4805 = vmatpush.bf16.msra.mxu0 %v8002_v43 }
 0x5af   : > { %v4085_v31 = vadd.f32 %v4072_v17, %v4008_v48  ;;  %v4089_v11 = vrot.slane %v4008_v48, 1  ;;  %v3717_v13 = vadd.f32 %v3699_v51, %v10056_v1  ;;  %4992 = vmatpush.bf16.msrb.mxu2 %v8009_v18  ;;  %v4397_v48 = vrot.slane %v10266_v39, 1 }
 0x5b0   : > { %v4148_v25 = vmul.f32 %v10138_v62, %v4131_v0  ;;  %v4237_v1 = vshll.u32 %v10300_v54, 16  ;;  %v4241_v63 = vshrl.u32 %v10300_v54, 16 }
 0x5b1   : > { %v4090_v27 = vsel %vm860_vm3, %v4046_v21, %v4089_v11  ;;  %v3858_v22 = vadd.f32 %v10037_v50, %v3717_v13  ;;  %v4398_v0 = vsel %vm860_vm3, %v4395_v19, %v4397_v48 }
 0x5b2   : > { %v4161_v35 = vpack.c.bf16 %v4148_v25, %v4148_v25  ;;  %v4106_v14 = vadd.f32 %v4090_v27, %v4084_v26  ;;  %v4239_v52 = vrot.slane %v4237_v1, 1 }
 0x5b3   : > { %v3990_v38 = vadd.f32 %v10065_v57, %v3858_v22  ;;  %v4233_v57 = vshrl.u32 %v10266_v39, 16  ;;  %4993 = vmatpush.bf16.msrb.mxu2 %v8008_v33 }
 0x5b4   : > { %v4493_v15 = vunpack.c.l.b16 %v4161_v35  ;;  %v4119_v61 = vmul.f32 0.25, %v4106_v14  ;;  %v4243_v37 = vor.u32 %v4241_v63, %v4239_v52 }
 0x5b5   : > { %v4009_v3 = vadd.f32 %v10078_v4, %v3990_v38  ;;  %v4235_v30 = vor.u32 %v4233_v57, %v4231_v24 }
 0x5b6   : > { %v3701_v58 = vpop.f32.mrf.mxu3  ;;  %v10310_v23 = vpack.c.b16 %v4493_v15, %v4199_v34  ;;  %v4132_v46 = vmax.f32 %v4119_v61, 0.0  ;;  %v8000_v15 = vld [vmem:[%s11151_s10 + $0xc0] sm:$0xff] }
 0x5b7   : > { %v4086_v50 = vadd.f32 %v4073_v59, %v4009_v3  ;;  %v4091_v60 = vrot.slane %v4009_v3, 1  ;;  %v4240_v21 = vsel %vm1179_vm5, %v4235_v30, %v4239_v52 }
 0x5b8   : > { %7231 = vmatmul.msk.bf16.gmra.mxu3 %vm1291_vm4, %v10300_v54  ;;  %7288 = vmatmul.msk.bf16.gmra.mxu1 %vm1291_vm4, %v10310_v23  ;;  %v4578_v6 = vshll.u32 %v10310_v23, 16  ;;  %v4149_v4 = vmul.f32 %v10138_v62, %v4132_v46  ;;  %v4582_v24 = vshrl.u32 %v10310_v23, 16 }
 0x5b9   : > { %v4092_v45 = vsel %vm860_vm3, %v4089_v11, %v4091_v60  ;;  %v4108_v10 = vadd.f32 %v4091_v60, %v4086_v50  ;;  %v8001_v11 = vld [vmem:[%s11151_s10 + $0xc8] sm:$0xff] }
 0x5ba   : > { %v4107_v7 = vadd.f32 %v4092_v45, %v4085_v31  ;;  %v4580_v29 = vrot.slane %v4578_v6, 1  ;;  %v4162_v49 = vpack.c.bf16 %v4149_v4, %v4149_v4  ;;  %v4676_v31 = vrot.slane %v10310_v23, 1  ;;  %4806 = vmatpush.bf16.msra.mxu0 %v8001_v11 }
 0x5bb   : > { %v4399_v6 = vrot.slane %v10300_v54, 1 }
 0x5bc   : > { %v4120_v55 = vmul.f32 0.25, %v4107_v7  ;;  %v4581_v26 = vsel %vm1179_vm5, %v4235_v30, %v4580_v29  ;;  %v4494_v32 = vunpack.c.l.b16 %v4162_v49  ;;  %v4584_v34 = vor.u32 %v4582_v24, %v4580_v29 }
 0x5bd   : > { %7209 = vmatmul.msk.bf16.gmra.mxu0 %vm1291_vm4, %v4240_v21  ;;  %7316 = vmatmul.msk.bf16.gmra.mxu2 %vm1291_vm4, %v4581_v26  ;;  %v4677_v13 = vsel %vm860_vm3, %v4397_v48, %v4676_v31  ;;  %v4400_v7 = vsel %vm860_vm3, %v4397_v48, %v4399_v6 }
 0x5be   : > { %v4133_v47 = vmax.f32 %v4120_v55, 0.0  ;;  %v10337_v53 = vpack.c.b16 %v4494_v32, %v4494_v32  ;;  %4807 = vmatpush.bf16.msra.mxu0 %v8000_v15 }
 0x5c0   : > { %v4150_v12 = vmul.f32 %v10138_v62, %v4133_v47  ;;  %v4585_v59 = vshll.u32 %v10337_v53, 16  ;;  %v4589_v51 = vshrl.u32 %v10337_v53, 16  ;;  %v4678_v22 = vrot.slane %v10337_v53, 1 }
 0x5c2   : > { %v4163_v16 = vpack.c.bf16 %v4150_v12, %v4150_v12  ;;  %v4587_v8 = vrot.slane %v4585_v59, 1  ;;  %v4679_v41 = vsel %vm860_vm3, %v4676_v31, %v4678_v22 }
 0x5c4   : > { %v4766_v42 = vunpack.c.l.b16 %v4163_v16  ;;  %v4588_v20 = vsel %vm1179_vm5, %v4584_v34, %v4587_v8  ;;  %v4591_v28 = vor.u32 %v4589_v51, %v4587_v8 }
 0x5c6   : > { %v10341_v17 = vpack.c.b16 %v4766_v42, %v4494_v32 }
 0x5c8   : > { %7289 = vmatmul.msk.bf16.gmra.mxu1 %vm1291_vm4, %v10337_v53  ;;  %7343 = vmatmul.msk.bf16.vlgmr.msra.gmra.mxu3 %vm1291_vm4, %v4396_v56  ;;  %v4855_v3 = vshrl.u32 %v10341_v17, 16  ;;  %v4949_v4 = vrot.slane %v10341_v17, 1 }
 0x5ca   : > { %v4950_v30 = vsel %vm860_vm3, %v4676_v31, %v4949_v4 }
 0x5cd   : > { %7210 = vmatmul.msk.bf16.gmra.mxu0 %vm1291_vm4, %v4243_v37  ;;  %7317 = vmatmul.msk.bf16.gmra.mxu2 %vm1291_vm4, %v4588_v20 }
 0x5d8   : > { %7344 = vmatmul.msk.bf16.gmra.mxu3 %vm1291_vm4, %v4398_v0  ;;  %7401 = vmatmul.msk.bf16.vlgmr.msra.gmra.mxu1 %vm1291_vm4, %v10285_v5  ;;  %v4121_v5 = vmul.f32 0.25, %v4108_v10 }
 0x5da   : > { %v4134_v25 = vmax.f32 %v4121_v5, 0.0 }
 0x5dc   : > { %v4151_v27 = vmul.f32 %v10138_v62, %v4134_v25 }
 0x5dd   : > { %7256 = vmatmul.msk.bf16.vlgmr.msrb.gmra.mxu0 %vm1291_vm4, %v10208_v2  ;;  %7318 = vmatmul.msk.bf16.gmra.mxu2 %vm1291_vm4, %v4591_v28  ;;  %v4851_v2 = vshll.u32 %v10341_v17, 16 }
 0x5de   : > { %v4164_v14 = vpack.c.bf16 %v4151_v27, %v4151_v27 }
 0x5df   : > { %v4853_v35 = vrot.slane %v4851_v2, 1 }
 0x5e0   : > { %v4767_v1 = vunpack.c.l.b16 %v4164_v14 }
 0x5e1   : > { %v4854_v38 = vsel %vm1179_vm5, %v4584_v34, %v4853_v35  ;;  %v4857_v50 = vor.u32 %v4855_v3, %v4853_v35 }
 0x5e2   : > { %v10388_v62 = vpack.c.b16 %v4767_v1, %v4767_v1 }
 0x5e4   : > { %v4858_v58 = vshll.u32 %v10388_v62, 16  ;;  %v4862_v54 = vshrl.u32 %v10388_v62, 16  ;;  %v4951_v32 = vrot.slane %v10388_v62, 1 }
 0x5e6   : > { %v4860_v57 = vrot.slane %v4858_v58, 1  ;;  %v4952_v18 = vsel %vm860_vm3, %v4949_v4, %v4951_v32 }
 0x5e8   : > { %7345 = vmatmul.msk.bf16.gmra.mxu3 %vm1291_vm4, %v4677_v13  ;;  %7402 = vmatmul.msk.bf16.gmra.mxu1 %vm1291_vm4, %v4581_v26  ;;  %v4861_v52 = vsel %vm1179_vm5, %v4857_v50, %v4860_v57  ;;  %v4864_v26 = vor.u32 %v4862_v54, %v4860_v57 }
 0x5ed   : > { %7257 = vmatmul.msk.bf16.gmra.mxu0 %vm1291_vm4, %v4396_v56  ;;  %7430 = vmatmul.msk.bf16.vlgmr.msrb.gmra.mxu2 %vm1291_vm4, %v4398_v0 }
 0x5f8   : > { %7346 = vmatmul.msk.bf16.gmra.mxu3 %vm1291_vm4, %v4679_v41  ;;  %7403 = vmatmul.msk.bf16.gmra.mxu1 %vm1291_vm4, %v4854_v38 }
 0x5fb   : > { %v4359_v61 = vpop.f32.mrf.mxu3 }
 0x5fd   : > { %7258 = vmatmul.msk.bf16.gmra.mxu0 %vm1291_vm4, %v4398_v0  ;;  %7431 = vmatmul.msk.bf16.gmra.mxu2 %vm1291_vm4, %v4677_v13 }
 0x603   : > { %v10394_v46 = vpop.f32.mrf.mxu3 }
 0x605   : > { %v10396_v60 = vpop.f32.mrf.mxu1 }
 0x608   : > { %7347 = vmatmul.msk.bf16.gmra.mxu3 %vm1291_vm4, %v4678_v22  ;;  %7404 = vmatmul.msk.bf16.gmra.mxu1 %vm1291_vm4, %v4861_v52 }
 0x60a   : > { %v4292_v9 = vpop.f32.mrf.mxu0 }
 0x60b   : > { %v4360_v45 = vadd.f32 %v4359_v61, %v4292_v9  ;;  %v4364_v10 = vpop.f32.mrf.mxu3  ;;  %v7445_v9 = vld [vmem:[%s11153_s12 + $0x10] sm:$0xf] }
 0x60d   : > { %7259 = vmatmul.msk.bf16.gmra.mxu0 %vm1291_vm4, %v4400_v7  ;;  %v10406_v29 = vpop.f32.mrf.mxu1  ;;  %7432 = vmatmul.msk.bf16.gmra.mxu2 %vm1291_vm4, %v4950_v30 }
 0x612   : > { %v10409_v49 = vpop.f32.mrf.mxu0 }
 0x613   : > { %v10411_v55 = vpop.f32.mrf.mxu3 }
 0x615   : > { %v10414_v21 = vpop.f32.mrf.mxu1 }
 0x618   : > { %7405 = vmatmul.msk.bf16.gmra.mxu1 %vm1291_vm4, %v4864_v26 }
 0x61a   : > { %v4297_v40 = vpop.f32.mrf.mxu0 }
 0x61b   : > { %v4365_v36 = vadd.f32 %v4364_v10, %v4297_v40  ;;  %v4369_v47 = vpop.f32.mrf.mxu3 }
 0x61d   : > { %7260 = vmatmul.msk.bf16.gmra.mxu0 %vm1291_vm4, %v4399_v6  ;;  %v10420_v12 = vpop.f32.mrf.mxu1  ;;  %7433 = vmatmul.msk.bf16.gmra.mxu2 %vm1291_vm4, %v4952_v18 }
 0x620   : > { %v4634_v53 = vpop.f32.mrf.mxu2 }
 0x622   : > { %v10423_v16 = vpop.f32.mrf.mxu0 }
 0x623   : > { %v10425_v19 = vpop.f32.mrf.mxu3 }
 0x625   : > { %v10427_v42 = vpop.f32.mrf.mxu1 }
 0x628   : > { %v10429_v59 = vpop.f32.mrf.mxu2 }
 0x62a   : > { %v4302_v56 = vpop.f32.mrf.mxu0 }
 0x62b   : > { %v4370_v24 = vadd.f32 %v4369_v47, %v4302_v56  ;;  %v4374_v8 = vpop.f32.mrf.mxu3 }
 0x62d   : > { %v10431_v33 = vpop.f32.mrf.mxu1  ;;  %7372 = vmatmul.msk.bf16.vlgmr.msra.gmra.mxu0 %vm1291_vm4, %v10223_v44  ;;  %7434 = vmatmul.msk.bf16.gmra.mxu2 %vm1291_vm4, %v4951_v32 }
 0x630   : > { %v4639_v63 = vpop.f32.mrf.mxu2 }
 0x632   : > { %v10436_v34 = vpop.f32.mrf.mxu0 }
 0x633   : > { %v10438_v37 = vpop.f32.mrf.mxu3 }
 0x635   : > { %v10440_v20 = vpop.f32.mrf.mxu1 }
 0x638   : > { %v10442_v43 = vpop.f32.mrf.mxu2 }
 0x63a   : > { %v4307_v48 = vpop.f32.mrf.mxu0 }
 0x63b   : > { %v4375_v0 = vadd.f32 %v4374_v8, %v4307_v48  ;;  %v4379_v51 = vpop.f32.mrf.mxu3 }
 0x63d   : > { %v10444_v28 = vpop.f32.mrf.mxu1  ;;  %7373 = vmatmul.msk.bf16.gmra.mxu0 %vm1291_vm4, %v10266_v39 }
 0x640   : > { %v4644_v44 = vpop.f32.mrf.mxu2 }
 0x642   : > { %v10448_v31 = vpop.f32.mrf.mxu0 }
 0x643   : > { %v4381_v11 = vpop.f32.mrf.mxu3 }
 0x645   : > { %v10450_v13 = vpop.f32.mrf.mxu1 }
 0x648   : > { %v10452_v5 = vpop.f32.mrf.mxu2 }
 0x64a   : > { %v4312_v25 = vpop.f32.mrf.mxu0 }
 0x64b   : > { %v10454_v2 = vadd.f32 %v4379_v51, %v4312_v25  ;;  %v4722_v27 = vpop.f32.mrf.mxu3 }
 0x64d   : > { %v4558_v22 = vpop.f32.mrf.mxu1  ;;  %7374 = vmatmul.msk.bf16.gmra.mxu0 %vm1291_vm4, %v10310_v23 }
 0x650   : > { %v4649_v35 = vpop.f32.mrf.mxu2 }
 0x652   : > { %v4314_v14 = vpop.f32.mrf.mxu0 }
 0x653   : > { %v10458_v41 = vpop.f32.mrf.mxu3 }
 0x655   : > { %v10460_v39 = vpop.f32.mrf.mxu1 }
 0x658   : > { %v10462_v38 = vpop.f32.mrf.mxu2 }
 0x65a   : > { %v4449_v15 = vpop.f32.mrf.mxu0 }
 0x65b   : > { %v4473_v1 = vadd.f32 %v4449_v15, %v4360_v45  ;;  %v4727_v61 = vpop.f32.mrf.mxu3 }
 0x65d   : > { %v4560_v3 = vadd.f32 %v10396_v60, %v4473_v1  ;;  %7375 = vmatmul.msk.bf16.gmra.mxu0 %vm1291_vm4, %v10341_v17  ;;  %v10467_v58 = vpop.f32.mrf.mxu1  ;;  %v8015_v60 = vld [vmem:[%s11153_s12 + $0x14] sm:$0xf0] }
 0x65e   : > { %v7446_v17 = vor.u32 %v8015_v60, %v7445_v9 }
 0x65f   : > { %v4658_v50 = vadd.f32 %v4634_v53, %v4560_v3 }
 0x660   : > { %v4654_v23 = vpop.f32.mrf.mxu2  ;;  %5128 = vmatpush.bf16.msrb.mxu3 %v7446_v17 }
 0x661   : > { %v10469_v57 = vadd.f32 %v4722_v27, %v4658_v50 }
 0x662   : > { %v4451_v52 = vpop.f32.mrf.mxu0 }
 0x663   : > { %v10471_v6 = vpop.f32.mrf.mxu3 }
 0x665   : > { %v10473_v4 = vpop.f32.mrf.mxu1 }
 0x668   : > { %v4656_v45 = vpop.f32.mrf.mxu2 }
 0x669   : > { %v7437_v45 = vld [vmem:[%s11153_s12] sm:$0xf] }
 0x66a   : > { %v4454_v10 = vpop.f32.mrf.mxu0 }
 0x66b   : > { %v4475_v7 = vadd.f32 %v4454_v10, %v4365_v36  ;;  %v4732_v30 = vpop.f32.mrf.mxu3 }
 0x66d   : > { %v4562_v54 = vadd.f32 %v10414_v21, %v4475_v7  ;;  %7376 = vmatmul.msk.bf16.gmra.mxu0 %vm1291_vm4, %v10388_v62  ;;  %v10484_v26 = vpop.f32.mrf.mxu1 }
 0x66f   : > { %v4660_v32 = vadd.f32 %v4639_v63, %v4562_v54 }
 0x670   : > { %v4995_v40 = vpop.f32.mrf.mxu2 }
 0x671   : > { %v10486_v47 = vadd.f32 %v4727_v61, %v4660_v32 }
 0x672   : > { %v4456_v18 = vpop.f32.mrf.mxu0 }
 0x673   : > { %v10488_v53 = vpop.f32.mrf.mxu3 }
 0x675   : > { %v10490_v56 = vpop.f32.mrf.mxu1 }
 0x678   : > { %v10492_v8 = vpop.f32.mrf.mxu2 }
 0x67a   : > { %v4459_v36 = vpop.f32.mrf.mxu0 }
 0x67b   : > { %v4477_v48 = vadd.f32 %v4459_v36, %v4370_v24  ;;  %v4737_v51 = vpop.f32.mrf.mxu3 }
 0x67d   : > { %v4564_v21 = vadd.f32 %v10427_v42, %v4477_v48  ;;  %v10495_v11 = vpop.f32.mrf.mxu1 }
 0x67f   : > { %v4662_v62 = vadd.f32 %v4644_v44, %v4564_v21 }
 0x680   : > { %v10497_v25 = vpop.f32.mrf.mxu2 }
 0x681   : > { %v10499_v63 = vadd.f32 %v4732_v30, %v4662_v62  ;;  %v4362_v62 = vadd.f32 %v10394_v46, %v10409_v49  ;;  %v4367_v46 = vadd.f32 %v10411_v55, %v10423_v16  ;;  %v8023_v55 = vld [vmem:[%s11153_s12 + $0x54] sm:$0xf0] }
 0x682   : > { %v10501_v27 = vpop.f32.mrf.mxu0 }
 0x683   : > { %v10503_v22 = vpop.f32.mrf.mxu3  ;;  %v4476_v16 = vadd.f32 %v4456_v18, %v4367_v46  ;;  %v8021_v18 = vld [vmem:[%s11153_s12 + $0x44] sm:$0xf0] }
 0x685   : > { %v10505_v14 = vpop.f32.mrf.mxu1 }
 0x688   : > { %v10507_v15 = vpop.f32.mrf.mxu2 }
 0x68a   : > { %v4464_v1 = vpop.f32.mrf.mxu0 }
 0x68b   : > { %v4479_v24 = vadd.f32 %v4464_v1, %v4375_v0  ;;  %v4742_v61 = vpop.f32.mrf.mxu3  ;;  %v8013_v0 = vld [vmem:[%s11153_s12 + $0x4] sm:$0xf0]  ;;  %v4474_v1 = vadd.f32 %v4451_v52, %v4362_v62 }
 0x68c   : > { %v7438_v10 = vor.u32 %v8013_v0, %v7437_v45 }
 0x68d   : > { %v4566_v42 = vadd.f32 %v10440_v20, %v4479_v24  ;;  %v10510_v3 = vpop.f32.mrf.mxu1 }
 0x68e   : > { %5129 = vmatpush.bf16.msrb.mxu3 %v7438_v10  ;;  %v8027_v10 = vld [vmem:[%s11153_s12 + $0x74] sm:$0xf0] }
 0x68f   : > { %v4664_v44 = vadd.f32 %v4649_v35, %v4566_v42  ;;  %v4561_v42 = vadd.f32 %v10406_v29, %v4474_v1  ;;  %v10550_v29 = vld [vmem:[%s11152_s11] ss:$0 sm:$0xff]  ;;  %v4563_v1 = vadd.f32 %v10420_v12, %v4476_v16 }
 0x690   : > { %v10512_v50 = vpop.f32.mrf.mxu2 }
 0x691   : > { %v10514_v9 = vadd.f32 %v4737_v51, %v4664_v44 }
 0x692   : > { %v10516_v60 = vpop.f32.mrf.mxu0 }
 0x693   : > { %v4744_v17 = vpop.f32.mrf.mxu3 }
 0x695   : > { %v10524_v20 = vpop.f32.mrf.mxu1 }
 0x698   : > { %v10526_v35 = vpop.f32.mrf.mxu2 }
 0x69a   : > { %v4469_v7 = vpop.f32.mrf.mxu0 }
 0x69b   : > { %v4481_v30 = vadd.f32 %v4469_v7, %v10454_v2 }
 0x69d   : > { %v4568_v54 = vadd.f32 %v10450_v13, %v4481_v30  ;;  %v4929_v32 = vpop.f32.mrf.mxu1 }
 0x69f   : > { %v4666_v36 = vadd.f32 %v4654_v23, %v4568_v54  ;;  %v4659_v23 = vadd.f32 %v10429_v59, %v4561_v42  ;;  %v7491_v59 = vld [vmem:[%s11153_s12 + $0x58] sm:$0xf0] }
 0x6a0   : > { %v10530_v48 = vpop.f32.mrf.mxu2 }
 0x6a1   : > { %v10532_v51 = vadd.f32 %v4742_v61, %v4666_v36  ;;  %v4747_v61 = vadd.f32 %v10458_v41, %v4659_v23  ;;  %v7489_v41 = vld [vmem:[%s11153_s12 + $0x50] sm:$0xf]  ;;  %v8020_v36 = vld [vmem:[%s11153_s12 + $0x44] sm:$0xf] }
 0x6a2   : > { %v4471_v21 = vpop.f32.mrf.mxu0  ;;  %v7490_v7 = vor.u32 %v8023_v55, %v7489_v41 }
 0x6a4   : > { %5256 = vmatpush.bf16.msrb.mxu0 %v7490_v7  ;;  %v4372_v7 = vadd.f32 %v10425_v19, %v10436_v34  ;;  %v7535_v19 = vld [vmem:[%s11153_s12 + $0x98] sm:$0xf0] }
 0x6a6   : > { %v4478_v34 = vadd.f32 %v10501_v27, %v4372_v7  ;;  %v7525_v27 = vld [vmem:[%s11153_s12 + $0x80] sm:$0xf] }
 0x6a8   : > { %v10536_v24 = vpop.f32.mrf.mxu2 }
 0x6aa   : > { %v4809_v44 = vpop.f32.mrf.mxu0 }
 0x6ab   : > { %v4833_v2 = vadd.f32 %v4809_v44, %v10469_v57 }
 0x6ad   : > { %v4931_v13 = vadd.f32 %v10460_v39, %v4833_v2  ;;  %v8022_v39 = vld [vmem:[%s11153_s12 + $0x54] sm:$0xf]  ;;  %v7503_v2 = vld [vmem:[%s11153_s12 + $0x60] sm:$0xf] }
 0x6ae   : > { %v7494_v57 = vor.u32 %v8022_v39, %v7491_v59  ;;  %v4661_v39 = vadd.f32 %v10442_v43, %v4563_v1  ;;  %v8014_v59 = vld [vmem:[%s11153_s12 + $0x14] sm:$0xf]  ;;  %v8012_v43 = vld [vmem:[%s11153_s12 + $0x4] sm:$0xf] }
 0x6af   : > { %v5019_v17 = vadd.f32 %v4995_v40, %v4931_v13  ;;  %v7511_v40 = vld [vmem:[%s11153_s12 + $0x70] sm:$0xf]  ;;  %v8025_v13 = vld [vmem:[%s11153_s12 + $0x64] sm:$0xf0] }
 0x6b0   : > { %v10542_v45 = vpop.f32.mrf.mxu2  ;;  %v7512_v30 = vor.u32 %v8027_v10, %v7511_v40  ;;  %5269 = vmatpush.bf16.msrb.mxu1 %v7494_v57  ;;  %v7447_v57 = vld [vmem:[%s11153_s12 + $0x18] sm:$0xf0] }
 0x6b1   : > { %v5032_v54 = vadd.f32 %v10550_v29, %v5019_v17  ;;  %v7504_v17 = vor.u32 %v8025_v13, %v7503_v2  ;;  %v7450_v55 = vor.u32 %v8014_v59, %v7447_v57  ;;  %v7527_v2 = vld [vmem:[%s11153_s12 + $0x88] sm:$0xf0] }
 0x6b2   : > { %v4811_v0 = vpop.f32.mrf.mxu0  ;;  %5317 = vmatpush.bf16.msra.mxu2 %v7512_v30 }
 0x6b3   : > { %v4834_v49 = vadd.f32 %v4811_v0, %v4747_v61  ;;  %v5048_v61 = vrot.slane %v5032_v54, 1  ;;  %5141 = vmatpush.bf16.msra.mxu3 %v7450_v55 }
 0x6b5   : > { %v4932_v52 = vadd.f32 %v10467_v58, %v4834_v49  ;;  %v7481_v58 = vld [vmem:[%s11153_s12 + $0x40] sm:$0xf] }
 0x6b6   : > { %v7482_v62 = vor.u32 %v8021_v18, %v7481_v58  ;;  %5318 = vmatpush.bf16.msra.mxu2 %v7504_v17  ;;  %v8030_v58 = vld [vmem:[%s11153_s12 + $0x94] sm:$0xf]  ;;  %v7547_v17 = vld [vmem:[%s11153_s12 + $0xa0] sm:$0xf] }
 0x6b7   : > { %v5020_v32 = vadd.f32 %v10492_v8, %v4932_v52  ;;  %v7483_v8 = vld [vmem:[%s11153_s12 + $0x48] sm:$0xf0]  ;;  %v4749_v52 = vadd.f32 %v10471_v6, %v4661_v39  ;;  %v8031_v6 = vld [vmem:[%s11153_s12 + $0x94] sm:$0xf0] }
 0x6b8   : > { %v5017_v21 = vpop.f32.mrf.mxu2  ;;  %v7486_v44 = vor.u32 %v8020_v36, %v7483_v8  ;;  %5257 = vmatpush.bf16.msrb.mxu0 %v7482_v62  ;;  %v7538_v36 = vor.u32 %v8030_v58, %v7535_v19  ;;  %v8035_v62 = vld [vmem:[%s11153_s12 + $0xb4] sm:$0xf0] }
 0x6b9   : > { %v5033_v42 = vadd.f32 %v10550_v29, %v5020_v32  ;;  %v7555_v21 = vld [vmem:[%s11153_s12 + $0xb0] sm:$0xf] }
 0x6ba   : > { %v4814_v23 = vpop.f32.mrf.mxu0  ;;  %5270 = vmatpush.bf16.msrb.mxu1 %v7486_v44  ;;  %v7556_v8 = vor.u32 %v8035_v62, %v7555_v21  ;;  %v8043_v21 = vld [vmem:[%s11153_s12 + $0xf4] sm:$0xf0] }
 0x6bb   : > { %v5049_v0 = vrot.slane %v5033_v42, 1  ;;  %v4835_v46 = vadd.f32 %v4814_v23, %v10486_v47  ;;  %v8028_v42 = vld [vmem:[%s11153_s12 + $0x84] sm:$0xf] }
 0x6bc   : > { %5443 = vmatpush.bf16.msrb.mxu2 %v7556_v8  ;;  %v7530_v23 = vor.u32 %v8028_v42, %v7527_v2  ;;  %v7571_v2 = vld [vmem:[%s11153_s12 + $0xc8] sm:$0xf0] }
 0x6bd   : > { %v5050_v12 = vsel %vm860_vm3, %v5048_v61, %v5049_v0  ;;  %v4933_v49 = vadd.f32 %v10473_v4, %v4835_v46  ;;  %v7439_v4 = vld [vmem:[%s11153_s12 + $0x8] sm:$0xf0]  ;;  %v8033_v61 = vld [vmem:[%s11153_s12 + $0xa4] sm:$0xf0] }
 0x6be   : > { %v5062_v41 = vadd.f32 %v5050_v12, %v5032_v54  ;;  %v7442_v10 = vor.u32 %v8012_v43, %v7439_v4  ;;  %v7533_v54 = vld [vmem:[%s11153_s12 + $0x90] sm:$0xf]  ;;  %5390 = vmatpush.bf16.msra.mxu1 %v7538_v36  ;;  %v7548_v46 = vor.u32 %v8033_v61, %v7547_v17 }
 0x6bf   : > { %v5021_v47 = vadd.f32 %v10497_v25, %v4933_v49  ;;  %v7534_v32 = vor.u32 %v8031_v6, %v7533_v54  ;;  %v7467_v43 = vld [vmem:[%s11153_s12 + $0x30] sm:$0xf]  ;;  %v7459_v54 = vld [vmem:[%s11153_s12 + $0x20] sm:$0xf] }
 0x6c0   : > { %5142 = vmatpush.bf16.msra.mxu3 %v7442_v10  ;;  %5444 = vmatpush.bf16.msrb.mxu2 %v7548_v46  ;;  %v7599_v36 = vld [vmem:[%s11153_s12 + $0xf0] sm:$0xf] }
 0x6c1   : > { %v5034_v16 = vadd.f32 %v10550_v29, %v5021_v47  ;;  %5377 = vmatpush.bf16.msra.mxu0 %v7534_v32  ;;  %v8038_v32 = vld [vmem:[%s11153_s12 + $0xd4] sm:$0xf]  ;;  %v7600_v17 = vor.u32 %v8043_v21, %v7599_v36 }
 0x6c2   : > { %v4816_v40 = vpop.f32.mrf.mxu0  ;;  %5391 = vmatpush.bf16.msra.mxu1 %v7530_v23 }
 0x6c3   : > { %v5066_v30 = vadd.f32 %v5062_v41, %v5034_v16  ;;  %v4836_v25 = vadd.f32 %v4816_v40, %v4749_v52  ;;  %v5051_v12 = vrot.slane %v5034_v16, 1 }
 0x6c5   : > { %v4934_v18 = vadd.f32 %v10484_v26, %v4836_v25  ;;  %v8029_v26 = vld [vmem:[%s11153_s12 + $0x84] sm:$0xf0] }
 0x6c6   : > { %v7526_v44 = vor.u32 %v8029_v26, %v7525_v27 }
 0x6c7   : > { %v5022_v1 = vadd.f32 %v10507_v15, %v4934_v18  ;;  %v4565_v15 = vadd.f32 %v10431_v33, %v4478_v34 }
 0x6c8   : > { %5378 = vmatpush.bf16.msra.mxu0 %v7526_v44  ;;  %v8036_v44 = vld [vmem:[%s11153_s12 + $0xc4] sm:$0xf] }
 0x6c9   : > { %v5035_v13 = vadd.f32 %v10550_v29, %v5022_v1  ;;  %v4663_v57 = vadd.f32 %v10452_v5, %v4565_v15  ;;  %v4377_v5 = vadd.f32 %v10438_v37, %v10448_v31  ;;  %v7577_v31 = vld [vmem:[%s11153_s12 + $0xd0] sm:$0xf] }
 0x6ca   : > { %v4819_v0 = vpop.f32.mrf.mxu0 }
 0x6cb   : > { %v5052_v49 = vrot.slane %v5035_v13, 1  ;;  %v4837_v39 = vadd.f32 %v4819_v0, %v10499_v63  ;;  %v8019_v63 = vld [vmem:[%s11153_s12 + $0x34] sm:$0xf0]  ;;  %v4751_v40 = vadd.f32 %v10488_v53, %v4663_v57  ;;  %v8017_v53 = vld [vmem:[%s11153_s12 + $0x24] sm:$0xf0] }
 0x6cc   : > { %v7468_v7 = vor.u32 %v8019_v63, %v7467_v43  ;;  %v7460_v19 = vor.u32 %v8017_v53, %v7459_v54  ;;  %v8046_v54 = vld [vmem:[%s11153_s12 + $0x114] sm:$0xf] }
 0x6cd   : > { %v5053_v33 = vsel %vm860_vm3, %v5051_v12, %v5052_v49  ;;  %v4935_v59 = vadd.f32 %v10490_v56, %v4837_v39  ;;  %v7591_v12 = vld [vmem:[%s11153_s12 + $0xe0] sm:$0xf]  ;;  %v8041_v49 = vld [vmem:[%s11153_s12 + $0xe4] sm:$0xf0] }
 0x6ce   : > { %v5063_v41 = vadd.f32 %v5053_v33, %v5034_v16  ;;  %v5077_v55 = vadd.f32 %v5066_v30, %v5053_v33  ;;  %v4480_v30 = vadd.f32 %v10516_v60, %v4377_v5  ;;  %v8039_v60 = vld [vmem:[%s11153_s12 + $0xd4] sm:$0xf0]  ;;  %v7574_v33 = vor.u32 %v8036_v44, %v7571_v2 }
 0x6cf   : > { %v5023_v47 = vadd.f32 %v10512_v50, %v4935_v59  ;;  %v7578_v8 = vor.u32 %v8039_v60, %v7577_v31 }
 0x6d0   : > { %v5081_v52 = vmul.f32 0.25, %v5077_v55  ;;  %v4567_v34 = vadd.f32 %v10444_v28, %v4480_v30  ;;  %v8037_v28 = vld [vmem:[%s11153_s12 + $0xc4] sm:$0xf0]  ;;  %v8047_v30 = vld [vmem:[%s11153_s12 + $0x114] sm:$0xf0] }
 0x6d1   : > { %v5036_v4 = vadd.f32 %v10550_v29, %v5023_v47  ;;  %v8018_v47 = vld [vmem:[%s11153_s12 + $0x34] sm:$0xf] }
 0x6d2   : > { %v5085_v56 = vmax.f32 %v5081_v52, 0.0  ;;  %v4821_v16 = vpop.f32.mrf.mxu0  ;;  %v4665_v0 = vadd.f32 %v10462_v38, %v4567_v34  ;;  %v8044_v34 = vld [vmem:[%s11153_s12 + $0x104] sm:$0xf] }
 0x6d3   : > { %v5067_v10 = vadd.f32 %v5063_v41, %v5036_v4  ;;  %v4838_v50 = vadd.f32 %v4821_v16, %v4751_v40  ;;  %v5054_v15 = vrot.slane %v5036_v4, 1  ;;  %v7592_v41 = vor.u32 %v8041_v49, %v7591_v12  ;;  %v8016_v16 = vld [vmem:[%s11153_s12 + $0x24] sm:$0xf] }
 0x6d4   : > { %v10671_v25 = vpack.c.bf16 %v5085_v56, %v5085_v56  ;;  %v4753_v43 = vadd.f32 %v10503_v22, %v4665_v0  ;;  %v7621_v22 = vld [vmem:[%s11153_s12 + $0x110] sm:$0xf] }
 0x6d5   : > { %v4936_v37 = vadd.f32 %v10495_v11, %v4838_v50  ;;  %v7579_v11 = vld [vmem:[%s11153_s12 + $0xd8] sm:$0xf0] }
 0x6d6   : > { %v5161_v6 = vunpack.c.l.b16 %v10671_v25  ;;  %7451 = vmatmul.msk.bf16.vlgmr.msrb.gmra.mxu3 %vm5118_vm6, %v10671_v25  ;;  %v7582_v1 = vor.u32 %v8038_v32, %v7579_v11  ;;  %v7622_v32 = vor.u32 %v8047_v30, %v7621_v22  ;;  %v8057_v22 = vld [vmem:[%s11153_s12 + $0x164] sm:$0xf0] }
 0x6d7   : > { %v5024_v58 = vadd.f32 %v10526_v35, %v4936_v37  ;;  %5195 = vmatpush.bf16.msrb.mxu3 %v7468_v7  ;;  %v7569_v35 = vld [vmem:[%s11153_s12 + $0xc0] sm:$0xf] }
 0x6d8   : > { %v5162_v18 = vpack.c.b16 %v5161_v6, %v5161_v6  ;;  %v7570_v46 = vor.u32 %v8037_v28, %v7569_v35  ;;  %v8051_v6 = vld [vmem:[%s11153_s12 + $0x134] sm:$0xf0]  ;;  %v7635_v28 = vld [vmem:[%s11153_s12 + $0x120] sm:$0xf] }
 0x6d9   : > { %v5037_v62 = vadd.f32 %v10550_v29, %v5024_v58  ;;  %v8045_v58 = vld [vmem:[%s11153_s12 + $0x104] sm:$0xf0] }
 0x6da   : > { %v10710_v27 = vshrl.u32 %v5162_v18, 16  ;;  %v4824_v26 = vpop.f32.mrf.mxu0  ;;  %v5226_v42 = vrot.slane %v5162_v18, 1  ;;  %v7615_v18 = vld [vmem:[%s11153_s12 + $0x108] sm:$0xf0] }
 0x6db   : > { %v5055_v13 = vrot.slane %v5037_v62, 1  ;;  %v4839_v23 = vadd.f32 %v4824_v26, %v10514_v9  ;;  %5196 = vmatpush.bf16.msrb.mxu3 %v7460_v19  ;;  %v8049_v26 = vld [vmem:[%s11153_s12 + $0x124] sm:$0xf0]  ;;  %v7618_v44 = vor.u32 %v8044_v34, %v7615_v18  ;;  %v7731_v18 = vld [vmem:[%s11153_s12 + $0x1b0] sm:$0xf] }
 0x6dc   : > { %7495 = vmatmul.msk.bf16.vlgmr.msrb.gmra.mxu0 %vm5118_vm6, %v5226_v42  ;;  %7496 = vmatmul.msk.bf16.vlgmr.msrb.gmra.mxu1 %vm5118_vm6, %v5226_v42  ;;  %v5287_v61 = vrot.slane %v10710_v27, 1 }
 0x6dd   : > { %v5056_v9 = vsel %vm860_vm3, %v5054_v15, %v5055_v13  ;;  %v4937_v39 = vadd.f32 %v10505_v14, %v4839_v23  ;;  %5504 = vmatpush.bf16.msrb.mxu0 %v7578_v8  ;;  %5517 = vmatpush.bf16.msrb.mxu1 %v7582_v1  ;;  %v7469_v14 = vld [vmem:[%s11153_s12 + $0x38] sm:$0xf0]  ;;  %v7636_v13 = vor.u32 %v8049_v26, %v7635_v28  ;;  %v8026_v23 = vld [vmem:[%s11153_s12 + $0x74] sm:$0xf]  ;;  %v8060_v28 = vld [vmem:[%s11153_s12 + $0x184] sm:$0xf] }
 0x6de   : > { %v5064_v59 = vadd.f32 %v5056_v9, %v5036_v4  ;;  %v5078_v57 = vadd.f32 %v5067_v10, %v5056_v9  ;;  %7517 = vmatmul.msk.bf16.vlgmr.msra.gmra.mxu2 %vm5118_vm6, %v5287_v61  ;;  %v7472_v5 = vor.u32 %v8018_v47, %v7469_v14  ;;  %v7461_v10 = vld [vmem:[%s11153_s12 + $0x28] sm:$0xf0]  ;;  %v7687_v47 = vld [vmem:[%s11153_s12 + $0x170] sm:$0xf]  ;;  %v8059_v14 = vld [vmem:[%s11153_s12 + $0x174] sm:$0xf0] }
 0x6df   : > { %v5025_v38 = vadd.f32 %v10530_v48, %v4937_v39  ;;  %5565 = vmatpush.bf16.msra.mxu2 %v7600_v17  ;;  %v7464_v37 = vor.u32 %v8016_v16, %v7461_v10  ;;  %v7513_v17 = vld [vmem:[%s11153_s12 + $0x78] sm:$0xf0]  ;;  %v7505_v39 = vld [vmem:[%s11153_s12 + $0x68] sm:$0xf0] }
 0x6e0   : > { %v5082_v55 = vmul.f32 0.25, %v5078_v57  ;;  %v7516_v9 = vor.u32 %v8026_v23, %v7513_v17  ;;  %v8054_v57 = vld [vmem:[%s11153_s12 + $0x154] sm:$0xf]  ;;  %v7703_v26 = vld [vmem:[%s11153_s12 + $0x188] sm:$0xf0] }
 0x6e1   : > { %v5038_v52 = vadd.f32 %v10550_v29, %v5025_v38  ;;  %5505 = vmatpush.bf16.msrb.mxu0 %v7570_v46  ;;  %5518 = vmatpush.bf16.msrb.mxu1 %v7574_v33  ;;  %v7667_v38 = vld [vmem:[%s11153_s12 + $0x158] sm:$0xf0]  ;;  %v8042_v17 = vld [vmem:[%s11153_s12 + $0xf4] sm:$0xf] }
 0x6e2   : > { %v5086_v63 = vmax.f32 %v5082_v55, 0.0  ;;  %v4826_v4 = vpop.f32.mrf.mxu0 }
 0x6e3   : > { %v5068_v48 = vadd.f32 %v5064_v59, %v5038_v52  ;;  %v4840_v40 = vadd.f32 %v4826_v4, %v4753_v43  ;;  %5566 = vmatpush.bf16.msra.mxu2 %v7592_v41  ;;  %v5057_v36 = vrot.slane %v5038_v52, 1  ;;  %v8055_v59 = vld [vmem:[%s11153_s12 + $0x154] sm:$0xf0]  ;;  %v7657_v4 = vld [vmem:[%s11153_s12 + $0x140] sm:$0xf] }
 0x6e4   : > { %v5090_v56 = vpack.c.bf16 %v5086_v63, %v5086_v63  ;;  %v7670_v63 = vor.u32 %v8054_v57, %v7667_v38 }
 0x6e5   : > { %v4938_v50 = vadd.f32 %v10510_v3, %v4840_v40  ;;  %v7623_v3 = vld [vmem:[%s11153_s12 + $0x118] sm:$0xf0]  ;;  %v5065_v0 = vadd.f32 %v5057_v36, %v5038_v52  ;;  %v8052_v40 = vld [vmem:[%s11153_s12 + $0x144] sm:$0xf] }
 0x6e6   : > { %v5409_v7 = vunpack.c.l.b16 %v5090_v56  ;;  %7452 = vmatmul.msk.bf16.vlgmr.msra.gmra.mxu3 %vm5118_vm6, %v10671_v25  ;;  %v7643_v25 = vld [vmem:[%s11153_s12 + $0x130] sm:$0xf]  ;;  %v7626_v11 = vor.u32 %v8046_v54, %v7623_v3 }
 0x6e7   : > { %v5026_v53 = vadd.f32 %v10536_v24, %v4938_v50  ;;  %5208 = vmatpush.bf16.msra.mxu3 %v7472_v5  ;;  %v7613_v24 = vld [vmem:[%s11153_s12 + $0x100] sm:$0xf]  ;;  %v7644_v8 = vor.u32 %v8051_v6, %v7643_v25  ;;  %v7659_v5 = vld [vmem:[%s11153_s12 + $0x148] sm:$0xf0]  ;;  %v8032_v6 = vld [vmem:[%s11153_s12 + $0xa4] sm:$0xf] }
 0x6e8   : > { %v10765_v31 = vpack.c.b16 %v5409_v7, %v5409_v7  ;;  %v7614_v35 = vor.u32 %v8045_v58, %v7613_v24  ;;  %v7679_v50 = vld [vmem:[%s11153_s12 + $0x160] sm:$0xf]  ;;  %v7662_v30 = vor.u32 %v8052_v40, %v7659_v5  ;;  %v8062_v24 = vld [vmem:[%s11153_s12 + $0x194] sm:$0xf]  ;;  %v7711_v58 = vld [vmem:[%s11153_s12 + $0x198] sm:$0xf0] }
 0x6e9   : > { %v5039_v60 = vadd.f32 %v10550_v29, %v5026_v53  ;;  %v7680_v54 = vor.u32 %v8057_v22, %v7679_v50  ;;  %v8034_v53 = vld [vmem:[%s11153_s12 + $0xb4] sm:$0xf]  ;;  %v7645_v22 = vld [vmem:[%s11153_s12 + $0x138] sm:$0xf0] }
 0x6ea   : > { %v4829_v19 = vpop.f32.mrf.mxu0  ;;  %v10790_v1 = vshrl.u32 %v10765_v31, 16  ;;  %v5474_v52 = vrot.slane %v10765_v31, 1  ;;  %v8050_v50 = vld [vmem:[%s11153_s12 + $0x134] sm:$0xf] }
 0x6eb   : > { %v5072_v21 = vrot.slane %v5039_v60, 1  ;;  %v4841_v62 = vadd.f32 %v4829_v19, %v10532_v51  ;;  %5209 = vmatpush.bf16.msra.mxu3 %v7464_v37  ;;  %v7557_v37 = vld [vmem:[%s11153_s12 + $0xb8] sm:$0xf0]  ;;  %v7549_v60 = vld [vmem:[%s11153_s12 + $0xa8] sm:$0xf0] }
 0x6ec   : > { %7539 = vmatmul.msk.bf16.vlgmr.msra.gmra.mxu0 %vm5118_vm6, %v5090_v56  ;;  %7540 = vmatmul.msk.bf16.vlgmr.msra.gmra.mxu1 %vm5118_vm6, %v5090_v56  ;;  %v7688_v56 = vor.u32 %v8059_v14, %v7687_v47  ;;  %v5535_v10 = vrot.slane %v10790_v1, 1  ;;  %v7560_v31 = vor.u32 %v8034_v53, %v7557_v37  ;;  %v7552_v19 = vor.u32 %v8032_v6, %v7549_v60  ;;  %v8069_v47 = vld [vmem:[%s11153_s12 + $0x1c4] sm:$0xf0]  ;;  %v7747_v14 = vld [vmem:[%s11153_s12 + $0x1c8] sm:$0xf0] }
 0x6ed   : > { %v5073_v51 = vsel %vm860_vm3, %v5057_v36, %v5072_v21  ;;  %v4939_v42 = vadd.f32 %v10524_v20, %v4841_v62  ;;  %5625 = vmatpush.bf16.msra.mxu0 %v7622_v32  ;;  %5638 = vmatpush.bf16.msra.mxu1 %v7626_v11  ;;  %v7709_v32 = vld [vmem:[%s11153_s12 + $0x190] sm:$0xf]  ;;  %v8063_v11 = vld [vmem:[%s11153_s12 + $0x194] sm:$0xf0]  ;;  %v7714_v62 = vor.u32 %v8062_v24, %v7711_v58  ;;  %v7689_v6 = vld [vmem:[%s11153_s12 + $0x178] sm:$0xf0] }
 0x6ee   : > { %v5079_v2 = vadd.f32 %v5073_v51, %v5068_v48  ;;  %7561 = vmatmul.msk.bf16.vlgmr.msrb.gmra.mxu2 %vm5118_vm6, %v10790_v1  ;;  %v8053_v48 = vld [vmem:[%s11153_s12 + $0x144] sm:$0xf0]  ;;  %v8067_v36 = vld [vmem:[%s11153_s12 + $0x1b4] sm:$0xf0]  ;;  %v7710_v21 = vor.u32 %v8063_v11, %v7709_v32  ;;  %v8056_v32 = vld [vmem:[%s11153_s12 + $0x164] sm:$0xf] }
 0x6ef   : > { %v5027_v15 = vadd.f32 %v10542_v45, %v4939_v42  ;;  %5691 = vmatpush.bf16.msrb.mxu2 %v7644_v8  ;;  %v8024_v45 = vld [vmem:[%s11153_s12 + $0x64] sm:$0xf]  ;;  %v7658_v7 = vor.u32 %v8053_v48, %v7657_v4  ;;  %v7701_v8 = vld [vmem:[%s11153_s12 + $0x180] sm:$0xf]  ;;  %v7732_v51 = vor.u32 %v8067_v36, %v7731_v18  ;;  %v8073_v48 = vld [vmem:[%s11153_s12 + $0x1e4] sm:$0xf0] }
 0x6f0   : > { %v7508_v41 = vor.u32 %v8024_v45, %v7505_v39  ;;  %v5083_v55 = vmul.f32 0.25, %v5079_v2  ;;  %v8065_v2 = vld [vmem:[%s11153_s12 + $0x1a4] sm:$0xf0]  ;;  %v8070_v45 = vld [vmem:[%s11153_s12 + $0x1d4] sm:$0xf] }
 0x6f1   : > { %v5040_v20 = vadd.f32 %v10550_v29, %v5027_v15  ;;  %5626 = vmatpush.bf16.msra.mxu0 %v7614_v35  ;;  %5639 = vmatpush.bf16.msra.mxu1 %v7618_v44  ;;  %v7665_v29 = vld [vmem:[%s11153_s12 + $0x150] sm:$0xf]  ;;  %v8061_v35 = vld [vmem:[%s11153_s12 + $0x184] sm:$0xf0]  ;;  %v7723_v44 = vld [vmem:[%s11153_s12 + $0x1a0] sm:$0xf] }
 0x6f2   : > { %v4831_v46 = vpop.f32.mrf.mxu0  ;;  %v7666_v43 = vor.u32 %v8055_v59, %v7665_v29  ;;  %v5087_v16 = vmax.f32 %v5083_v55, 0.0  ;;  %v7702_v15 = vor.u32 %v8061_v35, %v7701_v8  ;;  %v7724_v23 = vor.u32 %v8065_v2, %v7723_v44  ;;  %v7755_v39 = vld [vmem:[%s11153_s12 + $0x1d8] sm:$0xf0]  ;;  %v7745_v55 = vld [vmem:[%s11153_s12 + $0x1c0] sm:$0xf] }
 0x6f3   : > { %v5069_v12 = vadd.f32 %v5065_v0, %v5040_v20  ;;  %v5074_v49 = vrot.slane %v5040_v20, 1  ;;  %5692 = vmatpush.bf16.msrb.mxu2 %v7636_v13  ;;  %v7706_v13 = vor.u32 %v8060_v28, %v7703_v26  ;;  %v7601_v20 = vld [vmem:[%s11153_s12 + $0xf8] sm:$0xf0]  ;;  %v8040_v46 = vld [vmem:[%s11153_s12 + $0xe4] sm:$0xf]  ;;  %v7746_v40 = vor.u32 %v8069_v47, %v7745_v55 }
 0x6f4   : > { %v5091_v3 = vpack.c.bf16 %v5087_v16, %v5087_v16  ;;  %v7604_v0 = vor.u32 %v8042_v17, %v7601_v20  ;;  %v7767_v4 = vld [vmem:[%s11153_s12 + $0x1e0] sm:$0xf]  ;;  %v7681_v11 = vld [vmem:[%s11153_s12 + $0x168] sm:$0xf0]  ;;  %v8064_v18 = vld [vmem:[%s11153_s12 + $0x1a4] sm:$0xf] }
 0x6f5   : > { %v10816_v33 = vadd.f32 %v5074_v49, %v5069_v12  ;;  %v7593_v12 = vld [vmem:[%s11153_s12 + $0xe8] sm:$0xf0]  ;;  %v7753_v49 = vld [vmem:[%s11153_s12 + $0x1d0] sm:$0xf]  ;;  %v7684_v24 = vor.u32 %v8056_v32, %v7681_v11  ;;  %v7777_v8 = vld [vmem:[%s11153_s12 + $0x1f8] sm:$0xf0] }
 0x6f6   : > { %7473 = vmatmul.msk.bf16.vlgmr.msrb.gmra.mxu3 %vm5118_vm6, %v10710_v27  ;;  %v5657_v25 = vunpack.c.l.b16 %v5091_v3  ;;  %v7596_v29 = vor.u32 %v8040_v46, %v7593_v12  ;;  %v7725_v36 = vld [vmem:[%s11153_s12 + $0x1a8] sm:$0xf0]  ;;  %v8072_v28 = vld [vmem:[%s11153_s12 + $0x1e4] sm:$0xf] }
 0x6f7   : > { %5330 = vmatpush.bf16.msrb.mxu3 %v7516_v9  ;;  %v8071_v9 = vld [vmem:[%s11153_s12 + $0x1d4] sm:$0xf0]  ;;  %v5084_v59 = vmul.f32 0.25, %v10816_v33  ;;  %v8068_v33 = vld [vmem:[%s11153_s12 + $0x1c4] sm:$0xf] }
 0x6f8   : > { %v5658_v34 = vpack.c.b16 %v5657_v25, %v5657_v25  ;;  %v7754_v38 = vor.u32 %v8071_v9, %v7753_v49  ;;  %v7750_v5 = vor.u32 %v8068_v33, %v7747_v14  ;;  %v8058_v25 = vld [vmem:[%s11153_s12 + $0x174] sm:$0xf]  ;;  %v7769_v26 = vld [vmem:[%s11153_s12 + $0x1e8] sm:$0xf0] }
 0x6f9   : > { %v7692_v60 = vor.u32 %v8058_v25, %v7689_v6 }
 0x6fa   : > { %v10909_v42 = vshrl.u32 %v5658_v34, 16  ;;  %v5722_v57 = vrot.slane %v5658_v34, 1  ;;  %v8066_v34 = vld [vmem:[%s11153_s12 + $0x1b4] sm:$0xf] }
 0x6fb   : > { %5331 = vmatpush.bf16.msrb.mxu3 %v7508_v41  ;;  %v7758_v41 = vor.u32 %v8070_v45, %v7755_v39 }
 0x6fc   : > { %7583 = vmatmul.msk.bf16.vlgmr.msrb.gmra.mxu0 %vm5118_vm6, %v5474_v52  ;;  %7584 = vmatmul.msk.bf16.vlgmr.msrb.gmra.mxu1 %vm5118_vm6, %v5474_v52 }
 0x6fd   : > { %5752 = vmatpush.bf16.msrb.mxu0 %v7666_v43  ;;  %5765 = vmatpush.bf16.msrb.mxu1 %v7670_v63  ;;  %v5088_v43 = vmax.f32 %v5084_v59, 0.0  ;;  %v5783_v63 = vrot.slane %v10909_v42, 1 }
 0x6fe   : > { %7605 = vmatmul.msk.bf16.vlgmr.msra.gmra.mxu2 %vm5118_vm6, %v5535_v10 }
 0x6ff   : > { %5813 = vmatpush.bf16.msra.mxu2 %v7688_v56  ;;  %v7768_v56 = vor.u32 %v8073_v48, %v7767_v4  ;;  %v5092_v16 = vpack.c.bf16 %v5088_v43, %v5088_v43 }
 0x701   : > { %5753 = vmatpush.bf16.msrb.mxu0 %v7658_v7  ;;  %5766 = vmatpush.bf16.msrb.mxu1 %v7662_v30  ;;  %v7648_v7 = vor.u32 %v8050_v50, %v7645_v22  ;;  %v5905_v30 = vunpack.c.l.b16 %v5092_v16 }
 0x703   : > { %5814 = vmatpush.bf16.msra.mxu2 %v7680_v54  ;;  %v8048_v54 = vld [vmem:[%s11153_s12 + $0x124] sm:$0xf]  ;;  %v5906_v37 = vpack.c.b16 %v5905_v30, %v5905_v30 }
 0x705   : > { %v5970_v58 = vrot.slane %v5906_v37, 1 }
 0x706   : > { %7474 = vmatmul.msk.bf16.vlgmr.msra.gmra.mxu3 %vm5118_vm6, %v10710_v27  ;;  %v7775_v27 = vld [vmem:[%s11153_s12 + $0x1f0] sm:$0xf] }
 0x707   : > { %5456 = vmatpush.bf16.msra.mxu3 %v7560_v31  ;;  %v5908_v31 = vshrl.u32 %v5906_v37, 16 }
 0x70b   : > { %5457 = vmatpush.bf16.msra.mxu3 %v7552_v19  ;;  %v6031_v19 = vrot.slane %v5908_v31, 1 }
 0x70c   : > { %7627 = vmatmul.msk.bf16.vlgmr.msra.gmra.mxu0 %vm5118_vm6, %v5091_v3  ;;  %7628 = vmatmul.msk.bf16.vlgmr.msra.gmra.mxu1 %vm5118_vm6, %v5091_v3  ;;  %v7637_v3 = vld [vmem:[%s11153_s12 + $0x128] sm:$0xf0] }
 0x70d   : > { %5873 = vmatpush.bf16.msra.mxu0 %v7710_v21  ;;  %5886 = vmatpush.bf16.msra.mxu1 %v7714_v62  ;;  %v7640_v53 = vor.u32 %v8048_v54, %v7637_v3  ;;  %v7728_v21 = vor.u32 %v8064_v18, %v7725_v36  ;;  %v8074_v62 = vld [vmem:[%s11153_s12 + $0x1f4] sm:$0xf] }
 0x70e   : > { %7649 = vmatmul.msk.bf16.vlgmr.msrb.gmra.mxu2 %vm5118_vm6, %v10909_v42  ;;  %v7780_v35 = vor.u32 %v8074_v62, %v7777_v8 }
 0x70f   : > { %5939 = vmatpush.bf16.msrb.mxu2 %v7732_v51  ;;  %v7772_v51 = vor.u32 %v8072_v28, %v7769_v26 }
 0x711   : > { %5874 = vmatpush.bf16.msra.mxu0 %v7702_v15  ;;  %5887 = vmatpush.bf16.msra.mxu1 %v7706_v13 }
 0x713   : > { %5940 = vmatpush.bf16.msrb.mxu2 %v7724_v23 }
 0x716   : > { %7518 = vmatmul.msk.bf16.vlgmr.msrb.gmra.mxu3 %vm5118_vm6, %v5287_v61  ;;  %v8075_v61 = vld [vmem:[%s11153_s12 + $0x1f4] sm:$0xf0] }
 0x717   : > { %5578 = vmatpush.bf16.msrb.mxu3 %v7604_v0  ;;  %v7776_v52 = vor.u32 %v8075_v61, %v7775_v27 }
 0x71b   : > { %5579 = vmatpush.bf16.msrb.mxu3 %v7596_v29 }
 0x71c   : > { %7671 = vmatmul.msk.bf16.vlgmr.msrb.gmra.mxu0 %vm5118_vm6, %v5722_v57  ;;  %7672 = vmatmul.msk.bf16.vlgmr.msrb.gmra.mxu1 %vm5118_vm6, %v5722_v57 }
 0x71d   : > { %6000 = vmatpush.bf16.msrb.mxu0 %v7754_v38  ;;  %6013 = vmatpush.bf16.msrb.mxu1 %v7758_v41 }
 0x71e   : > { %7693 = vmatmul.msk.bf16.vlgmr.msra.gmra.mxu2 %vm5118_vm6, %v5783_v63 }
 0x71f   : > { %6061 = vmatpush.bf16.msra.mxu2 %v7776_v52 }
 0x721   : > { %6001 = vmatpush.bf16.msrb.mxu0 %v7746_v40  ;;  %6014 = vmatpush.bf16.msrb.mxu1 %v7750_v5  ;;  %v5093_v40 = vld [vmem:[%s11154_s13] sm:$0x3] }
 0x723   : > { %6062 = vmatpush.bf16.msra.mxu2 %v7768_v56 }
 0x726   : > { %7562 = vmatmul.msk.bf16.vlgmr.msra.gmra.mxu3 %vm5118_vm6, %v10790_v1  ;;  %v7733_v1 = vld [vmem:[%s11153_s12 + $0x1b8] sm:$0xf0] }
 0x727   : > { %5704 = vmatpush.bf16.msra.mxu3 %v7648_v7 }
 0x72b   : > { %5705 = vmatpush.bf16.msra.mxu3 %v7640_v53 }
 0x72c   : > { %7715 = vmatmul.msk.bf16.vlgmr.msra.gmra.mxu0 %vm5118_vm6, %v5092_v16  ;;  %7716 = vmatmul.msk.bf16.vlgmr.msra.gmra.mxu1 %vm5118_vm6, %v5092_v16 }
 0x72e   : > { %7737 = vmatmul.msk.bf16.vlgmr.msrb.gmra.mxu2 %vm5118_vm6, %v5908_v31 }
 0x736   : > { %7606 = vmatmul.msk.bf16.vlgmr.msrb.gmra.mxu3 %vm5118_vm6, %v5535_v10  ;;  %v7736_v10 = vor.u32 %v8066_v34, %v7733_v1 }
 0x737   : > { %5826 = vmatpush.bf16.msrb.mxu3 %v7692_v60 }
 0x73b   : > { %5827 = vmatpush.bf16.msrb.mxu3 %v7684_v24 }
 0x73c   : > { %7759 = vmatmul.msk.bf16.vlgmr.msrb.gmra.mxu0 %vm5118_vm6, %v5970_v58  ;;  %7760 = vmatmul.msk.bf16.vlgmr.msrb.gmra.mxu1 %vm5118_vm6, %v5970_v58 }
 0x73e   : > { %7781 = vmatmul.msk.bf16.vlgmr.msra.gmra.mxu2 %vm5118_vm6, %v6031_v19 }
 0x746   : > { %7650 = vmatmul.msk.bf16.vlgmr.msra.gmra.mxu3 %vm5118_vm6, %v10909_v42 }
 0x747   : > { %5952 = vmatpush.bf16.msra.mxu3 %v7736_v10 }
 0x74b   : > { %5953 = vmatpush.bf16.msra.mxu3 %v7728_v21 }
 0x756   : > { %7694 = vmatmul.msk.bf16.vlgmr.msrb.gmra.mxu3 %vm5118_vm6, %v5783_v63 }
 0x757   : > { %6074 = vmatpush.bf16.msrb.mxu3 %v7780_v35 }
 0x759   : > { %v5131_v42 = vpop.f32.mrf.mxu3  ;;  %v5259_v44 = vpop.f32.mrf.mxu0 }
 0x75a   : > { %v5272_v2 = vpop.f32.mrf.mxu1 }
 0x75b   : > { %v5278_v15 = vrot.slane %v5272_v2, 7  ;;  %6075 = vmatpush.bf16.msrb.mxu3 %v7772_v51 }
 0x75d   : > { %v5279_v13 = vsel %vm5151_vm7, %v5259_v44, %v5278_v15 }
 0x761   : > { %v5133_v23 = vpop.f32.mrf.mxu3  ;;  %v5261_v17 = vpop.f32.mrf.mxu0 }
 0x762   : > { %v5274_v20 = vpop.f32.mrf.mxu1  ;;  %v5320_v0 = vpop.f32.mrf.mxu2 }
 0x766   : > { %7738 = vmatmul.msk.bf16.vlgmr.msra.gmra.mxu3 %vm5118_vm6, %v5908_v31 }
 0x769   : > { %v5144_v46 = vpop.f32.mrf.mxu3  ;;  %v5380_v12 = vpop.f32.mrf.mxu0 }
 0x76a   : > { %v5150_v49 = vrot.slane %v5144_v46, 7  ;;  %v5322_v9 = vpop.f32.mrf.mxu2  ;;  %v5393_v45 = vpop.f32.mrf.mxu1 }
 0x76b   : > { %v5399_v39 = vrot.slane %v5393_v45, 7 }
 0x76c   : > { %v5152_v29 = vsel %vm5151_vm7, %v5131_v42, %v5150_v49 }
 0x76d   : > { %v5400_v59 = vsel %vm5151_vm7, %v5380_v12, %v5399_v39  ;;  %v5154_v7 = vadd.f32 %v5152_v29, %v5093_v40 }
 0x771   : > { %v5146_v27 = vpop.f32.mrf.mxu3  ;;  %v5382_v61 = vpop.f32.mrf.mxu0 }
 0x772   : > { %v5395_v57 = vpop.f32.mrf.mxu1  ;;  %v5446_v38 = vpop.f32.mrf.mxu2 }
 0x776   : > { %7782 = vmatmul.msk.bf16.vlgmr.msrb.gmra.mxu3 %vm5118_vm6, %v6031_v19 }
 0x779   : > { %v5198_v41 = vpop.f32.mrf.mxu3  ;;  %v5507_v55 = vpop.f32.mrf.mxu0 }
 0x77a   : > { %v5448_v47 = vpop.f32.mrf.mxu2  ;;  %v5520_v33 = vpop.f32.mrf.mxu1 }
 0x77b   : > { %v5526_v14 = vrot.slane %v5520_v33, 7 }
 0x77d   : > { %v5527_v52 = vsel %vm5151_vm7, %v5507_v55, %v5526_v14  ;;  %v8091_v55 = vld [vmem:[%s11155_s14 + $0x78] sm:$0xff] }
 0x77e   : > { %6237 = vmatpush.bf16.msra.mxu1 %v8091_v55 }
 0x781   : > { %v5200_v43 = vpop.f32.mrf.mxu3  ;;  %v5509_v63 = vpop.f32.mrf.mxu0 }
 0x782   : > { %v5522_v4 = vpop.f32.mrf.mxu1  ;;  %v5568_v48 = vpop.f32.mrf.mxu2  ;;  %v8090_v43 = vld [vmem:[%s11155_s14 + $0x70] sm:$0xff] }
 0x783   : > { %6238 = vmatpush.bf16.msra.mxu1 %v8090_v43 }
 0x789   : > { %v5211_v5 = vpop.f32.mrf.mxu3  ;;  %v5628_v56 = vpop.f32.mrf.mxu0 }
 0x78a   : > { %v5217_v16 = vrot.slane %v5211_v5, 7  ;;  %v5570_v50 = vpop.f32.mrf.mxu2  ;;  %v5641_v22 = vpop.f32.mrf.mxu1  ;;  %v8081_v5 = vld [vmem:[%s11155_s14 + $0x28] sm:$0xff] }
 0x78b   : > { %v5647_v30 = vrot.slane %v5641_v22, 7  ;;  %v8080_v22 = vld [vmem:[%s11155_s14 + $0x20] sm:$0xff] }
 0x78c   : > { %v5218_v54 = vsel %vm5151_vm7, %v5198_v41, %v5217_v16 }
 0x78d   : > { %v5220_v3 = vadd.f32 %v5218_v54, %v5154_v7  ;;  %v5648_v53 = vsel %vm5151_vm7, %v5628_v56, %v5647_v30  ;;  %v8089_v56 = vld [vmem:[%s11155_s14 + $0x68] sm:$0xff]  ;;  %v8088_v7 = vld [vmem:[%s11155_s14 + $0x60] sm:$0xff]  ;;  %v8079_v30 = vld [vmem:[%s11155_s14 + $0x18] sm:$0xff] }
 0x78e   : > { %6239 = vmatpush.bf16.msra.mxu1 %v8089_v56  ;;  %v8087_v54 = vld [vmem:[%s11155_s14 + $0x58] sm:$0xff] }
 0x78f   : > { %v5281_v37 = vadd.f32 %v5279_v13, %v5220_v3 }
 0x791   : > { %v5213_v31 = vpop.f32.mrf.mxu3  ;;  %v5630_v25 = vpop.f32.mrf.mxu0 }
 0x792   : > { %v5643_v6 = vpop.f32.mrf.mxu1  ;;  %v5694_v60 = vpop.f32.mrf.mxu2  ;;  %6240 = vmatpush.bf16.msra.mxu1 %v8088_v7 }
 0x796   : > { %6241 = vmatpush.bf16.msra.mxu1 %v8087_v54 }
 0x799   : > { %v5333_v32 = vpop.f32.mrf.mxu3  ;;  %v5755_v11 = vpop.f32.mrf.mxu0 }
 0x79a   : > { %v5339_v24 = vrot.slane %v5333_v32, 7  ;;  %v5696_v58 = vpop.f32.mrf.mxu2  ;;  %v5768_v19 = vpop.f32.mrf.mxu1  ;;  %v8085_v32 = vld [vmem:[%s11155_s14 + $0x48] sm:$0xff] }
 0x79b   : > { %v5774_v34 = vrot.slane %v5768_v19, 7  ;;  %v8076_v58 = vld [vmem:[%s11155_s14] sm:$0xff] }
 0x79c   : > { %v5340_v1 = vsel %vm5151_vm7, %v5320_v0, %v5339_v24  ;;  %v8084_v19 = vld [vmem:[%s11155_s14 + $0x40] sm:$0xff] }
 0x79d   : > { %v5342_v10 = vadd.f32 %v5340_v1, %v5281_v37  ;;  %v5775_v18 = vsel %vm5151_vm7, %v5755_v11, %v5774_v34  ;;  %v8086_v37 = vld [vmem:[%s11155_s14 + $0x50] sm:$0xff] }
 0x79e   : > { %6242 = vmatpush.bf16.msra.mxu1 %v8086_v37 }
 0x79f   : > { %v5402_v36 = vadd.f32 %v5400_v59, %v5342_v10 }
 0x7a1   : > { %v5335_v21 = vpop.f32.mrf.mxu3  ;;  %v5757_v62 = vpop.f32.mrf.mxu0 }
 0x7a2   : > { %v5770_v8 = vpop.f32.mrf.mxu1  ;;  %v5816_v35 = vpop.f32.mrf.mxu2  ;;  %6243 = vmatpush.bf16.msra.mxu1 %v8085_v32 }
 0x7a6   : > { %6244 = vmatpush.bf16.msra.mxu1 %v8084_v19 }
 0x7a9   : > { %v5459_v28 = vpop.f32.mrf.mxu3  ;;  %v5876_v26 = vpop.f32.mrf.mxu0 }
 0x7aa   : > { %v5465_v51 = vrot.slane %v5459_v28, 7  ;;  %v5818_v42 = vpop.f32.mrf.mxu2  ;;  %v5889_v44 = vpop.f32.mrf.mxu1 }
 0x7ab   : > { %v5895_v2 = vrot.slane %v5889_v44, 7 }
 0x7ac   : > { %v5466_v15 = vsel %vm5151_vm7, %v5446_v38, %v5465_v51  ;;  %v8083_v38 = vld [vmem:[%s11155_s14 + $0x38] sm:$0xff] }
 0x7ad   : > { %v5468_v13 = vadd.f32 %v5466_v15, %v5402_v36  ;;  %v5896_v23 = vsel %vm5151_vm7, %v5876_v26, %v5895_v2  ;;  %6224 = vmatpush.bf16.msra.mxu0 %v8083_v38 }
 0x7af   : > { %v5529_v17 = vadd.f32 %v5527_v52, %v5468_v13  ;;  %v8082_v52 = vld [vmem:[%s11155_s14 + $0x30] sm:$0xff] }
 0x7b1   : > { %v5461_v20 = vpop.f32.mrf.mxu3  ;;  %v5878_v0 = vpop.f32.mrf.mxu0  ;;  %6225 = vmatpush.bf16.msra.mxu0 %v8082_v52 }
 0x7b2   : > { %v5891_v46 = vpop.f32.mrf.mxu1  ;;  %v5942_v12 = vpop.f32.mrf.mxu2 }
 0x7b5   : > { %6226 = vmatpush.bf16.msra.mxu0 %v8081_v5 }
 0x7b9   : > { %v5581_v49 = vpop.f32.mrf.mxu3  ;;  %v6003_v9 = vpop.f32.mrf.mxu0  ;;  %6227 = vmatpush.bf16.msra.mxu0 %v8080_v22 }
 0x7ba   : > { %v5587_v45 = vrot.slane %v5581_v49, 7  ;;  %v5944_v39 = vpop.f32.mrf.mxu2  ;;  %v6016_v29 = vpop.f32.mrf.mxu1 }
 0x7bb   : > { %v6022_v1 = vrot.slane %v6016_v29, 7 }
 0x7bc   : > { %v5588_v59 = vsel %vm5151_vm7, %v5568_v48, %v5587_v45 }
 0x7bd   : > { %v5590_v27 = vadd.f32 %v5588_v59, %v5529_v17  ;;  %6228 = vmatpush.bf16.msra.mxu0 %v8079_v30  ;;  %v6023_v21 = vsel %vm5151_vm7, %v6003_v9, %v6022_v1  ;;  %v6127_v17 = vld [vmem:[%s11156_s15] sm:$0x1] }
 0x7bf   : > { %v5650_v61 = vadd.f32 %v5648_v53, %v5590_v27  ;;  %v8078_v53 = vld [vmem:[%s11155_s14 + $0x10] sm:$0xff] }
 0x7c1   : > { %v5583_v57 = vpop.f32.mrf.mxu3  ;;  %v6005_v41 = vpop.f32.mrf.mxu0  ;;  %6229 = vmatpush.bf16.msra.mxu0 %v8078_v53 }
 0x7c2   : > { %v6018_v47 = vpop.f32.mrf.mxu1  ;;  %v6064_v33 = vpop.f32.mrf.mxu2 }
 0x7c9   : > { %v5707_v14 = vpop.f32.mrf.mxu3 }
 0x7ca   : > { %v5713_v63 = vrot.slane %v5707_v14, 7  ;;  %v6066_v4 = vpop.f32.mrf.mxu2 }
 0x7cc   : > { %v5714_v48 = vsel %vm5151_vm7, %v5694_v60, %v5713_v63  ;;  %v8077_v60 = vld [vmem:[%s11155_s14 + $0x8] sm:$0xff] }
 0x7cd   : > { %v5716_v40 = vadd.f32 %v5714_v48, %v5650_v61  ;;  %6230 = vmatpush.bf16.msra.mxu0 %v8077_v60 }
 0x7cf   : > { %v5777_v16 = vadd.f32 %v5775_v18, %v5716_v40 }
 0x7d1   : > { %v5709_v50 = vpop.f32.mrf.mxu3  ;;  %6231 = vmatpush.bf16.msra.mxu0 %v8076_v58 }
 0x7d9   : > { %v5829_v3 = vpop.f32.mrf.mxu3 }
 0x7da   : > { %v5835_v31 = vrot.slane %v5829_v3, 7 }
 0x7dc   : > { %v5836_v25 = vsel %vm5151_vm7, %v5816_v35, %v5835_v31 }
 0x7dd   : > { %v5838_v6 = vadd.f32 %v5836_v25, %v5777_v16 }
 0x7df   : > { %v5898_v11 = vadd.f32 %v5896_v23, %v5838_v6 }
 0x7e1   : > { %v5831_v24 = vpop.f32.mrf.mxu3 }
 0x7e9   : > { %v5955_v34 = vpop.f32.mrf.mxu3 }
 0x7ea   : > { %v5961_v10 = vrot.slane %v5955_v34, 7 }
 0x7ec   : > { %v5962_v18 = vsel %vm5151_vm7, %v5942_v12, %v5961_v10 }
 0x7ed   : > { %v5964_v36 = vadd.f32 %v5962_v18, %v5898_v11 }
 0x7ef   : > { %v6025_v62 = vadd.f32 %v6023_v21, %v5964_v36 }
 0x7f1   : > { %v5957_v8 = vpop.f32.mrf.mxu3 }
 0x7f9   : > { %v6077_v35 = vpop.f32.mrf.mxu3 }
 0x7fa   : > { %v6083_v28 = vrot.slane %v6077_v35, 7 }
 0x7fc   : > { %v6084_v26 = vsel %vm5151_vm7, %v6064_v33, %v6083_v28 }
 0x7fd   : > { %v6086_v51 = vadd.f32 %v6084_v26, %v6025_v62 }
 0x7ff   : > { %v6087_v42 = vmax.f32 %v6086_v51, 0.0 }
 0x801   : > { %v6089_v44 = vperm.slane %v6087_v42, 0  ;;  %v6090_v2 = vperm.slane %v6087_v42, 1  ;;  %v6079_v15 = vpop.f32.mrf.mxu3 }
 0x803   : > { %v6093_v13 = vpack.c.bf16 %v6089_v44, %v6089_v44  ;;  %v6094_v23 = vpack.c.bf16 %v6090_v2, %v6090_v2 }
 0x805   : > { %6232 = vmatmul.bf16.vlgmr.msra.gmra.mxu0 %v6093_v13  ;;  %6245 = vmatmul.bf16.vlgmr.msra.gmra.mxu1 %v6094_v23 }
 0x882   : > { %v6233_v20 = vpop.f32.mrf.mxu0  ;;  %v6246_v0 = vpop.f32.mrf.mxu1 }
 0x883   : > { %v6234_v46 = vadd.f32 %v6233_v20, %v6127_v17 }
 0x885   : > { %v6247_v12 = vadd.f32 %v6246_v0, %v6234_v46 }
 0x887   : > { %v6250_v49 = vsub.f32 0.0, %v6247_v12 }
 0x889   : > { %v6251_v9 = vmul.f32 1.442695, %v6250_v49 }
 0x88a   : > { %v6235_v45 = vpop.f32.mrf.mxu0  ;;  %v6248_v39 = vpop.f32.mrf.mxu1 }
 0x88b   : > { %8143 = vpow2.f32 %v6251_v9 }
 0x891   : > { %v8144_v29 = vpop.eup %8143 }
 0x892   : > { %v6253_v59 = vadd.f32 1.0, %v8144_v29 }
 0x894   : > { %8145 = vrcp.f32 %v6253_v59  ;;  %v6265_v41 = vand.u32 2147483648, %v6253_v59  ;;  %v6263_v55 = vand.u32 2147483647, %v6253_v59  ;;  %vm6259_vm9 = vweird.f32 %v6253_v59 }
 0x896   : > { %v6266_v33 = vor.u32 1.1754944e-38, %v6265_v41  ;;  %vm6264_vm11 = vcmp.eq.f32.partialorder %v6263_v55, 8.507059e+37 }
 0x89a   : > { %v8146_v27 = vpop.eup %8145 }
 0x89b   : > { %v6255_v61 = vmul.f32 %v8146_v27, %v6253_v59  ;;  %vm6260_vm8 = vweird.f32 %v8146_v27 }
 0x89c   : > { %vm6261_vm10 = vmor %vm6259_vm9, %vm6260_vm8 }
 0x89d   : > { %v6256_v57 = vsub.f32 1.0, %v6255_v61 }
 0x89f   : > { %v6257_v38 = vmul.f32 %v8146_v27, %v6256_v57 }
 0x8a1   : > { %v6258_v47 = vadd.f32 %v8146_v27, %v6257_v38 }
 0x8a3   : > { %v6262_v14 = vsel %vm6261_vm10, %v8146_v27, %v6258_v47 }
 0x8a4   : > { %v6267_v52 = vsel %vm6264_vm11, %v6266_v33, %v6262_v14 }
 0x8a5   : > { %6269 = vst [vmem:[%s546_s19] sm:$0x1] %v6267_v52 }
 0x8a6   : > { %8174 = shalt.err (!%p8171_p3)
}
 0x8a7   : > { %8096 = dma.vmem_to_hbm [thread:$0]  (%p8335_p5), %s6282_s30, 16, %s6284_s18, %s6271_s20  }
 0x8a8 PF: > { %s11244_s17 = sld [smem:[#allocation5_spill]]  ;;  %p8102_p4 = scmp.ge.s32.totalorder %s8209_s24, 2 }
 0x8aa   : > { %p8099_p7 = pnand %p8102_p4, %p8339_p6 }
 0x8ac   : > { %p8100_p8 = pneg %p8099_p7 }
 0x8ae   : > { %s6295_s1 = sand.u32 1, %s11244_s17  }
 0x8af   : > { %s6296_s23 = scalar_lea.sflag [#allocation3], %s6295_s1 }
 0x8b0   : > { %8192 = dma.done.wait (%p8100_p8), %s6296_s23, 16  }
 0x8b1   : > { %8194 = vsyncadd (%p8100_p8), %s6296_s23, 4294967280  ;;  %s11246_s24 = sld [smem:[#allocation7_spill]]  ;;  %s11249_s21 = smov %s8201_s22 }
 0x8b2   : > { %s11247_s25 = sld [smem:[#allocation6_spill]] }
 0x8b3   : > { %s11248_s23 = sld [smem:[#allocation8_spill]] }
 0x8b7   : > { %p26_p9 = scmp.ge.s32.totalorder %s11246_s24, 4  }
 0x8b8   : > { %s11250_s22 = smov %s11247_s25 }
 0x8b9   :  { %28 = sbr.rel (!%p26_p9) target bundleno = 6 (0x6), region = 167 }
 0x8be   :  { %6301 = vsyncpa [#allocation3], 1 }
 0x8bf   :  { %6303 = vsyncpa [#allocation3 + $0x1], 1 }

</bundles_post_ra>
